<compile_context>
chip_gen: v7x
topology: tpu7x:2x2x1
jax: 0.10.0
libtpu: 0.0.40
codegen_flags: <defaults>
</compile_context>

<pallas_src>
import functools
import math

import jax
import jax.numpy as jnp
from jax.experimental import pallas as pl
from jax.experimental.pallas import tpu as pltpu


# ----------------------------------------------------------------------------
# Fused forward kernel (embedding + encoder layers + decoder + FC + softmax + CE)
# ----------------------------------------------------------------------------
def _make_focus_kernel(L, Ns, N_full, E, Hd, H, T, V, num_layer):
    G = 8 * Hd           # fused bidirectional gate width per encoder layer
    W2 = 2 * Hd          # bidirectional feature width (== H for num_layer == 2)
    f32 = jnp.float32
    bf16 = jnp.bfloat16

    def mxu(a, b):
        # bf16 MXU operands, f32 accumulate; element-wise math stays f32.
        return jnp.dot(a.astype(bf16), b.astype(bf16), preferred_element_type=f32)

    def kernel(*refs):
        ids_ref, lab_ref, emb_ref = refs[:3]
        enc_refs = refs[3:3 + 3 * num_layer]
        (dwih_ref, dwhh_ref, db_ref, ow_ref, ob_ref,
         prob_ref, loss_ref,
         gx_scr, gmix_scr, henc_scr, genc_scr) = refs[3 + 3 * num_layer:]

        # forward-direction gate columns of the gate-interleaved fused layout
        col_g = jax.lax.broadcasted_iota(jnp.int32, (Ns, G), 1)
        fwd_cols = (col_g % W2) < Hd                             # (Ns, G) bool

        # ------------------------------------------------------------------
        # Embedding lookup inside the kernel: one-hot(ids) @ embed.
        # ids rows are time-major: row s*Ns + n == (time s, shard-batch n).
        # ------------------------------------------------------------------
        lane_v = jax.lax.broadcasted_iota(jnp.int32, (L * Ns, V), 1)
        oh_ids = (lane_v == ids_ref[...]).astype(bf16)           # exact 0/1
        x_flat = mxu(oh_ids, emb_ref[...])                       # (L*Ns, E)

        # ------------------------------------------------------------------
        # Encoder: num_layer fused bidirectional LSTM layers.
        # ------------------------------------------------------------------
        h_cat = None
        for l in range(num_layer):
            wih_ref, whh_ref, b_ref = enc_refs[3 * l:3 * l + 3]
            bias = b_ref[...]                                    # (1, G) f32
            whh_bf = whh_ref[...].astype(bf16)                   # (W2, G)

            # hoisted input projection for ALL timesteps: one MXU pass
            src = x_flat if l == 0 else henc_scr[...]
            gx_scr[...] = mxu(src, wih_ref[...]) + bias          # (L*Ns, G)

            # hoist the fwd/bwd time mix off the serial recurrence
            for s in range(L):
                gmix_scr[s * Ns:(s + 1) * Ns, :] = jnp.where(
                    fwd_cols,
                    gx_scr[s * Ns:(s + 1) * Ns, :],
                    gx_scr[(L - 1 - s) * Ns:(L - s) * Ns, :])

            # serial recurrence: step s == forward time s / backward time L-1-s
            h_cat = jnp.zeros((Ns, W2), f32)                     # [h_fwd | h_bwd]
            c_cat = jnp.zeros((Ns, W2), f32)
            for s in range(L):
                gates = gmix_scr[s * Ns:(s + 1) * Ns, :] + mxu(h_cat, whh_bf)
                sig = jax.nn.sigmoid(gates)                      # full 128-lane pass
                i_g = sig[:, 0 * W2:1 * W2]
                f_g = sig[:, 1 * W2:2 * W2]
                o_g = sig[:, 3 * W2:4 * W2]
                g_g = jnp.tanh(gates[:, 2 * W2:3 * W2])
                c_cat = f_g * c_cat + i_g * g_g
                h_cat = o_g * jnp.tanh(c_cat)
                # per-time [hf|hb] outputs (off the recurrence chain)
                henc_scr[s * Ns:(s + 1) * Ns, :Hd] = h_cat[:, :Hd]
                henc_scr[(L - 1 - s) * Ns:(L - s) * Ns, Hd:] = h_cat[:, Hd:]

        # backward-direction output at time 0 of the top layer
        first_back = h_cat[:, Hd:]                               # (Ns, Hd)

        # ------------------------------------------------------------------
        # Decoder: LSTM cell with one-hot(argmax) feedback + FC + softmax + CE.
        # ------------------------------------------------------------------
        dwhh_bf = dwhh_ref[...].astype(bf16)                     # (H, 4H)
        dwih_bf = dwih_ref[...].astype(bf16)                     # (T, 4H)
        ow_bf = ow_ref[...].astype(bf16)                         # (H, T)
        db = db_ref[...]                                         # (1, 4H)
        ob = ob_ref[...]                                         # (1, T)

        # hoisted: `hidden += enc[t]` enters only via enc[t] @ W_hh_dec
        genc_scr[...] = mxu(henc_scr[...], dwhh_bf)              # (L*Ns, 4H)

        c_dec = jnp.concatenate([first_back, first_back], axis=1)  # (Ns, H)
        h_dec = jnp.zeros((Ns, H), f32)
        lane_t = jax.lax.broadcasted_iota(jnp.int32, (Ns, T), 1)
        gxd = db                                  # input_0 == zeros -> bias only
        loss_rows = jnp.zeros((Ns, 1), f32)

        for t in range(L):
            gates = gxd + genc_scr[t * Ns:(t + 1) * Ns, :] + mxu(h_dec, dwhh_bf)
            sig = jax.nn.sigmoid(gates)
            i_g = sig[:, 0 * H:1 * H]
            f_g = sig[:, 1 * H:2 * H]
            o_g = sig[:, 3 * H:4 * H]
            g_g = jnp.tanh(gates[:, 2 * H:3 * H])
            c_dec = f_g * c_dec + i_g * g_g
            h_dec = o_g * jnp.tanh(c_dec)

            # FC -> softmax -> per-step CE (mean over batch applied at the end)
            logits = mxu(h_dec, ow_bf) + ob                      # (Ns, T)
            m = jnp.max(logits, axis=-1, keepdims=True)
            e = jnp.exp(logits - m)
            den = jnp.sum(e, axis=-1, keepdims=True)
            prob_ref[:, t * T:(t + 1) * T] = e * pl.reciprocal(den, approx=False)

            lse = jnp.log(den) + m                               # (Ns, 1)
            picked = jnp.sum(jnp.where(lane_t == lab_ref[t], logits, 0.0),
                             axis=-1, keepdims=True)             # (Ns, 1)
            loss_rows = loss_rows + (lse - picked)

            # next input = one-hot(argmax) with PyTorch's first-max tie-break;
            # one small MXU matmul replaces the old T-unrolled VPU select chain.
            amax = jnp.min(jnp.where(logits == m, lane_t, T),
                           axis=-1, keepdims=True)               # (Ns, 1)
            oh = (lane_t == amax).astype(bf16)                   # (Ns, T)
            gxd = mxu(oh, dwih_bf) + db

        # per-shard loss = sum_t sum_n CE / N_full  (wrapper sums over shards)
        loss_ref[...] = jnp.sum(loss_rows, axis=0, keepdims=True) * (1.0 / N_full)

    return kernel


# ----------------------------------------------------------------------------
# Wrapper: tiny int32 layout glue + single pallas_call (grid over batch shards)
# ----------------------------------------------------------------------------
def focus_forward(params, input_ids, tag_ids, *, num_layer, batch_shards=1):
    N, L = input_ids.shape
    V, E = params["embed"].shape
    G = params["enc_wih_0"].shape[1]
    Hd = G // 8
    H = params["dec_whh"].shape[0]
    T = params["out_w"].shape[1]
    assert 2 * Hd == H, "FocusModel decoder shapes require num_layer == 2"
    B = batch_shards
    assert N % B == 0, "batch must divide evenly across batch shards"
    Ns = N // B

    # Tiny int32 layout glue (a few dozen bytes); the embedding gather itself
    # runs inside the kernel as a one-hot matmul.
    ids = (input_ids.astype(jnp.int32)
           .reshape(B, Ns, L).transpose(0, 2, 1).reshape(B, L * Ns, 1))
    labels = (tag_ids.astype(jnp.int32)
              .reshape(B, Ns, L).transpose(0, 2, 1)[..., None])      # (B, L, Ns, 1)

    weight_args = [params["embed"]]
    for l in range(num_layer):
        weight_args += [params[f"enc_wih_{l}"], params[f"enc_whh_{l}"],
                        params[f"enc_b_{l}"]]
    weight_args += [params["dec_wih"], params["dec_whh"], params["dec_b"],
                    params["out_w"], params["out_b"]]

    def _resident(a):
        zero = (0,) * a.ndim
        return pl.BlockSpec(a.shape, lambda b, _z=zero: _z)

    in_specs = ([pl.BlockSpec((None, L * Ns, 1), lambda b: (b, 0, 0)),
                 pl.BlockSpec((None, L, Ns, 1), lambda b: (b, 0, 0, 0))]
                + [_resident(a) for a in weight_args])

    out_specs = (pl.BlockSpec((None, Ns, L * T), lambda b: (b, 0, 0)),
                 pl.BlockSpec((None, 1, 1), lambda b: (b, 0, 0)))
    out_shape = (jax.ShapeDtypeStruct((B, Ns, L * T), jnp.float32),
                 jax.ShapeDtypeStruct((B, 1, 1), jnp.float32))

    kernel = _make_focus_kernel(L=L, Ns=Ns, N_full=N, E=E, Hd=Hd, H=H, T=T,
                                V=V, num_layer=num_layer)

    grid_spec = pltpu.PrefetchScalarGridSpec(
        num_scalar_prefetch=0,
        grid=(B,),
        in_specs=in_specs,
        out_specs=out_specs,
        scratch_shapes=[
            pltpu.VMEM((L * Ns, G), jnp.float32),        # raw gate inputs
            pltpu.VMEM((L * Ns, G), jnp.float32),        # direction-mixed gate inputs
            pltpu.VMEM((L * Ns, 2 * Hd), jnp.float32),   # per-time encoder [hf|hb]
            pltpu.VMEM((L * Ns, 4 * H), jnp.float32),    # decoder enc[t] @ W_hh_dec
        ],
    )

    prob_shards, loss_shards = pl.pallas_call(
        kernel,
        grid_spec=grid_spec,
        out_shape=out_shape,
        compiler_params=pltpu.CompilerParams(
            dimension_semantics=("parallel",)),
    )(ids, labels, *weight_args)

    # (B, Ns, L*T) -> (N, L, T): contiguous row-major reshape, i.e. a free
    # bitcast (no transpose, no extra HBM round trip).
    prob = prob_shards.reshape(N, L, T)
    return prob, jnp.sum(loss_shards)


# ----------------------------------------------------------------------------
# Deterministic synthetic parameters (mirrors the PyTorch __init__ shapes,
# then fuses the bidirectional encoder weights into the kernel layout).
# ----------------------------------------------------------------------------
def init_params(key, vocab, E, H, num_layer, T):
    Hd = H // num_layer
    keys = iter(jax.random.split(key, 32))

    def u(shape, scale):
        return jax.random.uniform(next(keys), shape, jnp.float32, -scale, scale)

    def interleave_gates(wf, wb):
        # per-direction [i|f|g|o] columns -> fused [i_f i_b | f_f f_b | g_f g_b | o_f o_b]
        parts = []
        for g in range(4):
            parts.append(wf[:, g * Hd:(g + 1) * Hd])
            parts.append(wb[:, g * Hd:(g + 1) * Hd])
        return jnp.concatenate(parts, axis=1)

    params = {}
    emb = u((vocab, E), 0.1)
    params["embed"] = emb.at[0].set(0.0)                  # padding_idx = 0

    se = 1.0 / math.sqrt(Hd)
    for l in range(num_layer):
        I = E if l == 0 else 2 * Hd
        wih_f, wih_b = u((I, 4 * Hd), se), u((I, 4 * Hd), se)
        whh_f, whh_b = u((Hd, 4 * Hd), se), u((Hd, 4 * Hd), se)
        b_f, b_b = u((1, 4 * Hd), se), u((1, 4 * Hd), se)  # b_ih + b_hh folded
        params[f"enc_wih_{l}"] = interleave_gates(wih_f, wih_b)            # (I, 8*Hd)
        z = jnp.zeros((Hd, 4 * Hd), jnp.float32)
        params[f"enc_whh_{l}"] = interleave_gates(                         # (2*Hd, 8*Hd)
            jnp.concatenate([whh_f, z], axis=0),
            jnp.concatenate([z, whh_b], axis=0))
        params[f"enc_b_{l}"] = interleave_gates(b_f, b_b)                  # (1, 8*Hd)

    sd = 1.0 / math.sqrt(H)
    params["dec_wih"] = u((T, 4 * H), sd)
    params["dec_whh"] = u((H, 4 * H), sd)
    params["dec_b"] = u((1, 4 * H), sd)                   # b_ih + b_hh folded
    params["out_w"] = u((H, T), sd)
    params["out_b"] = u((1, T), sd)
    return params


if __name__ == "__main__":
    # cfg: vocab_size=32, embed_size=16, hidden_size=32, num_layer=2, num_tags=8
    N, L = 2, 8
    VOCAB, E, H, NUM_LAYER, T = 32, 16, 32, 2, 8

    root = jax.random.PRNGKey(0)
    kp, kin, ktag = jax.random.split(root, 3)
    params = init_params(kp, VOCAB, E, H, NUM_LAYER, T)

    input_ids = jax.random.randint(kin, (N, L), 1, VOCAB, dtype=jnp.int32)
    tag_ids = jax.random.randint(ktag, (N, L), 0, T, dtype=jnp.int32)

    # batch_shards=1 for single-TensorCore chips (v5e/v6e); on v7x pass
    # batch_shards=2 so each TensorCore runs one batch half of the grid.
    forward = jax.jit(functools.partial(focus_forward, num_layer=NUM_LAYER,
                                        batch_shards=1))
    prob, loss = forward(params, input_ids, tag_ids)
    jax.block_until_ready((prob, loss))

    assert prob.shape == (N, L, T)
    assert bool(jnp.isfinite(loss))
    assert jnp.allclose(jnp.sum(prob, axis=-1), 1.0, atol=1e-4)
    print("KERNEL_OK")
</pallas_src>

<mosaic_0001>
module attributes {stable_mosaic.version = 11 : i64} {
  func.func @kernel(%arg0: i32, %arg1: memref<1x16x1xi32, #tpu.memory_space<vmem>>, %arg2: memref<1x8x2x1xi32, #tpu.memory_space<vmem>>, %arg3: memref<32x16xf32, #tpu.memory_space<vmem>>, %arg4: memref<16x128xf32, #tpu.memory_space<vmem>>, %arg5: memref<32x128xf32, #tpu.memory_space<vmem>>, %arg6: memref<1x128xf32, #tpu.memory_space<vmem>>, %arg7: memref<32x128xf32, #tpu.memory_space<vmem>>, %arg8: memref<32x128xf32, #tpu.memory_space<vmem>>, %arg9: memref<1x128xf32, #tpu.memory_space<vmem>>, %arg10: memref<8x128xf32, #tpu.memory_space<vmem>>, %arg11: memref<32x128xf32, #tpu.memory_space<vmem>>, %arg12: memref<1x128xf32, #tpu.memory_space<vmem>>, %arg13: memref<32x8xf32, #tpu.memory_space<vmem>>, %arg14: memref<1x8xf32, #tpu.memory_space<vmem>>, %arg15: memref<1x2x64xf32, #tpu.memory_space<vmem>>, %arg16: memref<1x1x1xf32, #tpu.memory_space<vmem>>, %arg17: memref<16x128xf32, #tpu.memory_space<vmem>>, %arg18: memref<16x128xf32, #tpu.memory_space<vmem>>, %arg19: memref<16x32xf32, #tpu.memory_space<vmem>>, %arg20: memref<16x128xf32, #tpu.memory_space<vmem>>) attributes {dimension_semantics = [#tpu.dimension_semantics<parallel>], iteration_bounds = array<i64: 1>, scalar_prefetch = 0 : i64, scratch_operands = 4 : i64, tpu.core_type = #tpu.core_type<tc>, window_params = [{transform_indices = @transform_0, window_bounds = array<i64: 1, 16, 1>}, {transform_indices = @transform_1, window_bounds = array<i64: 1, 8, 2, 1>}, {pipeline_mode = #tpu.pipeline_mode<synchronous>, transform_indices = @transform_2, window_bounds = array<i64: 32, 16>}, {pipeline_mode = #tpu.pipeline_mode<synchronous>, transform_indices = @transform_3, window_bounds = array<i64: 16, 128>}, {pipeline_mode = #tpu.pipeline_mode<synchronous>, transform_indices = @transform_4, window_bounds = array<i64: 32, 128>}, {pipeline_mode = #tpu.pipeline_mode<synchronous>, transform_indices = @transform_5, window_bounds = array<i64: 1, 128>}, {pipeline_mode = #tpu.pipeline_mode<synchronous>, transform_indices = @transform_6, window_bounds = array<i64: 32, 128>}, {pipeline_mode = #tpu.pipeline_mode<synchronous>, transform_indices = @transform_7, window_bounds = array<i64: 32, 128>}, {pipeline_mode = #tpu.pipeline_mode<synchronous>, transform_indices = @transform_8, window_bounds = array<i64: 1, 128>}, {pipeline_mode = #tpu.pipeline_mode<synchronous>, transform_indices = @transform_9, window_bounds = array<i64: 8, 128>}, {pipeline_mode = #tpu.pipeline_mode<synchronous>, transform_indices = @transform_10, window_bounds = array<i64: 32, 128>}, {pipeline_mode = #tpu.pipeline_mode<synchronous>, transform_indices = @transform_11, window_bounds = array<i64: 1, 128>}, {pipeline_mode = #tpu.pipeline_mode<synchronous>, transform_indices = @transform_12, window_bounds = array<i64: 32, 8>}, {pipeline_mode = #tpu.pipeline_mode<synchronous>, transform_indices = @transform_13, window_bounds = array<i64: 1, 8>}, {transform_indices = @transform_14, window_bounds = array<i64: 1, 2, 64>}, {transform_indices = @transform_15, window_bounds = array<i64: 1, 1, 1>}]} {
    %0 = tpu.iota {dimensions = array<i32: 1>} : vector<2x128xi32>
    %c32_i32 = arith.constant 32 : i32
    %c0_i32 = arith.constant 0 : i32
    %1 = arith.cmpi eq, %c32_i32, %c0_i32 : i32
    %c1_i32 = arith.constant 1 : i32
    %2 = arith.select %1, %c1_i32, %c32_i32 : i32
    %3 = vector.broadcast %2 : i32 to vector<2x128xi32>
    %4 = arith.remsi %0, %3 : vector<2x128xi32>
    %c0_i32_0 = arith.constant 0 : i32
    %5 = vector.broadcast %c0_i32_0 : i32 to vector<2x128xi32>
    %6 = arith.cmpi ne, %4, %5 : vector<2x128xi32>
    %c0_i32_1 = arith.constant 0 : i32
    %7 = vector.broadcast %c0_i32_1 : i32 to vector<2x128xi32>
    %8 = arith.cmpi slt, %4, %7 : vector<2x128xi32>
    %c0_i32_2 = arith.constant 0 : i32
    %9 = arith.cmpi slt, %2, %c0_i32_2 : i32
    %10 = vector.broadcast %9 : i1 to vector<2x128xi1>
    %11 = vector.broadcast %10 : vector<2x128xi1> to vector<2x128xi1>
    %12 = arith.xori %8, %11 : vector<2x128xi1>
    %13 = arith.andi %12, %6 : vector<2x128xi1>
    %14 = vector.broadcast %2 : i32 to vector<2x128xi32>
    %15 = arith.addi %4, %14 : vector<2x128xi32>
    %16 = arith.select %13, %15, %4 : vector<2x128xi1>, vector<2x128xi32>
    %c16_i32 = arith.constant 16 : i32
    %17 = vector.broadcast %c16_i32 : i32 to vector<2x128xi32>
    %18 = arith.cmpi slt, %16, %17 : vector<2x128xi32>
    %19 = tpu.iota {dimensions = array<i32: 1>} : vector<16x32xi32>
    %c0 = arith.constant 0 : index
    %c0_3 = arith.constant 0 : index
    %c0_4 = arith.constant 0 : index
    %20 = vector.load %arg1[%c0, %c0_3, %c0_4] : memref<1x16x1xi32, #tpu.memory_space<vmem>>, vector<1x16x1xi32>
    %21 = vector.shape_cast %20 : vector<1x16x1xi32> to vector<16x1xi32>
    %22 = vector.broadcast %21 : vector<16x1xi32> to vector<16x32xi32>
    %23 = arith.cmpi eq, %19, %22 : vector<16x32xi32>
    %24 = arith.extui %23 : vector<16x32xi1> to vector<16x32xi32>
    %25 = arith.sitofp %24 : vector<16x32xi32> to vector<16x32xf32>
    %26 = arith.truncf %25 : vector<16x32xf32> to vector<16x32xbf16>
    %c0_5 = arith.constant 0 : index
    %c0_6 = arith.constant 0 : index
    %27 = vector.load %arg3[%c0_5, %c0_6] : memref<32x16xf32, #tpu.memory_space<vmem>>, vector<32x16xf32>
    %28 = arith.truncf %27 : vector<32x16xf32> to vector<32x16xbf16>
    %cst = arith.constant dense<0.000000e+00> : vector<16x16xf32>
    %29 = tpu.matmul %26, %28, %cst {dimension_numbers = #tpu.dot_dimension_numbers<[1], [0], [0], [1], [0, 0, 1, 1], [], []>} : vector<16x32xbf16>, vector<32x16xbf16>, vector<16x16xf32> -> vector<16x16xf32>
    %c0_7 = arith.constant 0 : index
    %c0_8 = arith.constant 0 : index
    %30 = vector.load %arg6[%c0_7, %c0_8] : memref<1x128xf32, #tpu.memory_space<vmem>>, vector<1x128xf32>
    %c0_9 = arith.constant 0 : index
    %c0_10 = arith.constant 0 : index
    %31 = vector.load %arg5[%c0_9, %c0_10] : memref<32x128xf32, #tpu.memory_space<vmem>>, vector<32x128xf32>
    %32 = arith.truncf %31 : vector<32x128xf32> to vector<32x128xbf16>
    %c0_11 = arith.constant 0 : index
    %c0_12 = arith.constant 0 : index
    %33 = vector.load %arg4[%c0_11, %c0_12] : memref<16x128xf32, #tpu.memory_space<vmem>>, vector<16x128xf32>
    %34 = arith.truncf %29 : vector<16x16xf32> to vector<16x16xbf16>
    %35 = arith.truncf %33 : vector<16x128xf32> to vector<16x128xbf16>
    %cst_13 = arith.constant dense<0.000000e+00> : vector<16x128xf32>
    %36 = tpu.matmul %34, %35, %cst_13 {dimension_numbers = #tpu.dot_dimension_numbers<[1], [0], [0], [1], [0, 0, 1, 1], [], []>} : vector<16x16xbf16>, vector<16x128xbf16>, vector<16x128xf32> -> vector<16x128xf32>
    %37 = vector.broadcast %30 : vector<1x128xf32> to vector<16x128xf32>
    %38 = arith.addf %36, %37 : vector<16x128xf32>
    %c0_14 = arith.constant 0 : index
    %c0_15 = arith.constant 0 : index
    %39 = vector.load %arg17[%c0_14, %c0_15] : memref<16x128xf32, #tpu.memory_space<vmem>>, vector<16x128xf32>
    tpu.vector_store %arg17[%c0_14, %c0_15], %38 {strides = array<i32>} : memref<16x128xf32, #tpu.memory_space<vmem>>, vector<16x128xf32>,
    %c0_16 = arith.constant 0 : index
    %c0_17 = arith.constant 0 : index
    %40 = vector.load %arg17[%c0_16, %c0_17] : memref<16x128xf32, #tpu.memory_space<vmem>>, vector<2x128xf32>
    %c14 = arith.constant 14 : index
    %c0_18 = arith.constant 0 : index
    %41 = vector.load %arg17[%c14, %c0_18] : memref<16x128xf32, #tpu.memory_space<vmem>>, vector<2x128xf32>
    %42 = arith.select %18, %40, %41 : vector<2x128xi1>, vector<2x128xf32>
    %c0_19 = arith.constant 0 : index
    %c0_20 = arith.constant 0 : index
    %43 = vector.load %arg18[%c0_19, %c0_20] : memref<16x128xf32, #tpu.memory_space<vmem>>, vector<2x128xf32>
    tpu.vector_store %arg18[%c0_19, %c0_20], %42 {strides = array<i32>} : memref<16x128xf32, #tpu.memory_space<vmem>>, vector<2x128xf32>,
    %c2 = arith.constant 2 : index
    %c0_21 = arith.constant 0 : index
    %44 = vector.load %arg17[%c2, %c0_21] : memref<16x128xf32, #tpu.memory_space<vmem>>, vector<2x128xf32>
    %c12 = arith.constant 12 : index
    %c0_22 = arith.constant 0 : index
    %45 = vector.load %arg17[%c12, %c0_22] : memref<16x128xf32, #tpu.memory_space<vmem>>, vector<2x128xf32>
    %46 = arith.select %18, %44, %45 : vector<2x128xi1>, vector<2x128xf32>
    %c2_23 = arith.constant 2 : index
    %c0_24 = arith.constant 0 : index
    %47 = vector.load %arg18[%c2_23, %c0_24] : memref<16x128xf32, #tpu.memory_space<vmem>>, vector<2x128xf32>
    tpu.vector_store %arg18[%c2_23, %c0_24], %46 {strides = array<i32>} : memref<16x128xf32, #tpu.memory_space<vmem>>, vector<2x128xf32>,
    %c4 = arith.constant 4 : index
    %c0_25 = arith.constant 0 : index
    %48 = vector.load %arg17[%c4, %c0_25] : memref<16x128xf32, #tpu.memory_space<vmem>>, vector<2x128xf32>
    %c10 = arith.constant 10 : index
    %c0_26 = arith.constant 0 : index
    %49 = vector.load %arg17[%c10, %c0_26] : memref<16x128xf32, #tpu.memory_space<vmem>>, vector<2x128xf32>
    %50 = arith.select %18, %48, %49 : vector<2x128xi1>, vector<2x128xf32>
    %c4_27 = arith.constant 4 : index
    %c0_28 = arith.constant 0 : index
    %51 = vector.load %arg18[%c4_27, %c0_28] : memref<16x128xf32, #tpu.memory_space<vmem>>, vector<2x128xf32>
    tpu.vector_store %arg18[%c4_27, %c0_28], %50 {strides = array<i32>} : memref<16x128xf32, #tpu.memory_space<vmem>>, vector<2x128xf32>,
    %c6 = arith.constant 6 : index
    %c0_29 = arith.constant 0 : index
    %52 = vector.load %arg17[%c6, %c0_29] : memref<16x128xf32, #tpu.memory_space<vmem>>, vector<2x128xf32>
    %c8 = arith.constant 8 : index
    %c0_30 = arith.constant 0 : index
    %53 = vector.load %arg17[%c8, %c0_30] : memref<16x128xf32, #tpu.memory_space<vmem>>, vector<2x128xf32>
    %54 = arith.select %18, %52, %53 : vector<2x128xi1>, vector<2x128xf32>
    %c6_31 = arith.constant 6 : index
    %c0_32 = arith.constant 0 : index
    %55 = vector.load %arg18[%c6_31, %c0_32] : memref<16x128xf32, #tpu.memory_space<vmem>>, vector<2x128xf32>
    tpu.vector_store %arg18[%c6_31, %c0_32], %54 {strides = array<i32>} : memref<16x128xf32, #tpu.memory_space<vmem>>, vector<2x128xf32>,
    %c8_33 = arith.constant 8 : index
    %c0_34 = arith.constant 0 : index
    %56 = vector.load %arg17[%c8_33, %c0_34] : memref<16x128xf32, #tpu.memory_space<vmem>>, vector<2x128xf32>
    %c6_35 = arith.constant 6 : index
    %c0_36 = arith.constant 0 : index
    %57 = vector.load %arg17[%c6_35, %c0_36] : memref<16x128xf32, #tpu.memory_space<vmem>>, vector<2x128xf32>
    %58 = arith.select %18, %56, %57 : vector<2x128xi1>, vector<2x128xf32>
    %c8_37 = arith.constant 8 : index
    %c0_38 = arith.constant 0 : index
    %59 = vector.load %arg18[%c8_37, %c0_38] : memref<16x128xf32, #tpu.memory_space<vmem>>, vector<2x128xf32>
    tpu.vector_store %arg18[%c8_37, %c0_38], %58 {strides = array<i32>} : memref<16x128xf32, #tpu.memory_space<vmem>>, vector<2x128xf32>,
    %c10_39 = arith.constant 10 : index
    %c0_40 = arith.constant 0 : index
    %60 = vector.load %arg17[%c10_39, %c0_40] : memref<16x128xf32, #tpu.memory_space<vmem>>, vector<2x128xf32>
    %c4_41 = arith.constant 4 : index
    %c0_42 = arith.constant 0 : index
    %61 = vector.load %arg17[%c4_41, %c0_42] : memref<16x128xf32, #tpu.memory_space<vmem>>, vector<2x128xf32>
    %62 = arith.select %18, %60, %61 : vector<2x128xi1>, vector<2x128xf32>
    %c10_43 = arith.constant 10 : index
    %c0_44 = arith.constant 0 : index
    %63 = vector.load %arg18[%c10_43, %c0_44] : memref<16x128xf32, #tpu.memory_space<vmem>>, vector<2x128xf32>
    tpu.vector_store %arg18[%c10_43, %c0_44], %62 {strides = array<i32>} : memref<16x128xf32, #tpu.memory_space<vmem>>, vector<2x128xf32>,
    %c12_45 = arith.constant 12 : index
    %c0_46 = arith.constant 0 : index
    %64 = vector.load %arg17[%c12_45, %c0_46] : memref<16x128xf32, #tpu.memory_space<vmem>>, vector<2x128xf32>
    %c2_47 = arith.constant 2 : index
    %c0_48 = arith.constant 0 : index
    %65 = vector.load %arg17[%c2_47, %c0_48] : memref<16x128xf32, #tpu.memory_space<vmem>>, vector<2x128xf32>
    %66 = arith.select %18, %64, %65 : vector<2x128xi1>, vector<2x128xf32>
    %c12_49 = arith.constant 12 : index
    %c0_50 = arith.constant 0 : index
    %67 = vector.load %arg18[%c12_49, %c0_50] : memref<16x128xf32, #tpu.memory_space<vmem>>, vector<2x128xf32>
    tpu.vector_store %arg18[%c12_49, %c0_50], %66 {strides = array<i32>} : memref<16x128xf32, #tpu.memory_space<vmem>>, vector<2x128xf32>,
    %c14_51 = arith.constant 14 : index
    %c0_52 = arith.constant 0 : index
    %68 = vector.load %arg17[%c14_51, %c0_52] : memref<16x128xf32, #tpu.memory_space<vmem>>, vector<2x128xf32>
    %c0_53 = arith.constant 0 : index
    %c0_54 = arith.constant 0 : index
    %69 = vector.load %arg17[%c0_53, %c0_54] : memref<16x128xf32, #tpu.memory_space<vmem>>, vector<2x128xf32>
    %70 = arith.select %18, %68, %69 : vector<2x128xi1>, vector<2x128xf32>
    %c14_55 = arith.constant 14 : index
    %c0_56 = arith.constant 0 : index
    %71 = vector.load %arg18[%c14_55, %c0_56] : memref<16x128xf32, #tpu.memory_space<vmem>>, vector<2x128xf32>
    tpu.vector_store %arg18[%c14_55, %c0_56], %70 {strides = array<i32>} : memref<16x128xf32, #tpu.memory_space<vmem>>, vector<2x128xf32>,
    %cst_57 = arith.constant 0.000000e+00 : f32
    %72 = vector.broadcast %cst_57 : f32 to vector<2x32xf32>
    %cst_58 = arith.constant 0.000000e+00 : f32
    %73 = vector.broadcast %cst_58 : f32 to vector<2x32xf32>
    %c0_59 = arith.constant 0 : index
    %c0_60 = arith.constant 0 : index
    %74 = vector.load %arg18[%c0_59, %c0_60] : memref<16x128xf32, #tpu.memory_space<vmem>>, vector<2x128xf32>
    %75 = arith.truncf %72 : vector<2x32xf32> to vector<2x32xbf16>
    %cst_61 = arith.constant dense<0.000000e+00> : vector<2x128xf32>
    %76 = tpu.matmul %75, %32, %cst_61 {dimension_numbers = #tpu.dot_dimension_numbers<[1], [0], [0], [1], [0, 0, 1, 1], [], []>} : vector<2x32xbf16>, vector<32x128xbf16>, vector<2x128xf32> -> vector<2x128xf32>
    %77 = arith.addf %74, %76 : vector<2x128xf32>
    %78 = arith.negf %77 : vector<2x128xf32>
    %79 = math.exp %78 : vector<2x128xf32>
    %cst_62 = arith.constant 1.000000e+00 : f32
    %80 = vector.broadcast %cst_62 : f32 to vector<2x128xf32>
    %81 = arith.addf %80, %79 : vector<2x128xf32>
    %82 = arith.divf %80, %81 : vector<2x128xf32>
    %83 = vector.extract_strided_slice %82 {offsets = [0, 0], sizes = [2, 32], strides = [1, 1]} : vector<2x128xf32> to vector<2x32xf32>
    %84 = vector.extract_strided_slice %82 {offsets = [0, 32], sizes = [2, 32], strides = [1, 1]} : vector<2x128xf32> to vector<2x32xf32>
    %85 = vector.extract_strided_slice %82 {offsets = [0, 96], sizes = [2, 32], strides = [1, 1]} : vector<2x128xf32> to vector<2x32xf32>
    %86 = vector.extract_strided_slice %77 {offsets = [0, 64], sizes = [2, 32], strides = [1, 1]} : vector<2x128xf32> to vector<2x32xf32>
    %87 = math.tanh %86 : vector<2x32xf32>
    %88 = arith.mulf %84, %73 : vector<2x32xf32>
    %89 = arith.mulf %83, %87 : vector<2x32xf32>
    %90 = arith.addf %88, %89 : vector<2x32xf32>
    %91 = math.tanh %90 : vector<2x32xf32>
    %92 = arith.mulf %85, %91 : vector<2x32xf32>
    %93 = vector.extract_strided_slice %92 {offsets = [0, 0], sizes = [2, 16], strides = [1, 1]} : vector<2x32xf32> to vector<2x16xf32>
    %c0_63 = arith.constant 0 : index
    %c0_64 = arith.constant 0 : index
    %94 = vector.load %arg19[%c0_63, %c0_64] : memref<16x32xf32, #tpu.memory_space<vmem>>, vector<2x16xf32>
    tpu.vector_store %arg19[%c0_63, %c0_64], %93 {strides = array<i32>} : memref<16x32xf32, #tpu.memory_space<vmem>>, vector<2x16xf32>,
    %95 = vector.extract_strided_slice %92 {offsets = [0, 16], sizes = [2, 16], strides = [1, 1]} : vector<2x32xf32> to vector<2x16xf32>
    %c14_65 = arith.constant 14 : index
    %c16 = arith.constant 16 : index
    %96 = vector.load %arg19[%c14_65, %c16] : memref<16x32xf32, #tpu.memory_space<vmem>>, vector<2x16xf32>
    tpu.vector_store %arg19[%c14_65, %c16], %95 {strides = array<i32>} : memref<16x32xf32, #tpu.memory_space<vmem>>, vector<2x16xf32>,
    %c2_66 = arith.constant 2 : index
    %c0_67 = arith.constant 0 : index
    %97 = vector.load %arg18[%c2_66, %c0_67] : memref<16x128xf32, #tpu.memory_space<vmem>>, vector<2x128xf32>
    %98 = arith.truncf %92 : vector<2x32xf32> to vector<2x32xbf16>
    %cst_68 = arith.constant dense<0.000000e+00> : vector<2x128xf32>
    %99 = tpu.matmul %98, %32, %cst_68 {dimension_numbers = #tpu.dot_dimension_numbers<[1], [0], [0], [1], [0, 0, 1, 1], [], []>} : vector<2x32xbf16>, vector<32x128xbf16>, vector<2x128xf32> -> vector<2x128xf32>
    %100 = arith.addf %97, %99 : vector<2x128xf32>
    %101 = arith.negf %100 : vector<2x128xf32>
    %102 = math.exp %101 : vector<2x128xf32>
    %cst_69 = arith.constant 1.000000e+00 : f32
    %103 = vector.broadcast %cst_69 : f32 to vector<2x128xf32>
    %104 = arith.addf %103, %102 : vector<2x128xf32>
    %105 = arith.divf %103, %104 : vector<2x128xf32>
    %106 = vector.extract_strided_slice %105 {offsets = [0, 0], sizes = [2, 32], strides = [1, 1]} : vector<2x128xf32> to vector<2x32xf32>
    %107 = vector.extract_strided_slice %105 {offsets = [0, 32], sizes = [2, 32], strides = [1, 1]} : vector<2x128xf32> to vector<2x32xf32>
    %108 = vector.extract_strided_slice %105 {offsets = [0, 96], sizes = [2, 32], strides = [1, 1]} : vector<2x128xf32> to vector<2x32xf32>
    %109 = vector.extract_strided_slice %100 {offsets = [0, 64], sizes = [2, 32], strides = [1, 1]} : vector<2x128xf32> to vector<2x32xf32>
    %110 = math.tanh %109 : vector<2x32xf32>
    %111 = arith.mulf %107, %90 : vector<2x32xf32>
    %112 = arith.mulf %106, %110 : vector<2x32xf32>
    %113 = arith.addf %111, %112 : vector<2x32xf32>
    %114 = math.tanh %113 : vector<2x32xf32>
    %115 = arith.mulf %108, %114 : vector<2x32xf32>
    %116 = vector.extract_strided_slice %115 {offsets = [0, 0], sizes = [2, 16], strides = [1, 1]} : vector<2x32xf32> to vector<2x16xf32>
    %c2_70 = arith.constant 2 : index
    %c0_71 = arith.constant 0 : index
    %117 = vector.load %arg19[%c2_70, %c0_71] : memref<16x32xf32, #tpu.memory_space<vmem>>, vector<2x16xf32>
    tpu.vector_store %arg19[%c2_70, %c0_71], %116 {strides = array<i32>} : memref<16x32xf32, #tpu.memory_space<vmem>>, vector<2x16xf32>,
    %118 = vector.extract_strided_slice %115 {offsets = [0, 16], sizes = [2, 16], strides = [1, 1]} : vector<2x32xf32> to vector<2x16xf32>
    %c12_72 = arith.constant 12 : index
    %c16_73 = arith.constant 16 : index
    %119 = vector.load %arg19[%c12_72, %c16_73] : memref<16x32xf32, #tpu.memory_space<vmem>>, vector<2x16xf32>
    tpu.vector_store %arg19[%c12_72, %c16_73], %118 {strides = array<i32>} : memref<16x32xf32, #tpu.memory_space<vmem>>, vector<2x16xf32>,
    %c4_74 = arith.constant 4 : index
    %c0_75 = arith.constant 0 : index
    %120 = vector.load %arg18[%c4_74, %c0_75] : memref<16x128xf32, #tpu.memory_space<vmem>>, vector<2x128xf32>
    %121 = arith.truncf %115 : vector<2x32xf32> to vector<2x32xbf16>
    %cst_76 = arith.constant dense<0.000000e+00> : vector<2x128xf32>
    %122 = tpu.matmul %121, %32, %cst_76 {dimension_numbers = #tpu.dot_dimension_numbers<[1], [0], [0], [1], [0, 0, 1, 1], [], []>} : vector<2x32xbf16>, vector<32x128xbf16>, vector<2x128xf32> -> vector<2x128xf32>
    %123 = arith.addf %120, %122 : vector<2x128xf32>
    %124 = arith.negf %123 : vector<2x128xf32>
    %125 = math.exp %124 : vector<2x128xf32>
    %cst_77 = arith.constant 1.000000e+00 : f32
    %126 = vector.broadcast %cst_77 : f32 to vector<2x128xf32>
    %127 = arith.addf %126, %125 : vector<2x128xf32>
    %128 = arith.divf %126, %127 : vector<2x128xf32>
    %129 = vector.extract_strided_slice %128 {offsets = [0, 0], sizes = [2, 32], strides = [1, 1]} : vector<2x128xf32> to vector<2x32xf32>
    %130 = vector.extract_strided_slice %128 {offsets = [0, 32], sizes = [2, 32], strides = [1, 1]} : vector<2x128xf32> to vector<2x32xf32>
    %131 = vector.extract_strided_slice %128 {offsets = [0, 96], sizes = [2, 32], strides = [1, 1]} : vector<2x128xf32> to vector<2x32xf32>
    %132 = vector.extract_strided_slice %123 {offsets = [0, 64], sizes = [2, 32], strides = [1, 1]} : vector<2x128xf32> to vector<2x32xf32>
    %133 = math.tanh %132 : vector<2x32xf32>
    %134 = arith.mulf %130, %113 : vector<2x32xf32>
    %135 = arith.mulf %129, %133 : vector<2x32xf32>
    %136 = arith.addf %134, %135 : vector<2x32xf32>
    %137 = math.tanh %136 : vector<2x32xf32>
    %138 = arith.mulf %131, %137 : vector<2x32xf32>
    %139 = vector.extract_strided_slice %138 {offsets = [0, 0], sizes = [2, 16], strides = [1, 1]} : vector<2x32xf32> to vector<2x16xf32>
    %c4_78 = arith.constant 4 : index
    %c0_79 = arith.constant 0 : index
    %140 = vector.load %arg19[%c4_78, %c0_79] : memref<16x32xf32, #tpu.memory_space<vmem>>, vector<2x16xf32>
    tpu.vector_store %arg19[%c4_78, %c0_79], %139 {strides = array<i32>} : memref<16x32xf32, #tpu.memory_space<vmem>>, vector<2x16xf32>,
    %141 = vector.extract_strided_slice %138 {offsets = [0, 16], sizes = [2, 16], strides = [1, 1]} : vector<2x32xf32> to vector<2x16xf32>
    %c10_80 = arith.constant 10 : index
    %c16_81 = arith.constant 16 : index
    %142 = vector.load %arg19[%c10_80, %c16_81] : memref<16x32xf32, #tpu.memory_space<vmem>>, vector<2x16xf32>
    tpu.vector_store %arg19[%c10_80, %c16_81], %141 {strides = array<i32>} : memref<16x32xf32, #tpu.memory_space<vmem>>, vector<2x16xf32>,
    %c6_82 = arith.constant 6 : index
    %c0_83 = arith.constant 0 : index
    %143 = vector.load %arg18[%c6_82, %c0_83] : memref<16x128xf32, #tpu.memory_space<vmem>>, vector<2x128xf32>
    %144 = arith.truncf %138 : vector<2x32xf32> to vector<2x32xbf16>
    %cst_84 = arith.constant dense<0.000000e+00> : vector<2x128xf32>
    %145 = tpu.matmul %144, %32, %cst_84 {dimension_numbers = #tpu.dot_dimension_numbers<[1], [0], [0], [1], [0, 0, 1, 1], [], []>} : vector<2x32xbf16>, vector<32x128xbf16>, vector<2x128xf32> -> vector<2x128xf32>
    %146 = arith.addf %143, %145 : vector<2x128xf32>
    %147 = arith.negf %146 : vector<2x128xf32>
    %148 = math.exp %147 : vector<2x128xf32>
    %cst_85 = arith.constant 1.000000e+00 : f32
    %149 = vector.broadcast %cst_85 : f32 to vector<2x128xf32>
    %150 = arith.addf %149, %148 : vector<2x128xf32>
    %151 = arith.divf %149, %150 : vector<2x128xf32>
    %152 = vector.extract_strided_slice %151 {offsets = [0, 0], sizes = [2, 32], strides = [1, 1]} : vector<2x128xf32> to vector<2x32xf32>
    %153 = vector.extract_strided_slice %151 {offsets = [0, 32], sizes = [2, 32], strides = [1, 1]} : vector<2x128xf32> to vector<2x32xf32>
    %154 = vector.extract_strided_slice %151 {offsets = [0, 96], sizes = [2, 32], strides = [1, 1]} : vector<2x128xf32> to vector<2x32xf32>
    %155 = vector.extract_strided_slice %146 {offsets = [0, 64], sizes = [2, 32], strides = [1, 1]} : vector<2x128xf32> to vector<2x32xf32>
    %156 = math.tanh %155 : vector<2x32xf32>
    %157 = arith.mulf %153, %136 : vector<2x32xf32>
    %158 = arith.mulf %152, %156 : vector<2x32xf32>
    %159 = arith.addf %157, %158 : vector<2x32xf32>
    %160 = math.tanh %159 : vector<2x32xf32>
    %161 = arith.mulf %154, %160 : vector<2x32xf32>
    %162 = vector.extract_strided_slice %161 {offsets = [0, 0], sizes = [2, 16], strides = [1, 1]} : vector<2x32xf32> to vector<2x16xf32>
    %c6_86 = arith.constant 6 : index
    %c0_87 = arith.constant 0 : index
    %163 = vector.load %arg19[%c6_86, %c0_87] : memref<16x32xf32, #tpu.memory_space<vmem>>, vector<2x16xf32>
    tpu.vector_store %arg19[%c6_86, %c0_87], %162 {strides = array<i32>} : memref<16x32xf32, #tpu.memory_space<vmem>>, vector<2x16xf32>,
    %164 = vector.extract_strided_slice %161 {offsets = [0, 16], sizes = [2, 16], strides = [1, 1]} : vector<2x32xf32> to vector<2x16xf32>
    %c8_88 = arith.constant 8 : index
    %c16_89 = arith.constant 16 : index
    %165 = vector.load %arg19[%c8_88, %c16_89] : memref<16x32xf32, #tpu.memory_space<vmem>>, vector<2x16xf32>
    tpu.vector_store %arg19[%c8_88, %c16_89], %164 {strides = array<i32>} : memref<16x32xf32, #tpu.memory_space<vmem>>, vector<2x16xf32>,
    %c8_90 = arith.constant 8 : index
    %c0_91 = arith.constant 0 : index
    %166 = vector.load %arg18[%c8_90, %c0_91] : memref<16x128xf32, #tpu.memory_space<vmem>>, vector<2x128xf32>
    %167 = arith.truncf %161 : vector<2x32xf32> to vector<2x32xbf16>
    %cst_92 = arith.constant dense<0.000000e+00> : vector<2x128xf32>
    %168 = tpu.matmul %167, %32, %cst_92 {dimension_numbers = #tpu.dot_dimension_numbers<[1], [0], [0], [1], [0, 0, 1, 1], [], []>} : vector<2x32xbf16>, vector<32x128xbf16>, vector<2x128xf32> -> vector<2x128xf32>
    %169 = arith.addf %166, %168 : vector<2x128xf32>
    %170 = arith.negf %169 : vector<2x128xf32>
    %171 = math.exp %170 : vector<2x128xf32>
    %cst_93 = arith.constant 1.000000e+00 : f32
    %172 = vector.broadcast %cst_93 : f32 to vector<2x128xf32>
    %173 = arith.addf %172, %171 : vector<2x128xf32>
    %174 = arith.divf %172, %173 : vector<2x128xf32>
    %175 = vector.extract_strided_slice %174 {offsets = [0, 0], sizes = [2, 32], strides = [1, 1]} : vector<2x128xf32> to vector<2x32xf32>
    %176 = vector.extract_strided_slice %174 {offsets = [0, 32], sizes = [2, 32], strides = [1, 1]} : vector<2x128xf32> to vector<2x32xf32>
    %177 = vector.extract_strided_slice %174 {offsets = [0, 96], sizes = [2, 32], strides = [1, 1]} : vector<2x128xf32> to vector<2x32xf32>
    %178 = vector.extract_strided_slice %169 {offsets = [0, 64], sizes = [2, 32], strides = [1, 1]} : vector<2x128xf32> to vector<2x32xf32>
    %179 = math.tanh %178 : vector<2x32xf32>
    %180 = arith.mulf %176, %159 : vector<2x32xf32>
    %181 = arith.mulf %175, %179 : vector<2x32xf32>
    %182 = arith.addf %180, %181 : vector<2x32xf32>
    %183 = math.tanh %182 : vector<2x32xf32>
    %184 = arith.mulf %177, %183 : vector<2x32xf32>
    %185 = vector.extract_strided_slice %184 {offsets = [0, 0], sizes = [2, 16], strides = [1, 1]} : vector<2x32xf32> to vector<2x16xf32>
    %c8_94 = arith.constant 8 : index
    %c0_95 = arith.constant 0 : index
    %186 = vector.load %arg19[%c8_94, %c0_95] : memref<16x32xf32, #tpu.memory_space<vmem>>, vector<2x16xf32>
    tpu.vector_store %arg19[%c8_94, %c0_95], %185 {strides = array<i32>} : memref<16x32xf32, #tpu.memory_space<vmem>>, vector<2x16xf32>,
    %187 = vector.extract_strided_slice %184 {offsets = [0, 16], sizes = [2, 16], strides = [1, 1]} : vector<2x32xf32> to vector<2x16xf32>
    %c6_96 = arith.constant 6 : index
    %c16_97 = arith.constant 16 : index
    %188 = vector.load %arg19[%c6_96, %c16_97] : memref<16x32xf32, #tpu.memory_space<vmem>>, vector<2x16xf32>
    tpu.vector_store %arg19[%c6_96, %c16_97], %187 {strides = array<i32>} : memref<16x32xf32, #tpu.memory_space<vmem>>, vector<2x16xf32>,
    %c10_98 = arith.constant 10 : index
    %c0_99 = arith.constant 0 : index
    %189 = vector.load %arg18[%c10_98, %c0_99] : memref<16x128xf32, #tpu.memory_space<vmem>>, vector<2x128xf32>
    %190 = arith.truncf %184 : vector<2x32xf32> to vector<2x32xbf16>
    %cst_100 = arith.constant dense<0.000000e+00> : vector<2x128xf32>
    %191 = tpu.matmul %190, %32, %cst_100 {dimension_numbers = #tpu.dot_dimension_numbers<[1], [0], [0], [1], [0, 0, 1, 1], [], []>} : vector<2x32xbf16>, vector<32x128xbf16>, vector<2x128xf32> -> vector<2x128xf32>
    %192 = arith.addf %189, %191 : vector<2x128xf32>
    %193 = arith.negf %192 : vector<2x128xf32>
    %194 = math.exp %193 : vector<2x128xf32>
    %cst_101 = arith.constant 1.000000e+00 : f32
    %195 = vector.broadcast %cst_101 : f32 to vector<2x128xf32>
    %196 = arith.addf %195, %194 : vector<2x128xf32>
    %197 = arith.divf %195, %196 : vector<2x128xf32>
    %198 = vector.extract_strided_slice %197 {offsets = [0, 0], sizes = [2, 32], strides = [1, 1]} : vector<2x128xf32> to vector<2x32xf32>
    %199 = vector.extract_strided_slice %197 {offsets = [0, 32], sizes = [2, 32], strides = [1, 1]} : vector<2x128xf32> to vector<2x32xf32>
    %200 = vector.extract_strided_slice %197 {offsets = [0, 96], sizes = [2, 32], strides = [1, 1]} : vector<2x128xf32> to vector<2x32xf32>
    %201 = vector.extract_strided_slice %192 {offsets = [0, 64], sizes = [2, 32], strides = [1, 1]} : vector<2x128xf32> to vector<2x32xf32>
    %202 = math.tanh %201 : vector<2x32xf32>
    %203 = arith.mulf %199, %182 : vector<2x32xf32>
    %204 = arith.mulf %198, %202 : vector<2x32xf32>
    %205 = arith.addf %203, %204 : vector<2x32xf32>
    %206 = math.tanh %205 : vector<2x32xf32>
    %207 = arith.mulf %200, %206 : vector<2x32xf32>
    %208 = vector.extract_strided_slice %207 {offsets = [0, 0], sizes = [2, 16], strides = [1, 1]} : vector<2x32xf32> to vector<2x16xf32>
    %c10_102 = arith.constant 10 : index
    %c0_103 = arith.constant 0 : index
    %209 = vector.load %arg19[%c10_102, %c0_103] : memref<16x32xf32, #tpu.memory_space<vmem>>, vector<2x16xf32>
    tpu.vector_store %arg19[%c10_102, %c0_103], %208 {strides = array<i32>} : memref<16x32xf32, #tpu.memory_space<vmem>>, vector<2x16xf32>,
    %210 = vector.extract_strided_slice %207 {offsets = [0, 16], sizes = [2, 16], strides = [1, 1]} : vector<2x32xf32> to vector<2x16xf32>
    %c4_104 = arith.constant 4 : index
    %c16_105 = arith.constant 16 : index
    %211 = vector.load %arg19[%c4_104, %c16_105] : memref<16x32xf32, #tpu.memory_space<vmem>>, vector<2x16xf32>
    tpu.vector_store %arg19[%c4_104, %c16_105], %210 {strides = array<i32>} : memref<16x32xf32, #tpu.memory_space<vmem>>, vector<2x16xf32>,
    %c12_106 = arith.constant 12 : index
    %c0_107 = arith.constant 0 : index
    %212 = vector.load %arg18[%c12_106, %c0_107] : memref<16x128xf32, #tpu.memory_space<vmem>>, vector<2x128xf32>
    %213 = arith.truncf %207 : vector<2x32xf32> to vector<2x32xbf16>
    %cst_108 = arith.constant dense<0.000000e+00> : vector<2x128xf32>
    %214 = tpu.matmul %213, %32, %cst_108 {dimension_numbers = #tpu.dot_dimension_numbers<[1], [0], [0], [1], [0, 0, 1, 1], [], []>} : vector<2x32xbf16>, vector<32x128xbf16>, vector<2x128xf32> -> vector<2x128xf32>
    %215 = arith.addf %212, %214 : vector<2x128xf32>
    %216 = arith.negf %215 : vector<2x128xf32>
    %217 = math.exp %216 : vector<2x128xf32>
    %cst_109 = arith.constant 1.000000e+00 : f32
    %218 = vector.broadcast %cst_109 : f32 to vector<2x128xf32>
    %219 = arith.addf %218, %217 : vector<2x128xf32>
    %220 = arith.divf %218, %219 : vector<2x128xf32>
    %221 = vector.extract_strided_slice %220 {offsets = [0, 0], sizes = [2, 32], strides = [1, 1]} : vector<2x128xf32> to vector<2x32xf32>
    %222 = vector.extract_strided_slice %220 {offsets = [0, 32], sizes = [2, 32], strides = [1, 1]} : vector<2x128xf32> to vector<2x32xf32>
    %223 = vector.extract_strided_slice %220 {offsets = [0, 96], sizes = [2, 32], strides = [1, 1]} : vector<2x128xf32> to vector<2x32xf32>
    %224 = vector.extract_strided_slice %215 {offsets = [0, 64], sizes = [2, 32], strides = [1, 1]} : vector<2x128xf32> to vector<2x32xf32>
    %225 = math.tanh %224 : vector<2x32xf32>
    %226 = arith.mulf %222, %205 : vector<2x32xf32>
    %227 = arith.mulf %221, %225 : vector<2x32xf32>
    %228 = arith.addf %226, %227 : vector<2x32xf32>
    %229 = math.tanh %228 : vector<2x32xf32>
    %230 = arith.mulf %223, %229 : vector<2x32xf32>
    %231 = vector.extract_strided_slice %230 {offsets = [0, 0], sizes = [2, 16], strides = [1, 1]} : vector<2x32xf32> to vector<2x16xf32>
    %c12_110 = arith.constant 12 : index
    %c0_111 = arith.constant 0 : index
    %232 = vector.load %arg19[%c12_110, %c0_111] : memref<16x32xf32, #tpu.memory_space<vmem>>, vector<2x16xf32>
    tpu.vector_store %arg19[%c12_110, %c0_111], %231 {strides = array<i32>} : memref<16x32xf32, #tpu.memory_space<vmem>>, vector<2x16xf32>,
    %233 = vector.extract_strided_slice %230 {offsets = [0, 16], sizes = [2, 16], strides = [1, 1]} : vector<2x32xf32> to vector<2x16xf32>
    %c2_112 = arith.constant 2 : index
    %c16_113 = arith.constant 16 : index
    %234 = vector.load %arg19[%c2_112, %c16_113] : memref<16x32xf32, #tpu.memory_space<vmem>>, vector<2x16xf32>
    tpu.vector_store %arg19[%c2_112, %c16_113], %233 {strides = array<i32>} : memref<16x32xf32, #tpu.memory_space<vmem>>, vector<2x16xf32>,
    %c14_114 = arith.constant 14 : index
    %c0_115 = arith.constant 0 : index
    %235 = vector.load %arg18[%c14_114, %c0_115] : memref<16x128xf32, #tpu.memory_space<vmem>>, vector<2x128xf32>
    %236 = arith.truncf %230 : vector<2x32xf32> to vector<2x32xbf16>
    %cst_116 = arith.constant dense<0.000000e+00> : vector<2x128xf32>
    %237 = tpu.matmul %236, %32, %cst_116 {dimension_numbers = #tpu.dot_dimension_numbers<[1], [0], [0], [1], [0, 0, 1, 1], [], []>} : vector<2x32xbf16>, vector<32x128xbf16>, vector<2x128xf32> -> vector<2x128xf32>
    %238 = arith.addf %235, %237 : vector<2x128xf32>
    %239 = arith.negf %238 : vector<2x128xf32>
    %240 = math.exp %239 : vector<2x128xf32>
    %cst_117 = arith.constant 1.000000e+00 : f32
    %241 = vector.broadcast %cst_117 : f32 to vector<2x128xf32>
    %242 = arith.addf %241, %240 : vector<2x128xf32>
    %243 = arith.divf %241, %242 : vector<2x128xf32>
    %244 = vector.extract_strided_slice %243 {offsets = [0, 0], sizes = [2, 32], strides = [1, 1]} : vector<2x128xf32> to vector<2x32xf32>
    %245 = vector.extract_strided_slice %243 {offsets = [0, 32], sizes = [2, 32], strides = [1, 1]} : vector<2x128xf32> to vector<2x32xf32>
    %246 = vector.extract_strided_slice %243 {offsets = [0, 96], sizes = [2, 32], strides = [1, 1]} : vector<2x128xf32> to vector<2x32xf32>
    %247 = vector.extract_strided_slice %238 {offsets = [0, 64], sizes = [2, 32], strides = [1, 1]} : vector<2x128xf32> to vector<2x32xf32>
    %248 = math.tanh %247 : vector<2x32xf32>
    %249 = arith.mulf %245, %228 : vector<2x32xf32>
    %250 = arith.mulf %244, %248 : vector<2x32xf32>
    %251 = arith.addf %249, %250 : vector<2x32xf32>
    %252 = math.tanh %251 : vector<2x32xf32>
    %253 = arith.mulf %246, %252 : vector<2x32xf32>
    %254 = vector.extract_strided_slice %253 {offsets = [0, 0], sizes = [2, 16], strides = [1, 1]} : vector<2x32xf32> to vector<2x16xf32>
    %c14_118 = arith.constant 14 : index
    %c0_119 = arith.constant 0 : index
    %255 = vector.load %arg19[%c14_118, %c0_119] : memref<16x32xf32, #tpu.memory_space<vmem>>, vector<2x16xf32>
    tpu.vector_store %arg19[%c14_118, %c0_119], %254 {strides = array<i32>} : memref<16x32xf32, #tpu.memory_space<vmem>>, vector<2x16xf32>,
    %256 = vector.extract_strided_slice %253 {offsets = [0, 16], sizes = [2, 16], strides = [1, 1]} : vector<2x32xf32> to vector<2x16xf32>
    %c0_120 = arith.constant 0 : index
    %c16_121 = arith.constant 16 : index
    %257 = vector.load %arg19[%c0_120, %c16_121] : memref<16x32xf32, #tpu.memory_space<vmem>>, vector<2x16xf32>
    tpu.vector_store %arg19[%c0_120, %c16_121], %256 {strides = array<i32>} : memref<16x32xf32, #tpu.memory_space<vmem>>, vector<2x16xf32>,
    %c0_122 = arith.constant 0 : index
    %c0_123 = arith.constant 0 : index
    %258 = vector.load %arg9[%c0_122, %c0_123] : memref<1x128xf32, #tpu.memory_space<vmem>>, vector<1x128xf32>
    %c0_124 = arith.constant 0 : index
    %c0_125 = arith.constant 0 : index
    %259 = vector.load %arg8[%c0_124, %c0_125] : memref<32x128xf32, #tpu.memory_space<vmem>>, vector<32x128xf32>
    %260 = arith.truncf %259 : vector<32x128xf32> to vector<32x128xbf16>
    %c0_126 = arith.constant 0 : index
    %c0_127 = arith.constant 0 : index
    %261 = vector.load %arg19[%c0_126, %c0_127] : memref<16x32xf32, #tpu.memory_space<vmem>>, vector<16x32xf32>
    %c0_128 = arith.constant 0 : index
    %c0_129 = arith.constant 0 : index
    %262 = vector.load %arg7[%c0_128, %c0_129] : memref<32x128xf32, #tpu.memory_space<vmem>>, vector<32x128xf32>
    %263 = arith.truncf %261 : vector<16x32xf32> to vector<16x32xbf16>
    %264 = arith.truncf %262 : vector<32x128xf32> to vector<32x128xbf16>
    %cst_130 = arith.constant dense<0.000000e+00> : vector<16x128xf32>
    %265 = tpu.matmul %263, %264, %cst_130 {dimension_numbers = #tpu.dot_dimension_numbers<[1], [0], [0], [1], [0, 0, 1, 1], [], []>} : vector<16x32xbf16>, vector<32x128xbf16>, vector<16x128xf32> -> vector<16x128xf32>
    %266 = vector.broadcast %258 : vector<1x128xf32> to vector<16x128xf32>
    %267 = arith.addf %265, %266 : vector<16x128xf32>
    %c0_131 = arith.constant 0 : index
    %c0_132 = arith.constant 0 : index
    %268 = vector.load %arg17[%c0_131, %c0_132] : memref<16x128xf32, #tpu.memory_space<vmem>>, vector<16x128xf32>
    tpu.vector_store %arg17[%c0_131, %c0_132], %267 {strides = array<i32>} : memref<16x128xf32, #tpu.memory_space<vmem>>, vector<16x128xf32>,
    %c0_133 = arith.constant 0 : index
    %c0_134 = arith.constant 0 : index
    %269 = vector.load %arg17[%c0_133, %c0_134] : memref<16x128xf32, #tpu.memory_space<vmem>>, vector<2x128xf32>
    %c14_135 = arith.constant 14 : index
    %c0_136 = arith.constant 0 : index
    %270 = vector.load %arg17[%c14_135, %c0_136] : memref<16x128xf32, #tpu.memory_space<vmem>>, vector<2x128xf32>
    %271 = arith.select %18, %269, %270 : vector<2x128xi1>, vector<2x128xf32>
    %c0_137 = arith.constant 0 : index
    %c0_138 = arith.constant 0 : index
    %272 = vector.load %arg18[%c0_137, %c0_138] : memref<16x128xf32, #tpu.memory_space<vmem>>, vector<2x128xf32>
    tpu.vector_store %arg18[%c0_137, %c0_138], %271 {strides = array<i32>} : memref<16x128xf32, #tpu.memory_space<vmem>>, vector<2x128xf32>,
    %c2_139 = arith.constant 2 : index
    %c0_140 = arith.constant 0 : index
    %273 = vector.load %arg17[%c2_139, %c0_140] : memref<16x128xf32, #tpu.memory_space<vmem>>, vector<2x128xf32>
    %c12_141 = arith.constant 12 : index
    %c0_142 = arith.constant 0 : index
    %274 = vector.load %arg17[%c12_141, %c0_142] : memref<16x128xf32, #tpu.memory_space<vmem>>, vector<2x128xf32>
    %275 = arith.select %18, %273, %274 : vector<2x128xi1>, vector<2x128xf32>
    %c2_143 = arith.constant 2 : index
    %c0_144 = arith.constant 0 : index
    %276 = vector.load %arg18[%c2_143, %c0_144] : memref<16x128xf32, #tpu.memory_space<vmem>>, vector<2x128xf32>
    tpu.vector_store %arg18[%c2_143, %c0_144], %275 {strides = array<i32>} : memref<16x128xf32, #tpu.memory_space<vmem>>, vector<2x128xf32>,
    %c4_145 = arith.constant 4 : index
    %c0_146 = arith.constant 0 : index
    %277 = vector.load %arg17[%c4_145, %c0_146] : memref<16x128xf32, #tpu.memory_space<vmem>>, vector<2x128xf32>
    %c10_147 = arith.constant 10 : index
    %c0_148 = arith.constant 0 : index
    %278 = vector.load %arg17[%c10_147, %c0_148] : memref<16x128xf32, #tpu.memory_space<vmem>>, vector<2x128xf32>
    %279 = arith.select %18, %277, %278 : vector<2x128xi1>, vector<2x128xf32>
    %c4_149 = arith.constant 4 : index
    %c0_150 = arith.constant 0 : index
    %280 = vector.load %arg18[%c4_149, %c0_150] : memref<16x128xf32, #tpu.memory_space<vmem>>, vector<2x128xf32>
    tpu.vector_store %arg18[%c4_149, %c0_150], %279 {strides = array<i32>} : memref<16x128xf32, #tpu.memory_space<vmem>>, vector<2x128xf32>,
    %c6_151 = arith.constant 6 : index
    %c0_152 = arith.constant 0 : index
    %281 = vector.load %arg17[%c6_151, %c0_152] : memref<16x128xf32, #tpu.memory_space<vmem>>, vector<2x128xf32>
    %c8_153 = arith.constant 8 : index
    %c0_154 = arith.constant 0 : index
    %282 = vector.load %arg17[%c8_153, %c0_154] : memref<16x128xf32, #tpu.memory_space<vmem>>, vector<2x128xf32>
    %283 = arith.select %18, %281, %282 : vector<2x128xi1>, vector<2x128xf32>
    %c6_155 = arith.constant 6 : index
    %c0_156 = arith.constant 0 : index
    %284 = vector.load %arg18[%c6_155, %c0_156] : memref<16x128xf32, #tpu.memory_space<vmem>>, vector<2x128xf32>
    tpu.vector_store %arg18[%c6_155, %c0_156], %283 {strides = array<i32>} : memref<16x128xf32, #tpu.memory_space<vmem>>, vector<2x128xf32>,
    %c8_157 = arith.constant 8 : index
    %c0_158 = arith.constant 0 : index
    %285 = vector.load %arg17[%c8_157, %c0_158] : memref<16x128xf32, #tpu.memory_space<vmem>>, vector<2x128xf32>
    %c6_159 = arith.constant 6 : index
    %c0_160 = arith.constant 0 : index
    %286 = vector.load %arg17[%c6_159, %c0_160] : memref<16x128xf32, #tpu.memory_space<vmem>>, vector<2x128xf32>
    %287 = arith.select %18, %285, %286 : vector<2x128xi1>, vector<2x128xf32>
    %c8_161 = arith.constant 8 : index
    %c0_162 = arith.constant 0 : index
    %288 = vector.load %arg18[%c8_161, %c0_162] : memref<16x128xf32, #tpu.memory_space<vmem>>, vector<2x128xf32>
    tpu.vector_store %arg18[%c8_161, %c0_162], %287 {strides = array<i32>} : memref<16x128xf32, #tpu.memory_space<vmem>>, vector<2x128xf32>,
    %c10_163 = arith.constant 10 : index
    %c0_164 = arith.constant 0 : index
    %289 = vector.load %arg17[%c10_163, %c0_164] : memref<16x128xf32, #tpu.memory_space<vmem>>, vector<2x128xf32>
    %c4_165 = arith.constant 4 : index
    %c0_166 = arith.constant 0 : index
    %290 = vector.load %arg17[%c4_165, %c0_166] : memref<16x128xf32, #tpu.memory_space<vmem>>, vector<2x128xf32>
    %291 = arith.select %18, %289, %290 : vector<2x128xi1>, vector<2x128xf32>
    %c10_167 = arith.constant 10 : index
    %c0_168 = arith.constant 0 : index
    %292 = vector.load %arg18[%c10_167, %c0_168] : memref<16x128xf32, #tpu.memory_space<vmem>>, vector<2x128xf32>
    tpu.vector_store %arg18[%c10_167, %c0_168], %291 {strides = array<i32>} : memref<16x128xf32, #tpu.memory_space<vmem>>, vector<2x128xf32>,
    %c12_169 = arith.constant 12 : index
    %c0_170 = arith.constant 0 : index
    %293 = vector.load %arg17[%c12_169, %c0_170] : memref<16x128xf32, #tpu.memory_space<vmem>>, vector<2x128xf32>
    %c2_171 = arith.constant 2 : index
    %c0_172 = arith.constant 0 : index
    %294 = vector.load %arg17[%c2_171, %c0_172] : memref<16x128xf32, #tpu.memory_space<vmem>>, vector<2x128xf32>
    %295 = arith.select %18, %293, %294 : vector<2x128xi1>, vector<2x128xf32>
    %c12_173 = arith.constant 12 : index
    %c0_174 = arith.constant 0 : index
    %296 = vector.load %arg18[%c12_173, %c0_174] : memref<16x128xf32, #tpu.memory_space<vmem>>, vector<2x128xf32>
    tpu.vector_store %arg18[%c12_173, %c0_174], %295 {strides = array<i32>} : memref<16x128xf32, #tpu.memory_space<vmem>>, vector<2x128xf32>,
    %c14_175 = arith.constant 14 : index
    %c0_176 = arith.constant 0 : index
    %297 = vector.load %arg17[%c14_175, %c0_176] : memref<16x128xf32, #tpu.memory_space<vmem>>, vector<2x128xf32>
    %c0_177 = arith.constant 0 : index
    %c0_178 = arith.constant 0 : index
    %298 = vector.load %arg17[%c0_177, %c0_178] : memref<16x128xf32, #tpu.memory_space<vmem>>, vector<2x128xf32>
    %299 = arith.select %18, %297, %298 : vector<2x128xi1>, vector<2x128xf32>
    %c14_179 = arith.constant 14 : index
    %c0_180 = arith.constant 0 : index
    %300 = vector.load %arg18[%c14_179, %c0_180] : memref<16x128xf32, #tpu.memory_space<vmem>>, vector<2x128xf32>
    tpu.vector_store %arg18[%c14_179, %c0_180], %299 {strides = array<i32>} : memref<16x128xf32, #tpu.memory_space<vmem>>, vector<2x128xf32>,
    %cst_181 = arith.constant 0.000000e+00 : f32
    %301 = vector.broadcast %cst_181 : f32 to vector<2x32xf32>
    %cst_182 = arith.constant 0.000000e+00 : f32
    %302 = vector.broadcast %cst_182 : f32 to vector<2x32xf32>
    %c0_183 = arith.constant 0 : index
    %c0_184 = arith.constant 0 : index
    %303 = vector.load %arg18[%c0_183, %c0_184] : memref<16x128xf32, #tpu.memory_space<vmem>>, vector<2x128xf32>
    %304 = arith.truncf %301 : vector<2x32xf32> to vector<2x32xbf16>
    %cst_185 = arith.constant dense<0.000000e+00> : vector<2x128xf32>
    %305 = tpu.matmul %304, %260, %cst_185 {dimension_numbers = #tpu.dot_dimension_numbers<[1], [0], [0], [1], [0, 0, 1, 1], [], []>} : vector<2x32xbf16>, vector<32x128xbf16>, vector<2x128xf32> -> vector<2x128xf32>
    %306 = arith.addf %303, %305 : vector<2x128xf32>
    %307 = arith.negf %306 : vector<2x128xf32>
    %308 = math.exp %307 : vector<2x128xf32>
    %cst_186 = arith.constant 1.000000e+00 : f32
    %309 = vector.broadcast %cst_186 : f32 to vector<2x128xf32>
    %310 = arith.addf %309, %308 : vector<2x128xf32>
    %311 = arith.divf %309, %310 : vector<2x128xf32>
    %312 = vector.extract_strided_slice %311 {offsets = [0, 0], sizes = [2, 32], strides = [1, 1]} : vector<2x128xf32> to vector<2x32xf32>
    %313 = vector.extract_strided_slice %311 {offsets = [0, 32], sizes = [2, 32], strides = [1, 1]} : vector<2x128xf32> to vector<2x32xf32>
    %314 = vector.extract_strided_slice %311 {offsets = [0, 96], sizes = [2, 32], strides = [1, 1]} : vector<2x128xf32> to vector<2x32xf32>
    %315 = vector.extract_strided_slice %306 {offsets = [0, 64], sizes = [2, 32], strides = [1, 1]} : vector<2x128xf32> to vector<2x32xf32>
    %316 = math.tanh %315 : vector<2x32xf32>
    %317 = arith.mulf %313, %302 : vector<2x32xf32>
    %318 = arith.mulf %312, %316 : vector<2x32xf32>
    %319 = arith.addf %317, %318 : vector<2x32xf32>
    %320 = math.tanh %319 : vector<2x32xf32>
    %321 = arith.mulf %314, %320 : vector<2x32xf32>
    %322 = vector.extract_strided_slice %321 {offsets = [0, 0], sizes = [2, 16], strides = [1, 1]} : vector<2x32xf32> to vector<2x16xf32>
    %c0_187 = arith.constant 0 : index
    %c0_188 = arith.constant 0 : index
    %323 = vector.load %arg19[%c0_187, %c0_188] : memref<16x32xf32, #tpu.memory_space<vmem>>, vector<2x16xf32>
    tpu.vector_store %arg19[%c0_187, %c0_188], %322 {strides = array<i32>} : memref<16x32xf32, #tpu.memory_space<vmem>>, vector<2x16xf32>,
    %324 = vector.extract_strided_slice %321 {offsets = [0, 16], sizes = [2, 16], strides = [1, 1]} : vector<2x32xf32> to vector<2x16xf32>
    %c14_189 = arith.constant 14 : index
    %c16_190 = arith.constant 16 : index
    %325 = vector.load %arg19[%c14_189, %c16_190] : memref<16x32xf32, #tpu.memory_space<vmem>>, vector<2x16xf32>
    tpu.vector_store %arg19[%c14_189, %c16_190], %324 {strides = array<i32>} : memref<16x32xf32, #tpu.memory_space<vmem>>, vector<2x16xf32>,
    %c2_191 = arith.constant 2 : index
    %c0_192 = arith.constant 0 : index
    %326 = vector.load %arg18[%c2_191, %c0_192] : memref<16x128xf32, #tpu.memory_space<vmem>>, vector<2x128xf32>
    %327 = arith.truncf %321 : vector<2x32xf32> to vector<2x32xbf16>
    %cst_193 = arith.constant dense<0.000000e+00> : vector<2x128xf32>
    %328 = tpu.matmul %327, %260, %cst_193 {dimension_numbers = #tpu.dot_dimension_numbers<[1], [0], [0], [1], [0, 0, 1, 1], [], []>} : vector<2x32xbf16>, vector<32x128xbf16>, vector<2x128xf32> -> vector<2x128xf32>
    %329 = arith.addf %326, %328 : vector<2x128xf32>
    %330 = arith.negf %329 : vector<2x128xf32>
    %331 = math.exp %330 : vector<2x128xf32>
    %cst_194 = arith.constant 1.000000e+00 : f32
    %332 = vector.broadcast %cst_194 : f32 to vector<2x128xf32>
    %333 = arith.addf %332, %331 : vector<2x128xf32>
    %334 = arith.divf %332, %333 : vector<2x128xf32>
    %335 = vector.extract_strided_slice %334 {offsets = [0, 0], sizes = [2, 32], strides = [1, 1]} : vector<2x128xf32> to vector<2x32xf32>
    %336 = vector.extract_strided_slice %334 {offsets = [0, 32], sizes = [2, 32], strides = [1, 1]} : vector<2x128xf32> to vector<2x32xf32>
    %337 = vector.extract_strided_slice %334 {offsets = [0, 96], sizes = [2, 32], strides = [1, 1]} : vector<2x128xf32> to vector<2x32xf32>
    %338 = vector.extract_strided_slice %329 {offsets = [0, 64], sizes = [2, 32], strides = [1, 1]} : vector<2x128xf32> to vector<2x32xf32>
    %339 = math.tanh %338 : vector<2x32xf32>
    %340 = arith.mulf %336, %319 : vector<2x32xf32>
    %341 = arith.mulf %335, %339 : vector<2x32xf32>
    %342 = arith.addf %340, %341 : vector<2x32xf32>
    %343 = math.tanh %342 : vector<2x32xf32>
    %344 = arith.mulf %337, %343 : vector<2x32xf32>
    %345 = vector.extract_strided_slice %344 {offsets = [0, 0], sizes = [2, 16], strides = [1, 1]} : vector<2x32xf32> to vector<2x16xf32>
    %c2_195 = arith.constant 2 : index
    %c0_196 = arith.constant 0 : index
    %346 = vector.load %arg19[%c2_195, %c0_196] : memref<16x32xf32, #tpu.memory_space<vmem>>, vector<2x16xf32>
    tpu.vector_store %arg19[%c2_195, %c0_196], %345 {strides = array<i32>} : memref<16x32xf32, #tpu.memory_space<vmem>>, vector<2x16xf32>,
    %347 = vector.extract_strided_slice %344 {offsets = [0, 16], sizes = [2, 16], strides = [1, 1]} : vector<2x32xf32> to vector<2x16xf32>
    %c12_197 = arith.constant 12 : index
    %c16_198 = arith.constant 16 : index
    %348 = vector.load %arg19[%c12_197, %c16_198] : memref<16x32xf32, #tpu.memory_space<vmem>>, vector<2x16xf32>
    tpu.vector_store %arg19[%c12_197, %c16_198], %347 {strides = array<i32>} : memref<16x32xf32, #tpu.memory_space<vmem>>, vector<2x16xf32>,
    %c4_199 = arith.constant 4 : index
    %c0_200 = arith.constant 0 : index
    %349 = vector.load %arg18[%c4_199, %c0_200] : memref<16x128xf32, #tpu.memory_space<vmem>>, vector<2x128xf32>
    %350 = arith.truncf %344 : vector<2x32xf32> to vector<2x32xbf16>
    %cst_201 = arith.constant dense<0.000000e+00> : vector<2x128xf32>
    %351 = tpu.matmul %350, %260, %cst_201 {dimension_numbers = #tpu.dot_dimension_numbers<[1], [0], [0], [1], [0, 0, 1, 1], [], []>} : vector<2x32xbf16>, vector<32x128xbf16>, vector<2x128xf32> -> vector<2x128xf32>
    %352 = arith.addf %349, %351 : vector<2x128xf32>
    %353 = arith.negf %352 : vector<2x128xf32>
    %354 = math.exp %353 : vector<2x128xf32>
    %cst_202 = arith.constant 1.000000e+00 : f32
    %355 = vector.broadcast %cst_202 : f32 to vector<2x128xf32>
    %356 = arith.addf %355, %354 : vector<2x128xf32>
    %357 = arith.divf %355, %356 : vector<2x128xf32>
    %358 = vector.extract_strided_slice %357 {offsets = [0, 0], sizes = [2, 32], strides = [1, 1]} : vector<2x128xf32> to vector<2x32xf32>
    %359 = vector.extract_strided_slice %357 {offsets = [0, 32], sizes = [2, 32], strides = [1, 1]} : vector<2x128xf32> to vector<2x32xf32>
    %360 = vector.extract_strided_slice %357 {offsets = [0, 96], sizes = [2, 32], strides = [1, 1]} : vector<2x128xf32> to vector<2x32xf32>
    %361 = vector.extract_strided_slice %352 {offsets = [0, 64], sizes = [2, 32], strides = [1, 1]} : vector<2x128xf32> to vector<2x32xf32>
    %362 = math.tanh %361 : vector<2x32xf32>
    %363 = arith.mulf %359, %342 : vector<2x32xf32>
    %364 = arith.mulf %358, %362 : vector<2x32xf32>
    %365 = arith.addf %363, %364 : vector<2x32xf32>
    %366 = math.tanh %365 : vector<2x32xf32>
    %367 = arith.mulf %360, %366 : vector<2x32xf32>
    %368 = vector.extract_strided_slice %367 {offsets = [0, 0], sizes = [2, 16], strides = [1, 1]} : vector<2x32xf32> to vector<2x16xf32>
    %c4_203 = arith.constant 4 : index
    %c0_204 = arith.constant 0 : index
    %369 = vector.load %arg19[%c4_203, %c0_204] : memref<16x32xf32, #tpu.memory_space<vmem>>, vector<2x16xf32>
    tpu.vector_store %arg19[%c4_203, %c0_204], %368 {strides = array<i32>} : memref<16x32xf32, #tpu.memory_space<vmem>>, vector<2x16xf32>,
    %370 = vector.extract_strided_slice %367 {offsets = [0, 16], sizes = [2, 16], strides = [1, 1]} : vector<2x32xf32> to vector<2x16xf32>
    %c10_205 = arith.constant 10 : index
    %c16_206 = arith.constant 16 : index
    %371 = vector.load %arg19[%c10_205, %c16_206] : memref<16x32xf32, #tpu.memory_space<vmem>>, vector<2x16xf32>
    tpu.vector_store %arg19[%c10_205, %c16_206], %370 {strides = array<i32>} : memref<16x32xf32, #tpu.memory_space<vmem>>, vector<2x16xf32>,
    %c6_207 = arith.constant 6 : index
    %c0_208 = arith.constant 0 : index
    %372 = vector.load %arg18[%c6_207, %c0_208] : memref<16x128xf32, #tpu.memory_space<vmem>>, vector<2x128xf32>
    %373 = arith.truncf %367 : vector<2x32xf32> to vector<2x32xbf16>
    %cst_209 = arith.constant dense<0.000000e+00> : vector<2x128xf32>
    %374 = tpu.matmul %373, %260, %cst_209 {dimension_numbers = #tpu.dot_dimension_numbers<[1], [0], [0], [1], [0, 0, 1, 1], [], []>} : vector<2x32xbf16>, vector<32x128xbf16>, vector<2x128xf32> -> vector<2x128xf32>
    %375 = arith.addf %372, %374 : vector<2x128xf32>
    %376 = arith.negf %375 : vector<2x128xf32>
    %377 = math.exp %376 : vector<2x128xf32>
    %cst_210 = arith.constant 1.000000e+00 : f32
    %378 = vector.broadcast %cst_210 : f32 to vector<2x128xf32>
    %379 = arith.addf %378, %377 : vector<2x128xf32>
    %380 = arith.divf %378, %379 : vector<2x128xf32>
    %381 = vector.extract_strided_slice %380 {offsets = [0, 0], sizes = [2, 32], strides = [1, 1]} : vector<2x128xf32> to vector<2x32xf32>
    %382 = vector.extract_strided_slice %380 {offsets = [0, 32], sizes = [2, 32], strides = [1, 1]} : vector<2x128xf32> to vector<2x32xf32>
    %383 = vector.extract_strided_slice %380 {offsets = [0, 96], sizes = [2, 32], strides = [1, 1]} : vector<2x128xf32> to vector<2x32xf32>
    %384 = vector.extract_strided_slice %375 {offsets = [0, 64], sizes = [2, 32], strides = [1, 1]} : vector<2x128xf32> to vector<2x32xf32>
    %385 = math.tanh %384 : vector<2x32xf32>
    %386 = arith.mulf %382, %365 : vector<2x32xf32>
    %387 = arith.mulf %381, %385 : vector<2x32xf32>
    %388 = arith.addf %386, %387 : vector<2x32xf32>
    %389 = math.tanh %388 : vector<2x32xf32>
    %390 = arith.mulf %383, %389 : vector<2x32xf32>
    %391 = vector.extract_strided_slice %390 {offsets = [0, 0], sizes = [2, 16], strides = [1, 1]} : vector<2x32xf32> to vector<2x16xf32>
    %c6_211 = arith.constant 6 : index
    %c0_212 = arith.constant 0 : index
    %392 = vector.load %arg19[%c6_211, %c0_212] : memref<16x32xf32, #tpu.memory_space<vmem>>, vector<2x16xf32>
    tpu.vector_store %arg19[%c6_211, %c0_212], %391 {strides = array<i32>} : memref<16x32xf32, #tpu.memory_space<vmem>>, vector<2x16xf32>,
    %393 = vector.extract_strided_slice %390 {offsets = [0, 16], sizes = [2, 16], strides = [1, 1]} : vector<2x32xf32> to vector<2x16xf32>
    %c8_213 = arith.constant 8 : index
    %c16_214 = arith.constant 16 : index
    %394 = vector.load %arg19[%c8_213, %c16_214] : memref<16x32xf32, #tpu.memory_space<vmem>>, vector<2x16xf32>
    tpu.vector_store %arg19[%c8_213, %c16_214], %393 {strides = array<i32>} : memref<16x32xf32, #tpu.memory_space<vmem>>, vector<2x16xf32>,
    %c8_215 = arith.constant 8 : index
    %c0_216 = arith.constant 0 : index
    %395 = vector.load %arg18[%c8_215, %c0_216] : memref<16x128xf32, #tpu.memory_space<vmem>>, vector<2x128xf32>
    %396 = arith.truncf %390 : vector<2x32xf32> to vector<2x32xbf16>
    %cst_217 = arith.constant dense<0.000000e+00> : vector<2x128xf32>
    %397 = tpu.matmul %396, %260, %cst_217 {dimension_numbers = #tpu.dot_dimension_numbers<[1], [0], [0], [1], [0, 0, 1, 1], [], []>} : vector<2x32xbf16>, vector<32x128xbf16>, vector<2x128xf32> -> vector<2x128xf32>
    %398 = arith.addf %395, %397 : vector<2x128xf32>
    %399 = arith.negf %398 : vector<2x128xf32>
    %400 = math.exp %399 : vector<2x128xf32>
    %cst_218 = arith.constant 1.000000e+00 : f32
    %401 = vector.broadcast %cst_218 : f32 to vector<2x128xf32>
    %402 = arith.addf %401, %400 : vector<2x128xf32>
    %403 = arith.divf %401, %402 : vector<2x128xf32>
    %404 = vector.extract_strided_slice %403 {offsets = [0, 0], sizes = [2, 32], strides = [1, 1]} : vector<2x128xf32> to vector<2x32xf32>
    %405 = vector.extract_strided_slice %403 {offsets = [0, 32], sizes = [2, 32], strides = [1, 1]} : vector<2x128xf32> to vector<2x32xf32>
    %406 = vector.extract_strided_slice %403 {offsets = [0, 96], sizes = [2, 32], strides = [1, 1]} : vector<2x128xf32> to vector<2x32xf32>
    %407 = vector.extract_strided_slice %398 {offsets = [0, 64], sizes = [2, 32], strides = [1, 1]} : vector<2x128xf32> to vector<2x32xf32>
    %408 = math.tanh %407 : vector<2x32xf32>
    %409 = arith.mulf %405, %388 : vector<2x32xf32>
    %410 = arith.mulf %404, %408 : vector<2x32xf32>
    %411 = arith.addf %409, %410 : vector<2x32xf32>
    %412 = math.tanh %411 : vector<2x32xf32>
    %413 = arith.mulf %406, %412 : vector<2x32xf32>
    %414 = vector.extract_strided_slice %413 {offsets = [0, 0], sizes = [2, 16], strides = [1, 1]} : vector<2x32xf32> to vector<2x16xf32>
    %c8_219 = arith.constant 8 : index
    %c0_220 = arith.constant 0 : index
    %415 = vector.load %arg19[%c8_219, %c0_220] : memref<16x32xf32, #tpu.memory_space<vmem>>, vector<2x16xf32>
    tpu.vector_store %arg19[%c8_219, %c0_220], %414 {strides = array<i32>} : memref<16x32xf32, #tpu.memory_space<vmem>>, vector<2x16xf32>,
    %416 = vector.extract_strided_slice %413 {offsets = [0, 16], sizes = [2, 16], strides = [1, 1]} : vector<2x32xf32> to vector<2x16xf32>
    %c6_221 = arith.constant 6 : index
    %c16_222 = arith.constant 16 : index
    %417 = vector.load %arg19[%c6_221, %c16_222] : memref<16x32xf32, #tpu.memory_space<vmem>>, vector<2x16xf32>
    tpu.vector_store %arg19[%c6_221, %c16_222], %416 {strides = array<i32>} : memref<16x32xf32, #tpu.memory_space<vmem>>, vector<2x16xf32>,
    %c10_223 = arith.constant 10 : index
    %c0_224 = arith.constant 0 : index
    %418 = vector.load %arg18[%c10_223, %c0_224] : memref<16x128xf32, #tpu.memory_space<vmem>>, vector<2x128xf32>
    %419 = arith.truncf %413 : vector<2x32xf32> to vector<2x32xbf16>
    %cst_225 = arith.constant dense<0.000000e+00> : vector<2x128xf32>
    %420 = tpu.matmul %419, %260, %cst_225 {dimension_numbers = #tpu.dot_dimension_numbers<[1], [0], [0], [1], [0, 0, 1, 1], [], []>} : vector<2x32xbf16>, vector<32x128xbf16>, vector<2x128xf32> -> vector<2x128xf32>
    %421 = arith.addf %418, %420 : vector<2x128xf32>
    %422 = arith.negf %421 : vector<2x128xf32>
    %423 = math.exp %422 : vector<2x128xf32>
    %cst_226 = arith.constant 1.000000e+00 : f32
    %424 = vector.broadcast %cst_226 : f32 to vector<2x128xf32>
    %425 = arith.addf %424, %423 : vector<2x128xf32>
    %426 = arith.divf %424, %425 : vector<2x128xf32>
    %427 = vector.extract_strided_slice %426 {offsets = [0, 0], sizes = [2, 32], strides = [1, 1]} : vector<2x128xf32> to vector<2x32xf32>
    %428 = vector.extract_strided_slice %426 {offsets = [0, 32], sizes = [2, 32], strides = [1, 1]} : vector<2x128xf32> to vector<2x32xf32>
    %429 = vector.extract_strided_slice %426 {offsets = [0, 96], sizes = [2, 32], strides = [1, 1]} : vector<2x128xf32> to vector<2x32xf32>
    %430 = vector.extract_strided_slice %421 {offsets = [0, 64], sizes = [2, 32], strides = [1, 1]} : vector<2x128xf32> to vector<2x32xf32>
    %431 = math.tanh %430 : vector<2x32xf32>
    %432 = arith.mulf %428, %411 : vector<2x32xf32>
    %433 = arith.mulf %427, %431 : vector<2x32xf32>
    %434 = arith.addf %432, %433 : vector<2x32xf32>
    %435 = math.tanh %434 : vector<2x32xf32>
    %436 = arith.mulf %429, %435 : vector<2x32xf32>
    %437 = vector.extract_strided_slice %436 {offsets = [0, 0], sizes = [2, 16], strides = [1, 1]} : vector<2x32xf32> to vector<2x16xf32>
    %c10_227 = arith.constant 10 : index
    %c0_228 = arith.constant 0 : index
    %438 = vector.load %arg19[%c10_227, %c0_228] : memref<16x32xf32, #tpu.memory_space<vmem>>, vector<2x16xf32>
    tpu.vector_store %arg19[%c10_227, %c0_228], %437 {strides = array<i32>} : memref<16x32xf32, #tpu.memory_space<vmem>>, vector<2x16xf32>,
    %439 = vector.extract_strided_slice %436 {offsets = [0, 16], sizes = [2, 16], strides = [1, 1]} : vector<2x32xf32> to vector<2x16xf32>
    %c4_229 = arith.constant 4 : index
    %c16_230 = arith.constant 16 : index
    %440 = vector.load %arg19[%c4_229, %c16_230] : memref<16x32xf32, #tpu.memory_space<vmem>>, vector<2x16xf32>
    tpu.vector_store %arg19[%c4_229, %c16_230], %439 {strides = array<i32>} : memref<16x32xf32, #tpu.memory_space<vmem>>, vector<2x16xf32>,
    %c12_231 = arith.constant 12 : index
    %c0_232 = arith.constant 0 : index
    %441 = vector.load %arg18[%c12_231, %c0_232] : memref<16x128xf32, #tpu.memory_space<vmem>>, vector<2x128xf32>
    %442 = arith.truncf %436 : vector<2x32xf32> to vector<2x32xbf16>
    %cst_233 = arith.constant dense<0.000000e+00> : vector<2x128xf32>
    %443 = tpu.matmul %442, %260, %cst_233 {dimension_numbers = #tpu.dot_dimension_numbers<[1], [0], [0], [1], [0, 0, 1, 1], [], []>} : vector<2x32xbf16>, vector<32x128xbf16>, vector<2x128xf32> -> vector<2x128xf32>
    %444 = arith.addf %441, %443 : vector<2x128xf32>
    %445 = arith.negf %444 : vector<2x128xf32>
    %446 = math.exp %445 : vector<2x128xf32>
    %cst_234 = arith.constant 1.000000e+00 : f32
    %447 = vector.broadcast %cst_234 : f32 to vector<2x128xf32>
    %448 = arith.addf %447, %446 : vector<2x128xf32>
    %449 = arith.divf %447, %448 : vector<2x128xf32>
    %450 = vector.extract_strided_slice %449 {offsets = [0, 0], sizes = [2, 32], strides = [1, 1]} : vector<2x128xf32> to vector<2x32xf32>
    %451 = vector.extract_strided_slice %449 {offsets = [0, 32], sizes = [2, 32], strides = [1, 1]} : vector<2x128xf32> to vector<2x32xf32>
    %452 = vector.extract_strided_slice %449 {offsets = [0, 96], sizes = [2, 32], strides = [1, 1]} : vector<2x128xf32> to vector<2x32xf32>
    %453 = vector.extract_strided_slice %444 {offsets = [0, 64], sizes = [2, 32], strides = [1, 1]} : vector<2x128xf32> to vector<2x32xf32>
    %454 = math.tanh %453 : vector<2x32xf32>
    %455 = arith.mulf %451, %434 : vector<2x32xf32>
    %456 = arith.mulf %450, %454 : vector<2x32xf32>
    %457 = arith.addf %455, %456 : vector<2x32xf32>
    %458 = math.tanh %457 : vector<2x32xf32>
    %459 = arith.mulf %452, %458 : vector<2x32xf32>
    %460 = vector.extract_strided_slice %459 {offsets = [0, 0], sizes = [2, 16], strides = [1, 1]} : vector<2x32xf32> to vector<2x16xf32>
    %c12_235 = arith.constant 12 : index
    %c0_236 = arith.constant 0 : index
    %461 = vector.load %arg19[%c12_235, %c0_236] : memref<16x32xf32, #tpu.memory_space<vmem>>, vector<2x16xf32>
    tpu.vector_store %arg19[%c12_235, %c0_236], %460 {strides = array<i32>} : memref<16x32xf32, #tpu.memory_space<vmem>>, vector<2x16xf32>,
    %462 = vector.extract_strided_slice %459 {offsets = [0, 16], sizes = [2, 16], strides = [1, 1]} : vector<2x32xf32> to vector<2x16xf32>
    %c2_237 = arith.constant 2 : index
    %c16_238 = arith.constant 16 : index
    %463 = vector.load %arg19[%c2_237, %c16_238] : memref<16x32xf32, #tpu.memory_space<vmem>>, vector<2x16xf32>
    tpu.vector_store %arg19[%c2_237, %c16_238], %462 {strides = array<i32>} : memref<16x32xf32, #tpu.memory_space<vmem>>, vector<2x16xf32>,
    %c14_239 = arith.constant 14 : index
    %c0_240 = arith.constant 0 : index
    %464 = vector.load %arg18[%c14_239, %c0_240] : memref<16x128xf32, #tpu.memory_space<vmem>>, vector<2x128xf32>
    %465 = arith.truncf %459 : vector<2x32xf32> to vector<2x32xbf16>
    %cst_241 = arith.constant dense<0.000000e+00> : vector<2x128xf32>
    %466 = tpu.matmul %465, %260, %cst_241 {dimension_numbers = #tpu.dot_dimension_numbers<[1], [0], [0], [1], [0, 0, 1, 1], [], []>} : vector<2x32xbf16>, vector<32x128xbf16>, vector<2x128xf32> -> vector<2x128xf32>
    %467 = arith.addf %464, %466 : vector<2x128xf32>
    %468 = arith.negf %467 : vector<2x128xf32>
    %469 = math.exp %468 : vector<2x128xf32>
    %cst_242 = arith.constant 1.000000e+00 : f32
    %470 = vector.broadcast %cst_242 : f32 to vector<2x128xf32>
    %471 = arith.addf %470, %469 : vector<2x128xf32>
    %472 = arith.divf %470, %471 : vector<2x128xf32>
    %473 = vector.extract_strided_slice %472 {offsets = [0, 0], sizes = [2, 32], strides = [1, 1]} : vector<2x128xf32> to vector<2x32xf32>
    %474 = vector.extract_strided_slice %472 {offsets = [0, 32], sizes = [2, 32], strides = [1, 1]} : vector<2x128xf32> to vector<2x32xf32>
    %475 = vector.extract_strided_slice %472 {offsets = [0, 96], sizes = [2, 32], strides = [1, 1]} : vector<2x128xf32> to vector<2x32xf32>
    %476 = vector.extract_strided_slice %467 {offsets = [0, 64], sizes = [2, 32], strides = [1, 1]} : vector<2x128xf32> to vector<2x32xf32>
    %477 = math.tanh %476 : vector<2x32xf32>
    %478 = arith.mulf %474, %457 : vector<2x32xf32>
    %479 = arith.mulf %473, %477 : vector<2x32xf32>
    %480 = arith.addf %478, %479 : vector<2x32xf32>
    %481 = math.tanh %480 : vector<2x32xf32>
    %482 = arith.mulf %475, %481 : vector<2x32xf32>
    %483 = vector.extract_strided_slice %482 {offsets = [0, 0], sizes = [2, 16], strides = [1, 1]} : vector<2x32xf32> to vector<2x16xf32>
    %c14_243 = arith.constant 14 : index
    %c0_244 = arith.constant 0 : index
    %484 = vector.load %arg19[%c14_243, %c0_244] : memref<16x32xf32, #tpu.memory_space<vmem>>, vector<2x16xf32>
    tpu.vector_store %arg19[%c14_243, %c0_244], %483 {strides = array<i32>} : memref<16x32xf32, #tpu.memory_space<vmem>>, vector<2x16xf32>,
    %485 = vector.extract_strided_slice %482 {offsets = [0, 16], sizes = [2, 16], strides = [1, 1]} : vector<2x32xf32> to vector<2x16xf32>
    %c0_245 = arith.constant 0 : index
    %c16_246 = arith.constant 16 : index
    %486 = vector.load %arg19[%c0_245, %c16_246] : memref<16x32xf32, #tpu.memory_space<vmem>>, vector<2x16xf32>
    tpu.vector_store %arg19[%c0_245, %c16_246], %485 {strides = array<i32>} : memref<16x32xf32, #tpu.memory_space<vmem>>, vector<2x16xf32>,
    %487 = vector.extract_strided_slice %482 {offsets = [0, 16], sizes = [2, 16], strides = [1, 1]} : vector<2x32xf32> to vector<2x16xf32>
    %c0_247 = arith.constant 0 : index
    %c0_248 = arith.constant 0 : index
    %488 = vector.load %arg11[%c0_247, %c0_248] : memref<32x128xf32, #tpu.memory_space<vmem>>, vector<32x128xf32>
    %489 = arith.truncf %488 : vector<32x128xf32> to vector<32x128xbf16>
    %c0_249 = arith.constant 0 : index
    %c0_250 = arith.constant 0 : index
    %490 = vector.load %arg10[%c0_249, %c0_250] : memref<8x128xf32, #tpu.memory_space<vmem>>, vector<8x128xf32>
    %491 = arith.truncf %490 : vector<8x128xf32> to vector<8x128xbf16>
    %c0_251 = arith.constant 0 : index
    %c0_252 = arith.constant 0 : index
    %492 = vector.load %arg13[%c0_251, %c0_252] : memref<32x8xf32, #tpu.memory_space<vmem>>, vector<32x8xf32>
    %493 = arith.truncf %492 : vector<32x8xf32> to vector<32x8xbf16>
    %c0_253 = arith.constant 0 : index
    %c0_254 = arith.constant 0 : index
    %494 = vector.load %arg12[%c0_253, %c0_254] : memref<1x128xf32, #tpu.memory_space<vmem>>, vector<1x128xf32>
    %c0_255 = arith.constant 0 : index
    %c0_256 = arith.constant 0 : index
    %495 = vector.load %arg14[%c0_255, %c0_256] : memref<1x8xf32, #tpu.memory_space<vmem>>, vector<1x8xf32>
    %c0_257 = arith.constant 0 : index
    %c0_258 = arith.constant 0 : index
    %496 = vector.load %arg19[%c0_257, %c0_258] : memref<16x32xf32, #tpu.memory_space<vmem>>, vector<16x32xf32>
    %497 = arith.truncf %496 : vector<16x32xf32> to vector<16x32xbf16>
    %cst_259 = arith.constant dense<0.000000e+00> : vector<16x128xf32>
    %498 = tpu.matmul %497, %489, %cst_259 {dimension_numbers = #tpu.dot_dimension_numbers<[1], [0], [0], [1], [0, 0, 1, 1], [], []>} : vector<16x32xbf16>, vector<32x128xbf16>, vector<16x128xf32> -> vector<16x128xf32>
    %c0_260 = arith.constant 0 : index
    %c0_261 = arith.constant 0 : index
    %499 = vector.load %arg20[%c0_260, %c0_261] : memref<16x128xf32, #tpu.memory_space<vmem>>, vector<16x128xf32>
    tpu.vector_store %arg20[%c0_260, %c0_261], %498 {strides = array<i32>} : memref<16x128xf32, #tpu.memory_space<vmem>>, vector<16x128xf32>,
    %500 = tpu.concatenate %487, %487 in 1 : vector<2x16xf32>, vector<2x16xf32> -> vector<2x32xf32>
    %cst_262 = arith.constant 0.000000e+00 : f32
    %501 = vector.broadcast %cst_262 : f32 to vector<2x32xf32>
    %502 = tpu.iota {dimensions = array<i32: 1>} : vector<2x8xi32>
    %cst_263 = arith.constant 0.000000e+00 : f32
    %503 = vector.broadcast %cst_263 : f32 to vector<2x1xf32>
    %c0_264 = arith.constant 0 : index
    %c0_265 = arith.constant 0 : index
    %504 = vector.load %arg20[%c0_264, %c0_265] : memref<16x128xf32, #tpu.memory_space<vmem>>, vector<2x128xf32>
    %505 = vector.broadcast %494 : vector<1x128xf32> to vector<2x128xf32>
    %506 = arith.addf %505, %504 : vector<2x128xf32>
    %507 = arith.truncf %501 : vector<2x32xf32> to vector<2x32xbf16>
    %cst_266 = arith.constant dense<0.000000e+00> : vector<2x128xf32>
    %508 = tpu.matmul %507, %489, %cst_266 {dimension_numbers = #tpu.dot_dimension_numbers<[1], [0], [0], [1], [0, 0, 1, 1], [], []>} : vector<2x32xbf16>, vector<32x128xbf16>, vector<2x128xf32> -> vector<2x128xf32>
    %509 = arith.addf %506, %508 : vector<2x128xf32>
    %510 = arith.negf %509 : vector<2x128xf32>
    %511 = math.exp %510 : vector<2x128xf32>
    %cst_267 = arith.constant 1.000000e+00 : f32
    %512 = vector.broadcast %cst_267 : f32 to vector<2x128xf32>
    %513 = arith.addf %512, %511 : vector<2x128xf32>
    %514 = arith.divf %512, %513 : vector<2x128xf32>
    %515 = vector.extract_strided_slice %514 {offsets = [0, 0], sizes = [2, 32], strides = [1, 1]} : vector<2x128xf32> to vector<2x32xf32>
    %516 = vector.extract_strided_slice %514 {offsets = [0, 32], sizes = [2, 32], strides = [1, 1]} : vector<2x128xf32> to vector<2x32xf32>
    %517 = vector.extract_strided_slice %514 {offsets = [0, 96], sizes = [2, 32], strides = [1, 1]} : vector<2x128xf32> to vector<2x32xf32>
    %518 = vector.extract_strided_slice %509 {offsets = [0, 64], sizes = [2, 32], strides = [1, 1]} : vector<2x128xf32> to vector<2x32xf32>
    %519 = math.tanh %518 : vector<2x32xf32>
    %520 = arith.mulf %516, %500 : vector<2x32xf32>
    %521 = arith.mulf %515, %519 : vector<2x32xf32>
    %522 = arith.addf %520, %521 : vector<2x32xf32>
    %523 = math.tanh %522 : vector<2x32xf32>
    %524 = arith.mulf %517, %523 : vector<2x32xf32>
    %525 = arith.truncf %524 : vector<2x32xf32> to vector<2x32xbf16>
    %cst_268 = arith.constant dense<0.000000e+00> : vector<2x8xf32>
    %526 = tpu.matmul %525, %493, %cst_268 {dimension_numbers = #tpu.dot_dimension_numbers<[1], [0], [0], [1], [0, 0, 1, 1], [], []>} : vector<2x32xbf16>, vector<32x8xbf16>, vector<2x8xf32> -> vector<2x8xf32>
    %527 = vector.broadcast %495 : vector<1x8xf32> to vector<2x8xf32>
    %528 = arith.addf %526, %527 : vector<2x8xf32>
    %cst_269 = arith.constant dense<0xFF800000> : vector<2xf32>
    %529 = vector.multi_reduction <maximumf>, %528, %cst_269 [1] : vector<2x8xf32> to vector<2xf32>
    %530 = vector.shape_cast %529 : vector<2xf32> to vector<2x1xf32>
    %531 = vector.broadcast %530 : vector<2x1xf32> to vector<2x8xf32>
    %532 = arith.subf %528, %531 : vector<2x8xf32>
    %533 = math.exp %532 : vector<2x8xf32>
    %cst_270 = arith.constant dense<0.000000e+00> : vector<2xf32>
    %534 = vector.multi_reduction <add>, %533, %cst_270 [1] : vector<2x8xf32> to vector<2xf32>
    %535 = vector.shape_cast %534 : vector<2xf32> to vector<2x1xf32>
    %536 = tpu.reciprocal %535 : vector<2x1xf32> -> vector<2x1xf32>
    %537 = vector.broadcast %536 : vector<2x1xf32> to vector<2x8xf32>
    %538 = arith.mulf %533, %537 : vector<2x8xf32>
    %c0_271 = arith.constant 0 : index
    %c0_272 = arith.constant 0 : index
    %c0_273 = arith.constant 0 : index
    %539 = vector.load %arg15[%c0_271, %c0_272, %c0_273] : memref<1x2x64xf32, #tpu.memory_space<vmem>>, vector<1x2x8xf32>
    %540 = vector.shape_cast %539 : vector<1x2x8xf32> to vector<2x8xf32>
    %541 = vector.shape_cast %538 : vector<2x8xf32> to vector<1x2x8xf32>
    tpu.vector_store %arg15[%c0_271, %c0_272, %c0_273], %541 {strides = array<i32>} : memref<1x2x64xf32, #tpu.memory_space<vmem>>, vector<1x2x8xf32>,
    %542 = math.log %535 : vector<2x1xf32>
    %543 = arith.addf %542, %530 : vector<2x1xf32>
    %c0_274 = arith.constant 0 : index
    %c0_275 = arith.constant 0 : index
    %c0_276 = arith.constant 0 : index
    %c0_277 = arith.constant 0 : index
    %544 = vector.load %arg2[%c0_274, %c0_275, %c0_276, %c0_277] : memref<1x8x2x1xi32, #tpu.memory_space<vmem>>, vector<1x1x2x1xi32>
    %545 = vector.shape_cast %544 : vector<1x1x2x1xi32> to vector<2x1xi32>
    %546 = vector.broadcast %545 : vector<2x1xi32> to vector<2x8xi32>
    %547 = arith.cmpi eq, %502, %546 : vector<2x8xi32>
    %cst_278 = arith.constant 0.000000e+00 : f32
    %548 = vector.broadcast %cst_278 : f32 to vector<2x8xf32>
    %549 = arith.select %547, %528, %548 : vector<2x8xi1>, vector<2x8xf32>
    %cst_279 = arith.constant dense<0.000000e+00> : vector<2xf32>
    %550 = vector.multi_reduction <add>, %549, %cst_279 [1] : vector<2x8xf32> to vector<2xf32>
    %551 = vector.shape_cast %550 : vector<2xf32> to vector<2x1xf32>
    %552 = arith.subf %543, %551 : vector<2x1xf32>
    %553 = arith.addf %503, %552 : vector<2x1xf32>
    %554 = vector.broadcast %530 : vector<2x1xf32> to vector<2x8xf32>
    %555 = arith.cmpf oeq, %528, %554 : vector<2x8xf32>
    %c8_i32 = arith.constant 8 : i32
    %556 = vector.broadcast %c8_i32 : i32 to vector<2x8xi32>
    %557 = arith.select %555, %502, %556 : vector<2x8xi1>, vector<2x8xi32>
    %cst_280 = arith.constant dense<2147483647> : vector<2xi32>
    %558 = vector.multi_reduction <minsi>, %557, %cst_280 [1] : vector<2x8xi32> to vector<2xi32>
    %559 = vector.shape_cast %558 : vector<2xi32> to vector<2x1xi32>
    %560 = vector.broadcast %559 : vector<2x1xi32> to vector<2x8xi32>
    %561 = arith.cmpi eq, %502, %560 : vector<2x8xi32>
    %562 = arith.extui %561 : vector<2x8xi1> to vector<2x8xi32>
    %563 = arith.sitofp %562 : vector<2x8xi32> to vector<2x8xf32>
    %564 = arith.truncf %563 : vector<2x8xf32> to vector<2x8xbf16>
    %cst_281 = arith.constant dense<0.000000e+00> : vector<2x128xf32>
    %565 = tpu.matmul %564, %491, %cst_281 {dimension_numbers = #tpu.dot_dimension_numbers<[1], [0], [0], [1], [0, 0, 1, 1], [], []>} : vector<2x8xbf16>, vector<8x128xbf16>, vector<2x128xf32> -> vector<2x128xf32>
    %566 = vector.broadcast %494 : vector<1x128xf32> to vector<2x128xf32>
    %567 = arith.addf %565, %566 : vector<2x128xf32>
    %c2_282 = arith.constant 2 : index
    %c0_283 = arith.constant 0 : index
    %568 = vector.load %arg20[%c2_282, %c0_283] : memref<16x128xf32, #tpu.memory_space<vmem>>, vector<2x128xf32>
    %569 = arith.addf %567, %568 : vector<2x128xf32>
    %570 = arith.truncf %524 : vector<2x32xf32> to vector<2x32xbf16>
    %cst_284 = arith.constant dense<0.000000e+00> : vector<2x128xf32>
    %571 = tpu.matmul %570, %489, %cst_284 {dimension_numbers = #tpu.dot_dimension_numbers<[1], [0], [0], [1], [0, 0, 1, 1], [], []>} : vector<2x32xbf16>, vector<32x128xbf16>, vector<2x128xf32> -> vector<2x128xf32>
    %572 = arith.addf %569, %571 : vector<2x128xf32>
    %573 = arith.negf %572 : vector<2x128xf32>
    %574 = math.exp %573 : vector<2x128xf32>
    %cst_285 = arith.constant 1.000000e+00 : f32
    %575 = vector.broadcast %cst_285 : f32 to vector<2x128xf32>
    %576 = arith.addf %575, %574 : vector<2x128xf32>
    %577 = arith.divf %575, %576 : vector<2x128xf32>
    %578 = vector.extract_strided_slice %577 {offsets = [0, 0], sizes = [2, 32], strides = [1, 1]} : vector<2x128xf32> to vector<2x32xf32>
    %579 = vector.extract_strided_slice %577 {offsets = [0, 32], sizes = [2, 32], strides = [1, 1]} : vector<2x128xf32> to vector<2x32xf32>
    %580 = vector.extract_strided_slice %577 {offsets = [0, 96], sizes = [2, 32], strides = [1, 1]} : vector<2x128xf32> to vector<2x32xf32>
    %581 = vector.extract_strided_slice %572 {offsets = [0, 64], sizes = [2, 32], strides = [1, 1]} : vector<2x128xf32> to vector<2x32xf32>
    %582 = math.tanh %581 : vector<2x32xf32>
    %583 = arith.mulf %579, %522 : vector<2x32xf32>
    %584 = arith.mulf %578, %582 : vector<2x32xf32>
    %585 = arith.addf %583, %584 : vector<2x32xf32>
    %586 = math.tanh %585 : vector<2x32xf32>
    %587 = arith.mulf %580, %586 : vector<2x32xf32>
    %588 = arith.truncf %587 : vector<2x32xf32> to vector<2x32xbf16>
    %cst_286 = arith.constant dense<0.000000e+00> : vector<2x8xf32>
    %589 = tpu.matmul %588, %493, %cst_286 {dimension_numbers = #tpu.dot_dimension_numbers<[1], [0], [0], [1], [0, 0, 1, 1], [], []>} : vector<2x32xbf16>, vector<32x8xbf16>, vector<2x8xf32> -> vector<2x8xf32>
    %590 = vector.broadcast %495 : vector<1x8xf32> to vector<2x8xf32>
    %591 = arith.addf %589, %590 : vector<2x8xf32>
    %cst_287 = arith.constant dense<0xFF800000> : vector<2xf32>
    %592 = vector.multi_reduction <maximumf>, %591, %cst_287 [1] : vector<2x8xf32> to vector<2xf32>
    %593 = vector.shape_cast %592 : vector<2xf32> to vector<2x1xf32>
    %594 = vector.broadcast %593 : vector<2x1xf32> to vector<2x8xf32>
    %595 = arith.subf %591, %594 : vector<2x8xf32>
    %596 = math.exp %595 : vector<2x8xf32>
    %cst_288 = arith.constant dense<0.000000e+00> : vector<2xf32>
    %597 = vector.multi_reduction <add>, %596, %cst_288 [1] : vector<2x8xf32> to vector<2xf32>
    %598 = vector.shape_cast %597 : vector<2xf32> to vector<2x1xf32>
    %599 = tpu.reciprocal %598 : vector<2x1xf32> -> vector<2x1xf32>
    %600 = vector.broadcast %599 : vector<2x1xf32> to vector<2x8xf32>
    %601 = arith.mulf %596, %600 : vector<2x8xf32>
    %c0_289 = arith.constant 0 : index
    %c0_290 = arith.constant 0 : index
    %c8_291 = arith.constant 8 : index
    %602 = vector.load %arg15[%c0_289, %c0_290, %c8_291] : memref<1x2x64xf32, #tpu.memory_space<vmem>>, vector<1x2x8xf32>
    %603 = vector.shape_cast %602 : vector<1x2x8xf32> to vector<2x8xf32>
    %604 = vector.shape_cast %601 : vector<2x8xf32> to vector<1x2x8xf32>
    tpu.vector_store %arg15[%c0_289, %c0_290, %c8_291], %604 {strides = array<i32>} : memref<1x2x64xf32, #tpu.memory_space<vmem>>, vector<1x2x8xf32>,
    %605 = math.log %598 : vector<2x1xf32>
    %606 = arith.addf %605, %593 : vector<2x1xf32>
    %c0_292 = arith.constant 0 : index
    %c1 = arith.constant 1 : index
    %c0_293 = arith.constant 0 : index
    %c0_294 = arith.constant 0 : index
    %607 = vector.load %arg2[%c0_292, %c1, %c0_293, %c0_294] : memref<1x8x2x1xi32, #tpu.memory_space<vmem>>, vector<1x1x2x1xi32>
    %608 = vector.shape_cast %607 : vector<1x1x2x1xi32> to vector<2x1xi32>
    %609 = vector.broadcast %608 : vector<2x1xi32> to vector<2x8xi32>
    %610 = arith.cmpi eq, %502, %609 : vector<2x8xi32>
    %cst_295 = arith.constant 0.000000e+00 : f32
    %611 = vector.broadcast %cst_295 : f32 to vector<2x8xf32>
    %612 = arith.select %610, %591, %611 : vector<2x8xi1>, vector<2x8xf32>
    %cst_296 = arith.constant dense<0.000000e+00> : vector<2xf32>
    %613 = vector.multi_reduction <add>, %612, %cst_296 [1] : vector<2x8xf32> to vector<2xf32>
    %614 = vector.shape_cast %613 : vector<2xf32> to vector<2x1xf32>
    %615 = arith.subf %606, %614 : vector<2x1xf32>
    %616 = arith.addf %553, %615 : vector<2x1xf32>
    %617 = vector.broadcast %593 : vector<2x1xf32> to vector<2x8xf32>
    %618 = arith.cmpf oeq, %591, %617 : vector<2x8xf32>
    %c8_i32_297 = arith.constant 8 : i32
    %619 = vector.broadcast %c8_i32_297 : i32 to vector<2x8xi32>
    %620 = arith.select %618, %502, %619 : vector<2x8xi1>, vector<2x8xi32>
    %cst_298 = arith.constant dense<2147483647> : vector<2xi32>
    %621 = vector.multi_reduction <minsi>, %620, %cst_298 [1] : vector<2x8xi32> to vector<2xi32>
    %622 = vector.shape_cast %621 : vector<2xi32> to vector<2x1xi32>
    %623 = vector.broadcast %622 : vector<2x1xi32> to vector<2x8xi32>
    %624 = arith.cmpi eq, %502, %623 : vector<2x8xi32>
    %625 = arith.extui %624 : vector<2x8xi1> to vector<2x8xi32>
    %626 = arith.sitofp %625 : vector<2x8xi32> to vector<2x8xf32>
    %627 = arith.truncf %626 : vector<2x8xf32> to vector<2x8xbf16>
    %cst_299 = arith.constant dense<0.000000e+00> : vector<2x128xf32>
    %628 = tpu.matmul %627, %491, %cst_299 {dimension_numbers = #tpu.dot_dimension_numbers<[1], [0], [0], [1], [0, 0, 1, 1], [], []>} : vector<2x8xbf16>, vector<8x128xbf16>, vector<2x128xf32> -> vector<2x128xf32>
    %629 = vector.broadcast %494 : vector<1x128xf32> to vector<2x128xf32>
    %630 = arith.addf %628, %629 : vector<2x128xf32>
    %c4_300 = arith.constant 4 : index
    %c0_301 = arith.constant 0 : index
    %631 = vector.load %arg20[%c4_300, %c0_301] : memref<16x128xf32, #tpu.memory_space<vmem>>, vector<2x128xf32>
    %632 = arith.addf %630, %631 : vector<2x128xf32>
    %633 = arith.truncf %587 : vector<2x32xf32> to vector<2x32xbf16>
    %cst_302 = arith.constant dense<0.000000e+00> : vector<2x128xf32>
    %634 = tpu.matmul %633, %489, %cst_302 {dimension_numbers = #tpu.dot_dimension_numbers<[1], [0], [0], [1], [0, 0, 1, 1], [], []>} : vector<2x32xbf16>, vector<32x128xbf16>, vector<2x128xf32> -> vector<2x128xf32>
    %635 = arith.addf %632, %634 : vector<2x128xf32>
    %636 = arith.negf %635 : vector<2x128xf32>
    %637 = math.exp %636 : vector<2x128xf32>
    %cst_303 = arith.constant 1.000000e+00 : f32
    %638 = vector.broadcast %cst_303 : f32 to vector<2x128xf32>
    %639 = arith.addf %638, %637 : vector<2x128xf32>
    %640 = arith.divf %638, %639 : vector<2x128xf32>
    %641 = vector.extract_strided_slice %640 {offsets = [0, 0], sizes = [2, 32], strides = [1, 1]} : vector<2x128xf32> to vector<2x32xf32>
    %642 = vector.extract_strided_slice %640 {offsets = [0, 32], sizes = [2, 32], strides = [1, 1]} : vector<2x128xf32> to vector<2x32xf32>
    %643 = vector.extract_strided_slice %640 {offsets = [0, 96], sizes = [2, 32], strides = [1, 1]} : vector<2x128xf32> to vector<2x32xf32>
    %644 = vector.extract_strided_slice %635 {offsets = [0, 64], sizes = [2, 32], strides = [1, 1]} : vector<2x128xf32> to vector<2x32xf32>
    %645 = math.tanh %644 : vector<2x32xf32>
    %646 = arith.mulf %642, %585 : vector<2x32xf32>
    %647 = arith.mulf %641, %645 : vector<2x32xf32>
    %648 = arith.addf %646, %647 : vector<2x32xf32>
    %649 = math.tanh %648 : vector<2x32xf32>
    %650 = arith.mulf %643, %649 : vector<2x32xf32>
    %651 = arith.truncf %650 : vector<2x32xf32> to vector<2x32xbf16>
    %cst_304 = arith.constant dense<0.000000e+00> : vector<2x8xf32>
    %652 = tpu.matmul %651, %493, %cst_304 {dimension_numbers = #tpu.dot_dimension_numbers<[1], [0], [0], [1], [0, 0, 1, 1], [], []>} : vector<2x32xbf16>, vector<32x8xbf16>, vector<2x8xf32> -> vector<2x8xf32>
    %653 = vector.broadcast %495 : vector<1x8xf32> to vector<2x8xf32>
    %654 = arith.addf %652, %653 : vector<2x8xf32>
    %cst_305 = arith.constant dense<0xFF800000> : vector<2xf32>
    %655 = vector.multi_reduction <maximumf>, %654, %cst_305 [1] : vector<2x8xf32> to vector<2xf32>
    %656 = vector.shape_cast %655 : vector<2xf32> to vector<2x1xf32>
    %657 = vector.broadcast %656 : vector<2x1xf32> to vector<2x8xf32>
    %658 = arith.subf %654, %657 : vector<2x8xf32>
    %659 = math.exp %658 : vector<2x8xf32>
    %cst_306 = arith.constant dense<0.000000e+00> : vector<2xf32>
    %660 = vector.multi_reduction <add>, %659, %cst_306 [1] : vector<2x8xf32> to vector<2xf32>
    %661 = vector.shape_cast %660 : vector<2xf32> to vector<2x1xf32>
    %662 = tpu.reciprocal %661 : vector<2x1xf32> -> vector<2x1xf32>
    %663 = vector.broadcast %662 : vector<2x1xf32> to vector<2x8xf32>
    %664 = arith.mulf %659, %663 : vector<2x8xf32>
    %c0_307 = arith.constant 0 : index
    %c0_308 = arith.constant 0 : index
    %c16_309 = arith.constant 16 : index
    %665 = vector.load %arg15[%c0_307, %c0_308, %c16_309] : memref<1x2x64xf32, #tpu.memory_space<vmem>>, vector<1x2x8xf32>
    %666 = vector.shape_cast %665 : vector<1x2x8xf32> to vector<2x8xf32>
    %667 = vector.shape_cast %664 : vector<2x8xf32> to vector<1x2x8xf32>
    tpu.vector_store %arg15[%c0_307, %c0_308, %c16_309], %667 {strides = array<i32>} : memref<1x2x64xf32, #tpu.memory_space<vmem>>, vector<1x2x8xf32>,
    %668 = math.log %661 : vector<2x1xf32>
    %669 = arith.addf %668, %656 : vector<2x1xf32>
    %c0_310 = arith.constant 0 : index
    %c2_311 = arith.constant 2 : index
    %c0_312 = arith.constant 0 : index
    %c0_313 = arith.constant 0 : index
    %670 = vector.load %arg2[%c0_310, %c2_311, %c0_312, %c0_313] : memref<1x8x2x1xi32, #tpu.memory_space<vmem>>, vector<1x1x2x1xi32>
    %671 = vector.shape_cast %670 : vector<1x1x2x1xi32> to vector<2x1xi32>
    %672 = vector.broadcast %671 : vector<2x1xi32> to vector<2x8xi32>
    %673 = arith.cmpi eq, %502, %672 : vector<2x8xi32>
    %cst_314 = arith.constant 0.000000e+00 : f32
    %674 = vector.broadcast %cst_314 : f32 to vector<2x8xf32>
    %675 = arith.select %673, %654, %674 : vector<2x8xi1>, vector<2x8xf32>
    %cst_315 = arith.constant dense<0.000000e+00> : vector<2xf32>
    %676 = vector.multi_reduction <add>, %675, %cst_315 [1] : vector<2x8xf32> to vector<2xf32>
    %677 = vector.shape_cast %676 : vector<2xf32> to vector<2x1xf32>
    %678 = arith.subf %669, %677 : vector<2x1xf32>
    %679 = arith.addf %616, %678 : vector<2x1xf32>
    %680 = vector.broadcast %656 : vector<2x1xf32> to vector<2x8xf32>
    %681 = arith.cmpf oeq, %654, %680 : vector<2x8xf32>
    %c8_i32_316 = arith.constant 8 : i32
    %682 = vector.broadcast %c8_i32_316 : i32 to vector<2x8xi32>
    %683 = arith.select %681, %502, %682 : vector<2x8xi1>, vector<2x8xi32>
    %cst_317 = arith.constant dense<2147483647> : vector<2xi32>
    %684 = vector.multi_reduction <minsi>, %683, %cst_317 [1] : vector<2x8xi32> to vector<2xi32>
    %685 = vector.shape_cast %684 : vector<2xi32> to vector<2x1xi32>
    %686 = vector.broadcast %685 : vector<2x1xi32> to vector<2x8xi32>
    %687 = arith.cmpi eq, %502, %686 : vector<2x8xi32>
    %688 = arith.extui %687 : vector<2x8xi1> to vector<2x8xi32>
    %689 = arith.sitofp %688 : vector<2x8xi32> to vector<2x8xf32>
    %690 = arith.truncf %689 : vector<2x8xf32> to vector<2x8xbf16>
    %cst_318 = arith.constant dense<0.000000e+00> : vector<2x128xf32>
    %691 = tpu.matmul %690, %491, %cst_318 {dimension_numbers = #tpu.dot_dimension_numbers<[1], [0], [0], [1], [0, 0, 1, 1], [], []>} : vector<2x8xbf16>, vector<8x128xbf16>, vector<2x128xf32> -> vector<2x128xf32>
    %692 = vector.broadcast %494 : vector<1x128xf32> to vector<2x128xf32>
    %693 = arith.addf %691, %692 : vector<2x128xf32>
    %c6_319 = arith.constant 6 : index
    %c0_320 = arith.constant 0 : index
    %694 = vector.load %arg20[%c6_319, %c0_320] : memref<16x128xf32, #tpu.memory_space<vmem>>, vector<2x128xf32>
    %695 = arith.addf %693, %694 : vector<2x128xf32>
    %696 = arith.truncf %650 : vector<2x32xf32> to vector<2x32xbf16>
    %cst_321 = arith.constant dense<0.000000e+00> : vector<2x128xf32>
    %697 = tpu.matmul %696, %489, %cst_321 {dimension_numbers = #tpu.dot_dimension_numbers<[1], [0], [0], [1], [0, 0, 1, 1], [], []>} : vector<2x32xbf16>, vector<32x128xbf16>, vector<2x128xf32> -> vector<2x128xf32>
    %698 = arith.addf %695, %697 : vector<2x128xf32>
    %699 = arith.negf %698 : vector<2x128xf32>
    %700 = math.exp %699 : vector<2x128xf32>
    %cst_322 = arith.constant 1.000000e+00 : f32
    %701 = vector.broadcast %cst_322 : f32 to vector<2x128xf32>
    %702 = arith.addf %701, %700 : vector<2x128xf32>
    %703 = arith.divf %701, %702 : vector<2x128xf32>
    %704 = vector.extract_strided_slice %703 {offsets = [0, 0], sizes = [2, 32], strides = [1, 1]} : vector<2x128xf32> to vector<2x32xf32>
    %705 = vector.extract_strided_slice %703 {offsets = [0, 32], sizes = [2, 32], strides = [1, 1]} : vector<2x128xf32> to vector<2x32xf32>
    %706 = vector.extract_strided_slice %703 {offsets = [0, 96], sizes = [2, 32], strides = [1, 1]} : vector<2x128xf32> to vector<2x32xf32>
    %707 = vector.extract_strided_slice %698 {offsets = [0, 64], sizes = [2, 32], strides = [1, 1]} : vector<2x128xf32> to vector<2x32xf32>
    %708 = math.tanh %707 : vector<2x32xf32>
    %709 = arith.mulf %705, %648 : vector<2x32xf32>
    %710 = arith.mulf %704, %708 : vector<2x32xf32>
    %711 = arith.addf %709, %710 : vector<2x32xf32>
    %712 = math.tanh %711 : vector<2x32xf32>
    %713 = arith.mulf %706, %712 : vector<2x32xf32>
    %714 = arith.truncf %713 : vector<2x32xf32> to vector<2x32xbf16>
    %cst_323 = arith.constant dense<0.000000e+00> : vector<2x8xf32>
    %715 = tpu.matmul %714, %493, %cst_323 {dimension_numbers = #tpu.dot_dimension_numbers<[1], [0], [0], [1], [0, 0, 1, 1], [], []>} : vector<2x32xbf16>, vector<32x8xbf16>, vector<2x8xf32> -> vector<2x8xf32>
    %716 = vector.broadcast %495 : vector<1x8xf32> to vector<2x8xf32>
    %717 = arith.addf %715, %716 : vector<2x8xf32>
    %cst_324 = arith.constant dense<0xFF800000> : vector<2xf32>
    %718 = vector.multi_reduction <maximumf>, %717, %cst_324 [1] : vector<2x8xf32> to vector<2xf32>
    %719 = vector.shape_cast %718 : vector<2xf32> to vector<2x1xf32>
    %720 = vector.broadcast %719 : vector<2x1xf32> to vector<2x8xf32>
    %721 = arith.subf %717, %720 : vector<2x8xf32>
    %722 = math.exp %721 : vector<2x8xf32>
    %cst_325 = arith.constant dense<0.000000e+00> : vector<2xf32>
    %723 = vector.multi_reduction <add>, %722, %cst_325 [1] : vector<2x8xf32> to vector<2xf32>
    %724 = vector.shape_cast %723 : vector<2xf32> to vector<2x1xf32>
    %725 = tpu.reciprocal %724 : vector<2x1xf32> -> vector<2x1xf32>
    %726 = vector.broadcast %725 : vector<2x1xf32> to vector<2x8xf32>
    %727 = arith.mulf %722, %726 : vector<2x8xf32>
    %c0_326 = arith.constant 0 : index
    %c0_327 = arith.constant 0 : index
    %c24 = arith.constant 24 : index
    %728 = vector.load %arg15[%c0_326, %c0_327, %c24] : memref<1x2x64xf32, #tpu.memory_space<vmem>>, vector<1x2x8xf32>
    %729 = vector.shape_cast %728 : vector<1x2x8xf32> to vector<2x8xf32>
    %730 = vector.shape_cast %727 : vector<2x8xf32> to vector<1x2x8xf32>
    tpu.vector_store %arg15[%c0_326, %c0_327, %c24], %730 {strides = array<i32>} : memref<1x2x64xf32, #tpu.memory_space<vmem>>, vector<1x2x8xf32>,
    %731 = math.log %724 : vector<2x1xf32>
    %732 = arith.addf %731, %719 : vector<2x1xf32>
    %c0_328 = arith.constant 0 : index
    %c3 = arith.constant 3 : index
    %c0_329 = arith.constant 0 : index
    %c0_330 = arith.constant 0 : index
    %733 = vector.load %arg2[%c0_328, %c3, %c0_329, %c0_330] : memref<1x8x2x1xi32, #tpu.memory_space<vmem>>, vector<1x1x2x1xi32>
    %734 = vector.shape_cast %733 : vector<1x1x2x1xi32> to vector<2x1xi32>
    %735 = vector.broadcast %734 : vector<2x1xi32> to vector<2x8xi32>
    %736 = arith.cmpi eq, %502, %735 : vector<2x8xi32>
    %cst_331 = arith.constant 0.000000e+00 : f32
    %737 = vector.broadcast %cst_331 : f32 to vector<2x8xf32>
    %738 = arith.select %736, %717, %737 : vector<2x8xi1>, vector<2x8xf32>
    %cst_332 = arith.constant dense<0.000000e+00> : vector<2xf32>
    %739 = vector.multi_reduction <add>, %738, %cst_332 [1] : vector<2x8xf32> to vector<2xf32>
    %740 = vector.shape_cast %739 : vector<2xf32> to vector<2x1xf32>
    %741 = arith.subf %732, %740 : vector<2x1xf32>
    %742 = arith.addf %679, %741 : vector<2x1xf32>
    %743 = vector.broadcast %719 : vector<2x1xf32> to vector<2x8xf32>
    %744 = arith.cmpf oeq, %717, %743 : vector<2x8xf32>
    %c8_i32_333 = arith.constant 8 : i32
    %745 = vector.broadcast %c8_i32_333 : i32 to vector<2x8xi32>
    %746 = arith.select %744, %502, %745 : vector<2x8xi1>, vector<2x8xi32>
    %cst_334 = arith.constant dense<2147483647> : vector<2xi32>
    %747 = vector.multi_reduction <minsi>, %746, %cst_334 [1] : vector<2x8xi32> to vector<2xi32>
    %748 = vector.shape_cast %747 : vector<2xi32> to vector<2x1xi32>
    %749 = vector.broadcast %748 : vector<2x1xi32> to vector<2x8xi32>
    %750 = arith.cmpi eq, %502, %749 : vector<2x8xi32>
    %751 = arith.extui %750 : vector<2x8xi1> to vector<2x8xi32>
    %752 = arith.sitofp %751 : vector<2x8xi32> to vector<2x8xf32>
    %753 = arith.truncf %752 : vector<2x8xf32> to vector<2x8xbf16>
    %cst_335 = arith.constant dense<0.000000e+00> : vector<2x128xf32>
    %754 = tpu.matmul %753, %491, %cst_335 {dimension_numbers = #tpu.dot_dimension_numbers<[1], [0], [0], [1], [0, 0, 1, 1], [], []>} : vector<2x8xbf16>, vector<8x128xbf16>, vector<2x128xf32> -> vector<2x128xf32>
    %755 = vector.broadcast %494 : vector<1x128xf32> to vector<2x128xf32>
    %756 = arith.addf %754, %755 : vector<2x128xf32>
    %c8_336 = arith.constant 8 : index
    %c0_337 = arith.constant 0 : index
    %757 = vector.load %arg20[%c8_336, %c0_337] : memref<16x128xf32, #tpu.memory_space<vmem>>, vector<2x128xf32>
    %758 = arith.addf %756, %757 : vector<2x128xf32>
    %759 = arith.truncf %713 : vector<2x32xf32> to vector<2x32xbf16>
    %cst_338 = arith.constant dense<0.000000e+00> : vector<2x128xf32>
    %760 = tpu.matmul %759, %489, %cst_338 {dimension_numbers = #tpu.dot_dimension_numbers<[1], [0], [0], [1], [0, 0, 1, 1], [], []>} : vector<2x32xbf16>, vector<32x128xbf16>, vector<2x128xf32> -> vector<2x128xf32>
    %761 = arith.addf %758, %760 : vector<2x128xf32>
    %762 = arith.negf %761 : vector<2x128xf32>
    %763 = math.exp %762 : vector<2x128xf32>
    %cst_339 = arith.constant 1.000000e+00 : f32
    %764 = vector.broadcast %cst_339 : f32 to vector<2x128xf32>
    %765 = arith.addf %764, %763 : vector<2x128xf32>
    %766 = arith.divf %764, %765 : vector<2x128xf32>
    %767 = vector.extract_strided_slice %766 {offsets = [0, 0], sizes = [2, 32], strides = [1, 1]} : vector<2x128xf32> to vector<2x32xf32>
    %768 = vector.extract_strided_slice %766 {offsets = [0, 32], sizes = [2, 32], strides = [1, 1]} : vector<2x128xf32> to vector<2x32xf32>
    %769 = vector.extract_strided_slice %766 {offsets = [0, 96], sizes = [2, 32], strides = [1, 1]} : vector<2x128xf32> to vector<2x32xf32>
    %770 = vector.extract_strided_slice %761 {offsets = [0, 64], sizes = [2, 32], strides = [1, 1]} : vector<2x128xf32> to vector<2x32xf32>
    %771 = math.tanh %770 : vector<2x32xf32>
    %772 = arith.mulf %768, %711 : vector<2x32xf32>
    %773 = arith.mulf %767, %771 : vector<2x32xf32>
    %774 = arith.addf %772, %773 : vector<2x32xf32>
    %775 = math.tanh %774 : vector<2x32xf32>
    %776 = arith.mulf %769, %775 : vector<2x32xf32>
    %777 = arith.truncf %776 : vector<2x32xf32> to vector<2x32xbf16>
    %cst_340 = arith.constant dense<0.000000e+00> : vector<2x8xf32>
    %778 = tpu.matmul %777, %493, %cst_340 {dimension_numbers = #tpu.dot_dimension_numbers<[1], [0], [0], [1], [0, 0, 1, 1], [], []>} : vector<2x32xbf16>, vector<32x8xbf16>, vector<2x8xf32> -> vector<2x8xf32>
    %779 = vector.broadcast %495 : vector<1x8xf32> to vector<2x8xf32>
    %780 = arith.addf %778, %779 : vector<2x8xf32>
    %cst_341 = arith.constant dense<0xFF800000> : vector<2xf32>
    %781 = vector.multi_reduction <maximumf>, %780, %cst_341 [1] : vector<2x8xf32> to vector<2xf32>
    %782 = vector.shape_cast %781 : vector<2xf32> to vector<2x1xf32>
    %783 = vector.broadcast %782 : vector<2x1xf32> to vector<2x8xf32>
    %784 = arith.subf %780, %783 : vector<2x8xf32>
    %785 = math.exp %784 : vector<2x8xf32>
    %cst_342 = arith.constant dense<0.000000e+00> : vector<2xf32>
    %786 = vector.multi_reduction <add>, %785, %cst_342 [1] : vector<2x8xf32> to vector<2xf32>
    %787 = vector.shape_cast %786 : vector<2xf32> to vector<2x1xf32>
    %788 = tpu.reciprocal %787 : vector<2x1xf32> -> vector<2x1xf32>
    %789 = vector.broadcast %788 : vector<2x1xf32> to vector<2x8xf32>
    %790 = arith.mulf %785, %789 : vector<2x8xf32>
    %c0_343 = arith.constant 0 : index
    %c0_344 = arith.constant 0 : index
    %c32 = arith.constant 32 : index
    %791 = vector.load %arg15[%c0_343, %c0_344, %c32] : memref<1x2x64xf32, #tpu.memory_space<vmem>>, vector<1x2x8xf32>
    %792 = vector.shape_cast %791 : vector<1x2x8xf32> to vector<2x8xf32>
    %793 = vector.shape_cast %790 : vector<2x8xf32> to vector<1x2x8xf32>
    tpu.vector_store %arg15[%c0_343, %c0_344, %c32], %793 {strides = array<i32>} : memref<1x2x64xf32, #tpu.memory_space<vmem>>, vector<1x2x8xf32>,
    %794 = math.log %787 : vector<2x1xf32>
    %795 = arith.addf %794, %782 : vector<2x1xf32>
    %c0_345 = arith.constant 0 : index
    %c4_346 = arith.constant 4 : index
    %c0_347 = arith.constant 0 : index
    %c0_348 = arith.constant 0 : index
    %796 = vector.load %arg2[%c0_345, %c4_346, %c0_347, %c0_348] : memref<1x8x2x1xi32, #tpu.memory_space<vmem>>, vector<1x1x2x1xi32>
    %797 = vector.shape_cast %796 : vector<1x1x2x1xi32> to vector<2x1xi32>
    %798 = vector.broadcast %797 : vector<2x1xi32> to vector<2x8xi32>
    %799 = arith.cmpi eq, %502, %798 : vector<2x8xi32>
    %cst_349 = arith.constant 0.000000e+00 : f32
    %800 = vector.broadcast %cst_349 : f32 to vector<2x8xf32>
    %801 = arith.select %799, %780, %800 : vector<2x8xi1>, vector<2x8xf32>
    %cst_350 = arith.constant dense<0.000000e+00> : vector<2xf32>
    %802 = vector.multi_reduction <add>, %801, %cst_350 [1] : vector<2x8xf32> to vector<2xf32>
    %803 = vector.shape_cast %802 : vector<2xf32> to vector<2x1xf32>
    %804 = arith.subf %795, %803 : vector<2x1xf32>
    %805 = arith.addf %742, %804 : vector<2x1xf32>
    %806 = vector.broadcast %782 : vector<2x1xf32> to vector<2x8xf32>
    %807 = arith.cmpf oeq, %780, %806 : vector<2x8xf32>
    %c8_i32_351 = arith.constant 8 : i32
    %808 = vector.broadcast %c8_i32_351 : i32 to vector<2x8xi32>
    %809 = arith.select %807, %502, %808 : vector<2x8xi1>, vector<2x8xi32>
    %cst_352 = arith.constant dense<2147483647> : vector<2xi32>
    %810 = vector.multi_reduction <minsi>, %809, %cst_352 [1] : vector<2x8xi32> to vector<2xi32>
    %811 = vector.shape_cast %810 : vector<2xi32> to vector<2x1xi32>
    %812 = vector.broadcast %811 : vector<2x1xi32> to vector<2x8xi32>
    %813 = arith.cmpi eq, %502, %812 : vector<2x8xi32>
    %814 = arith.extui %813 : vector<2x8xi1> to vector<2x8xi32>
    %815 = arith.sitofp %814 : vector<2x8xi32> to vector<2x8xf32>
    %816 = arith.truncf %815 : vector<2x8xf32> to vector<2x8xbf16>
    %cst_353 = arith.constant dense<0.000000e+00> : vector<2x128xf32>
    %817 = tpu.matmul %816, %491, %cst_353 {dimension_numbers = #tpu.dot_dimension_numbers<[1], [0], [0], [1], [0, 0, 1, 1], [], []>} : vector<2x8xbf16>, vector<8x128xbf16>, vector<2x128xf32> -> vector<2x128xf32>
    %818 = vector.broadcast %494 : vector<1x128xf32> to vector<2x128xf32>
    %819 = arith.addf %817, %818 : vector<2x128xf32>
    %c10_354 = arith.constant 10 : index
    %c0_355 = arith.constant 0 : index
    %820 = vector.load %arg20[%c10_354, %c0_355] : memref<16x128xf32, #tpu.memory_space<vmem>>, vector<2x128xf32>
    %821 = arith.addf %819, %820 : vector<2x128xf32>
    %822 = arith.truncf %776 : vector<2x32xf32> to vector<2x32xbf16>
    %cst_356 = arith.constant dense<0.000000e+00> : vector<2x128xf32>
    %823 = tpu.matmul %822, %489, %cst_356 {dimension_numbers = #tpu.dot_dimension_numbers<[1], [0], [0], [1], [0, 0, 1, 1], [], []>} : vector<2x32xbf16>, vector<32x128xbf16>, vector<2x128xf32> -> vector<2x128xf32>
    %824 = arith.addf %821, %823 : vector<2x128xf32>
    %825 = arith.negf %824 : vector<2x128xf32>
    %826 = math.exp %825 : vector<2x128xf32>
    %cst_357 = arith.constant 1.000000e+00 : f32
    %827 = vector.broadcast %cst_357 : f32 to vector<2x128xf32>
    %828 = arith.addf %827, %826 : vector<2x128xf32>
    %829 = arith.divf %827, %828 : vector<2x128xf32>
    %830 = vector.extract_strided_slice %829 {offsets = [0, 0], sizes = [2, 32], strides = [1, 1]} : vector<2x128xf32> to vector<2x32xf32>
    %831 = vector.extract_strided_slice %829 {offsets = [0, 32], sizes = [2, 32], strides = [1, 1]} : vector<2x128xf32> to vector<2x32xf32>
    %832 = vector.extract_strided_slice %829 {offsets = [0, 96], sizes = [2, 32], strides = [1, 1]} : vector<2x128xf32> to vector<2x32xf32>
    %833 = vector.extract_strided_slice %824 {offsets = [0, 64], sizes = [2, 32], strides = [1, 1]} : vector<2x128xf32> to vector<2x32xf32>
    %834 = math.tanh %833 : vector<2x32xf32>
    %835 = arith.mulf %831, %774 : vector<2x32xf32>
    %836 = arith.mulf %830, %834 : vector<2x32xf32>
    %837 = arith.addf %835, %836 : vector<2x32xf32>
    %838 = math.tanh %837 : vector<2x32xf32>
    %839 = arith.mulf %832, %838 : vector<2x32xf32>
    %840 = arith.truncf %839 : vector<2x32xf32> to vector<2x32xbf16>
    %cst_358 = arith.constant dense<0.000000e+00> : vector<2x8xf32>
    %841 = tpu.matmul %840, %493, %cst_358 {dimension_numbers = #tpu.dot_dimension_numbers<[1], [0], [0], [1], [0, 0, 1, 1], [], []>} : vector<2x32xbf16>, vector<32x8xbf16>, vector<2x8xf32> -> vector<2x8xf32>
    %842 = vector.broadcast %495 : vector<1x8xf32> to vector<2x8xf32>
    %843 = arith.addf %841, %842 : vector<2x8xf32>
    %cst_359 = arith.constant dense<0xFF800000> : vector<2xf32>
    %844 = vector.multi_reduction <maximumf>, %843, %cst_359 [1] : vector<2x8xf32> to vector<2xf32>
    %845 = vector.shape_cast %844 : vector<2xf32> to vector<2x1xf32>
    %846 = vector.broadcast %845 : vector<2x1xf32> to vector<2x8xf32>
    %847 = arith.subf %843, %846 : vector<2x8xf32>
    %848 = math.exp %847 : vector<2x8xf32>
    %cst_360 = arith.constant dense<0.000000e+00> : vector<2xf32>
    %849 = vector.multi_reduction <add>, %848, %cst_360 [1] : vector<2x8xf32> to vector<2xf32>
    %850 = vector.shape_cast %849 : vector<2xf32> to vector<2x1xf32>
    %851 = tpu.reciprocal %850 : vector<2x1xf32> -> vector<2x1xf32>
    %852 = vector.broadcast %851 : vector<2x1xf32> to vector<2x8xf32>
    %853 = arith.mulf %848, %852 : vector<2x8xf32>
    %c0_361 = arith.constant 0 : index
    %c0_362 = arith.constant 0 : index
    %c40 = arith.constant 40 : index
    %854 = vector.load %arg15[%c0_361, %c0_362, %c40] : memref<1x2x64xf32, #tpu.memory_space<vmem>>, vector<1x2x8xf32>
    %855 = vector.shape_cast %854 : vector<1x2x8xf32> to vector<2x8xf32>
    %856 = vector.shape_cast %853 : vector<2x8xf32> to vector<1x2x8xf32>
    tpu.vector_store %arg15[%c0_361, %c0_362, %c40], %856 {strides = array<i32>} : memref<1x2x64xf32, #tpu.memory_space<vmem>>, vector<1x2x8xf32>,
    %857 = math.log %850 : vector<2x1xf32>
    %858 = arith.addf %857, %845 : vector<2x1xf32>
    %c0_363 = arith.constant 0 : index
    %c5 = arith.constant 5 : index
    %c0_364 = arith.constant 0 : index
    %c0_365 = arith.constant 0 : index
    %859 = vector.load %arg2[%c0_363, %c5, %c0_364, %c0_365] : memref<1x8x2x1xi32, #tpu.memory_space<vmem>>, vector<1x1x2x1xi32>
    %860 = vector.shape_cast %859 : vector<1x1x2x1xi32> to vector<2x1xi32>
    %861 = vector.broadcast %860 : vector<2x1xi32> to vector<2x8xi32>
    %862 = arith.cmpi eq, %502, %861 : vector<2x8xi32>
    %cst_366 = arith.constant 0.000000e+00 : f32
    %863 = vector.broadcast %cst_366 : f32 to vector<2x8xf32>
    %864 = arith.select %862, %843, %863 : vector<2x8xi1>, vector<2x8xf32>
    %cst_367 = arith.constant dense<0.000000e+00> : vector<2xf32>
    %865 = vector.multi_reduction <add>, %864, %cst_367 [1] : vector<2x8xf32> to vector<2xf32>
    %866 = vector.shape_cast %865 : vector<2xf32> to vector<2x1xf32>
    %867 = arith.subf %858, %866 : vector<2x1xf32>
    %868 = arith.addf %805, %867 : vector<2x1xf32>
    %869 = vector.broadcast %845 : vector<2x1xf32> to vector<2x8xf32>
    %870 = arith.cmpf oeq, %843, %869 : vector<2x8xf32>
    %c8_i32_368 = arith.constant 8 : i32
    %871 = vector.broadcast %c8_i32_368 : i32 to vector<2x8xi32>
    %872 = arith.select %870, %502, %871 : vector<2x8xi1>, vector<2x8xi32>
    %cst_369 = arith.constant dense<2147483647> : vector<2xi32>
    %873 = vector.multi_reduction <minsi>, %872, %cst_369 [1] : vector<2x8xi32> to vector<2xi32>
    %874 = vector.shape_cast %873 : vector<2xi32> to vector<2x1xi32>
    %875 = vector.broadcast %874 : vector<2x1xi32> to vector<2x8xi32>
    %876 = arith.cmpi eq, %502, %875 : vector<2x8xi32>
    %877 = arith.extui %876 : vector<2x8xi1> to vector<2x8xi32>
    %878 = arith.sitofp %877 : vector<2x8xi32> to vector<2x8xf32>
    %879 = arith.truncf %878 : vector<2x8xf32> to vector<2x8xbf16>
    %cst_370 = arith.constant dense<0.000000e+00> : vector<2x128xf32>
    %880 = tpu.matmul %879, %491, %cst_370 {dimension_numbers = #tpu.dot_dimension_numbers<[1], [0], [0], [1], [0, 0, 1, 1], [], []>} : vector<2x8xbf16>, vector<8x128xbf16>, vector<2x128xf32> -> vector<2x128xf32>
    %881 = vector.broadcast %494 : vector<1x128xf32> to vector<2x128xf32>
    %882 = arith.addf %880, %881 : vector<2x128xf32>
    %c12_371 = arith.constant 12 : index
    %c0_372 = arith.constant 0 : index
    %883 = vector.load %arg20[%c12_371, %c0_372] : memref<16x128xf32, #tpu.memory_space<vmem>>, vector<2x128xf32>
    %884 = arith.addf %882, %883 : vector<2x128xf32>
    %885 = arith.truncf %839 : vector<2x32xf32> to vector<2x32xbf16>
    %cst_373 = arith.constant dense<0.000000e+00> : vector<2x128xf32>
    %886 = tpu.matmul %885, %489, %cst_373 {dimension_numbers = #tpu.dot_dimension_numbers<[1], [0], [0], [1], [0, 0, 1, 1], [], []>} : vector<2x32xbf16>, vector<32x128xbf16>, vector<2x128xf32> -> vector<2x128xf32>
    %887 = arith.addf %884, %886 : vector<2x128xf32>
    %888 = arith.negf %887 : vector<2x128xf32>
    %889 = math.exp %888 : vector<2x128xf32>
    %cst_374 = arith.constant 1.000000e+00 : f32
    %890 = vector.broadcast %cst_374 : f32 to vector<2x128xf32>
    %891 = arith.addf %890, %889 : vector<2x128xf32>
    %892 = arith.divf %890, %891 : vector<2x128xf32>
    %893 = vector.extract_strided_slice %892 {offsets = [0, 0], sizes = [2, 32], strides = [1, 1]} : vector<2x128xf32> to vector<2x32xf32>
    %894 = vector.extract_strided_slice %892 {offsets = [0, 32], sizes = [2, 32], strides = [1, 1]} : vector<2x128xf32> to vector<2x32xf32>
    %895 = vector.extract_strided_slice %892 {offsets = [0, 96], sizes = [2, 32], strides = [1, 1]} : vector<2x128xf32> to vector<2x32xf32>
    %896 = vector.extract_strided_slice %887 {offsets = [0, 64], sizes = [2, 32], strides = [1, 1]} : vector<2x128xf32> to vector<2x32xf32>
    %897 = math.tanh %896 : vector<2x32xf32>
    %898 = arith.mulf %894, %837 : vector<2x32xf32>
    %899 = arith.mulf %893, %897 : vector<2x32xf32>
    %900 = arith.addf %898, %899 : vector<2x32xf32>
    %901 = math.tanh %900 : vector<2x32xf32>
    %902 = arith.mulf %895, %901 : vector<2x32xf32>
    %903 = arith.truncf %902 : vector<2x32xf32> to vector<2x32xbf16>
    %cst_375 = arith.constant dense<0.000000e+00> : vector<2x8xf32>
    %904 = tpu.matmul %903, %493, %cst_375 {dimension_numbers = #tpu.dot_dimension_numbers<[1], [0], [0], [1], [0, 0, 1, 1], [], []>} : vector<2x32xbf16>, vector<32x8xbf16>, vector<2x8xf32> -> vector<2x8xf32>
    %905 = vector.broadcast %495 : vector<1x8xf32> to vector<2x8xf32>
    %906 = arith.addf %904, %905 : vector<2x8xf32>
    %cst_376 = arith.constant dense<0xFF800000> : vector<2xf32>
    %907 = vector.multi_reduction <maximumf>, %906, %cst_376 [1] : vector<2x8xf32> to vector<2xf32>
    %908 = vector.shape_cast %907 : vector<2xf32> to vector<2x1xf32>
    %909 = vector.broadcast %908 : vector<2x1xf32> to vector<2x8xf32>
    %910 = arith.subf %906, %909 : vector<2x8xf32>
    %911 = math.exp %910 : vector<2x8xf32>
    %cst_377 = arith.constant dense<0.000000e+00> : vector<2xf32>
    %912 = vector.multi_reduction <add>, %911, %cst_377 [1] : vector<2x8xf32> to vector<2xf32>
    %913 = vector.shape_cast %912 : vector<2xf32> to vector<2x1xf32>
    %914 = tpu.reciprocal %913 : vector<2x1xf32> -> vector<2x1xf32>
    %915 = vector.broadcast %914 : vector<2x1xf32> to vector<2x8xf32>
    %916 = arith.mulf %911, %915 : vector<2x8xf32>
    %c0_378 = arith.constant 0 : index
    %c0_379 = arith.constant 0 : index
    %c48 = arith.constant 48 : index
    %917 = vector.load %arg15[%c0_378, %c0_379, %c48] : memref<1x2x64xf32, #tpu.memory_space<vmem>>, vector<1x2x8xf32>
    %918 = vector.shape_cast %917 : vector<1x2x8xf32> to vector<2x8xf32>
    %919 = vector.shape_cast %916 : vector<2x8xf32> to vector<1x2x8xf32>
    tpu.vector_store %arg15[%c0_378, %c0_379, %c48], %919 {strides = array<i32>} : memref<1x2x64xf32, #tpu.memory_space<vmem>>, vector<1x2x8xf32>,
    %920 = math.log %913 : vector<2x1xf32>
    %921 = arith.addf %920, %908 : vector<2x1xf32>
    %c0_380 = arith.constant 0 : index
    %c6_381 = arith.constant 6 : index
    %c0_382 = arith.constant 0 : index
    %c0_383 = arith.constant 0 : index
    %922 = vector.load %arg2[%c0_380, %c6_381, %c0_382, %c0_383] : memref<1x8x2x1xi32, #tpu.memory_space<vmem>>, vector<1x1x2x1xi32>
    %923 = vector.shape_cast %922 : vector<1x1x2x1xi32> to vector<2x1xi32>
    %924 = vector.broadcast %923 : vector<2x1xi32> to vector<2x8xi32>
    %925 = arith.cmpi eq, %502, %924 : vector<2x8xi32>
    %cst_384 = arith.constant 0.000000e+00 : f32
    %926 = vector.broadcast %cst_384 : f32 to vector<2x8xf32>
    %927 = arith.select %925, %906, %926 : vector<2x8xi1>, vector<2x8xf32>
    %cst_385 = arith.constant dense<0.000000e+00> : vector<2xf32>
    %928 = vector.multi_reduction <add>, %927, %cst_385 [1] : vector<2x8xf32> to vector<2xf32>
    %929 = vector.shape_cast %928 : vector<2xf32> to vector<2x1xf32>
    %930 = arith.subf %921, %929 : vector<2x1xf32>
    %931 = arith.addf %868, %930 : vector<2x1xf32>
    %932 = vector.broadcast %908 : vector<2x1xf32> to vector<2x8xf32>
    %933 = arith.cmpf oeq, %906, %932 : vector<2x8xf32>
    %c8_i32_386 = arith.constant 8 : i32
    %934 = vector.broadcast %c8_i32_386 : i32 to vector<2x8xi32>
    %935 = arith.select %933, %502, %934 : vector<2x8xi1>, vector<2x8xi32>
    %cst_387 = arith.constant dense<2147483647> : vector<2xi32>
    %936 = vector.multi_reduction <minsi>, %935, %cst_387 [1] : vector<2x8xi32> to vector<2xi32>
    %937 = vector.shape_cast %936 : vector<2xi32> to vector<2x1xi32>
    %938 = vector.broadcast %937 : vector<2x1xi32> to vector<2x8xi32>
    %939 = arith.cmpi eq, %502, %938 : vector<2x8xi32>
    %940 = arith.extui %939 : vector<2x8xi1> to vector<2x8xi32>
    %941 = arith.sitofp %940 : vector<2x8xi32> to vector<2x8xf32>
    %942 = arith.truncf %941 : vector<2x8xf32> to vector<2x8xbf16>
    %cst_388 = arith.constant dense<0.000000e+00> : vector<2x128xf32>
    %943 = tpu.matmul %942, %491, %cst_388 {dimension_numbers = #tpu.dot_dimension_numbers<[1], [0], [0], [1], [0, 0, 1, 1], [], []>} : vector<2x8xbf16>, vector<8x128xbf16>, vector<2x128xf32> -> vector<2x128xf32>
    %944 = vector.broadcast %494 : vector<1x128xf32> to vector<2x128xf32>
    %945 = arith.addf %943, %944 : vector<2x128xf32>
    %c14_389 = arith.constant 14 : index
    %c0_390 = arith.constant 0 : index
    %946 = vector.load %arg20[%c14_389, %c0_390] : memref<16x128xf32, #tpu.memory_space<vmem>>, vector<2x128xf32>
    %947 = arith.addf %945, %946 : vector<2x128xf32>
    %948 = arith.truncf %902 : vector<2x32xf32> to vector<2x32xbf16>
    %cst_391 = arith.constant dense<0.000000e+00> : vector<2x128xf32>
    %949 = tpu.matmul %948, %489, %cst_391 {dimension_numbers = #tpu.dot_dimension_numbers<[1], [0], [0], [1], [0, 0, 1, 1], [], []>} : vector<2x32xbf16>, vector<32x128xbf16>, vector<2x128xf32> -> vector<2x128xf32>
    %950 = arith.addf %947, %949 : vector<2x128xf32>
    %951 = arith.negf %950 : vector<2x128xf32>
    %952 = math.exp %951 : vector<2x128xf32>
    %cst_392 = arith.constant 1.000000e+00 : f32
    %953 = vector.broadcast %cst_392 : f32 to vector<2x128xf32>
    %954 = arith.addf %953, %952 : vector<2x128xf32>
    %955 = arith.divf %953, %954 : vector<2x128xf32>
    %956 = vector.extract_strided_slice %955 {offsets = [0, 0], sizes = [2, 32], strides = [1, 1]} : vector<2x128xf32> to vector<2x32xf32>
    %957 = vector.extract_strided_slice %955 {offsets = [0, 32], sizes = [2, 32], strides = [1, 1]} : vector<2x128xf32> to vector<2x32xf32>
    %958 = vector.extract_strided_slice %955 {offsets = [0, 96], sizes = [2, 32], strides = [1, 1]} : vector<2x128xf32> to vector<2x32xf32>
    %959 = vector.extract_strided_slice %950 {offsets = [0, 64], sizes = [2, 32], strides = [1, 1]} : vector<2x128xf32> to vector<2x32xf32>
    %960 = math.tanh %959 : vector<2x32xf32>
    %961 = arith.mulf %957, %900 : vector<2x32xf32>
    %962 = arith.mulf %956, %960 : vector<2x32xf32>
    %963 = arith.addf %961, %962 : vector<2x32xf32>
    %964 = math.tanh %963 : vector<2x32xf32>
    %965 = arith.mulf %958, %964 : vector<2x32xf32>
    %966 = arith.truncf %965 : vector<2x32xf32> to vector<2x32xbf16>
    %cst_393 = arith.constant dense<0.000000e+00> : vector<2x8xf32>
    %967 = tpu.matmul %966, %493, %cst_393 {dimension_numbers = #tpu.dot_dimension_numbers<[1], [0], [0], [1], [0, 0, 1, 1], [], []>} : vector<2x32xbf16>, vector<32x8xbf16>, vector<2x8xf32> -> vector<2x8xf32>
    %968 = vector.broadcast %495 : vector<1x8xf32> to vector<2x8xf32>
    %969 = arith.addf %967, %968 : vector<2x8xf32>
    %cst_394 = arith.constant dense<0xFF800000> : vector<2xf32>
    %970 = vector.multi_reduction <maximumf>, %969, %cst_394 [1] : vector<2x8xf32> to vector<2xf32>
    %971 = vector.shape_cast %970 : vector<2xf32> to vector<2x1xf32>
    %972 = vector.broadcast %971 : vector<2x1xf32> to vector<2x8xf32>
    %973 = arith.subf %969, %972 : vector<2x8xf32>
    %974 = math.exp %973 : vector<2x8xf32>
    %cst_395 = arith.constant dense<0.000000e+00> : vector<2xf32>
    %975 = vector.multi_reduction <add>, %974, %cst_395 [1] : vector<2x8xf32> to vector<2xf32>
    %976 = vector.shape_cast %975 : vector<2xf32> to vector<2x1xf32>
    %977 = tpu.reciprocal %976 : vector<2x1xf32> -> vector<2x1xf32>
    %978 = vector.broadcast %977 : vector<2x1xf32> to vector<2x8xf32>
    %979 = arith.mulf %974, %978 : vector<2x8xf32>
    %c0_396 = arith.constant 0 : index
    %c0_397 = arith.constant 0 : index
    %c56 = arith.constant 56 : index
    %980 = vector.load %arg15[%c0_396, %c0_397, %c56] : memref<1x2x64xf32, #tpu.memory_space<vmem>>, vector<1x2x8xf32>
    %981 = vector.shape_cast %980 : vector<1x2x8xf32> to vector<2x8xf32>
    %982 = vector.shape_cast %979 : vector<2x8xf32> to vector<1x2x8xf32>
    tpu.vector_store %arg15[%c0_396, %c0_397, %c56], %982 {strides = array<i32>} : memref<1x2x64xf32, #tpu.memory_space<vmem>>, vector<1x2x8xf32>,
    %983 = math.log %976 : vector<2x1xf32>
    %984 = arith.addf %983, %971 : vector<2x1xf32>
    %c0_398 = arith.constant 0 : index
    %c7 = arith.constant 7 : index
    %c0_399 = arith.constant 0 : index
    %c0_400 = arith.constant 0 : index
    %985 = vector.load %arg2[%c0_398, %c7, %c0_399, %c0_400] : memref<1x8x2x1xi32, #tpu.memory_space<vmem>>, vector<1x1x2x1xi32>
    %986 = vector.shape_cast %985 : vector<1x1x2x1xi32> to vector<2x1xi32>
    %987 = vector.broadcast %986 : vector<2x1xi32> to vector<2x8xi32>
    %988 = arith.cmpi eq, %502, %987 : vector<2x8xi32>
    %cst_401 = arith.constant 0.000000e+00 : f32
    %989 = vector.broadcast %cst_401 : f32 to vector<2x8xf32>
    %990 = arith.select %988, %969, %989 : vector<2x8xi1>, vector<2x8xf32>
    %cst_402 = arith.constant dense<0.000000e+00> : vector<2xf32>
    %991 = vector.multi_reduction <add>, %990, %cst_402 [1] : vector<2x8xf32> to vector<2xf32>
    %992 = vector.shape_cast %991 : vector<2xf32> to vector<2x1xf32>
    %993 = arith.subf %984, %992 : vector<2x1xf32>
    %994 = arith.addf %931, %993 : vector<2x1xf32>
    %cst_403 = arith.constant dense<0.000000e+00> : vector<1xf32>
    %995 = vector.multi_reduction <add>, %994, %cst_403 [0] : vector<2x1xf32> to vector<1xf32>
    %996 = vector.shape_cast %995 : vector<1xf32> to vector<1x1xf32>
    %cst_404 = arith.constant 5.000000e-01 : f32
    %997 = vector.broadcast %cst_404 : f32 to vector<1x1xf32>
    %998 = arith.mulf %996, %997 : vector<1x1xf32>
    %c0_405 = arith.constant 0 : index
    %c0_406 = arith.constant 0 : index
    %c0_407 = arith.constant 0 : index
    %999 = vector.load %arg16[%c0_405, %c0_406, %c0_407] : memref<1x1x1xf32, #tpu.memory_space<vmem>>, vector<1x1x1xf32>
    %1000 = vector.shape_cast %999 : vector<1x1x1xf32> to vector<1x1xf32>
    %1001 = vector.shape_cast %998 : vector<1x1xf32> to vector<1x1x1xf32>
    tpu.vector_store %arg16[%c0_405, %c0_406, %c0_407], %1001 {strides = array<i32>} : memref<1x1x1xf32, #tpu.memory_space<vmem>>, vector<1x1x1xf32>,
    return
  }
  func.func @transform_0(%arg0: i32) -> (i32, i32, i32) {
    %c0_i32 = arith.constant 0 : i32
    %c0_i32_0 = arith.constant 0 : i32
    %c0_i32_1 = arith.constant 0 : i32
    return %arg0, %c0_i32, %c0_i32_0 : i32, i32, i32
  }
  func.func @transform_1(%arg0: i32) -> (i32, i32, i32, i32) {
    %c0_i32 = arith.constant 0 : i32
    %c0_i32_0 = arith.constant 0 : i32
    %c0_i32_1 = arith.constant 0 : i32
    %c0_i32_2 = arith.constant 0 : i32
    return %arg0, %c0_i32, %c0_i32_0, %c0_i32_1 : i32, i32, i32, i32
  }
  func.func @transform_2(%arg0: i32) -> (i32, i32) {
    %c0_i32 = arith.constant 0 : i32
    %c0_i32_0 = arith.constant 0 : i32
    %c0_i32_1 = arith.constant 0 : i32
    return %c0_i32, %c0_i32_0 : i32, i32
  }
  func.func @transform_3(%arg0: i32) -> (i32, i32) {
    %c0_i32 = arith.constant 0 : i32
    %c0_i32_0 = arith.constant 0 : i32
    %c0_i32_1 = arith.constant 0 : i32
    return %c0_i32, %c0_i32_0 : i32, i32
  }
  func.func @transform_4(%arg0: i32) -> (i32, i32) {
    %c0_i32 = arith.constant 0 : i32
    %c0_i32_0 = arith.constant 0 : i32
    %c0_i32_1 = arith.constant 0 : i32
    return %c0_i32, %c0_i32_0 : i32, i32
  }
  func.func @transform_5(%arg0: i32) -> (i32, i32) {
    %c0_i32 = arith.constant 0 : i32
    %c0_i32_0 = arith.constant 0 : i32
    %c0_i32_1 = arith.constant 0 : i32
    return %c0_i32, %c0_i32_0 : i32, i32
  }
  func.func @transform_6(%arg0: i32) -> (i32, i32) {
    %c0_i32 = arith.constant 0 : i32
    %c0_i32_0 = arith.constant 0 : i32
    %c0_i32_1 = arith.constant 0 : i32
    return %c0_i32, %c0_i32_0 : i32, i32
  }
  func.func @transform_7(%arg0: i32) -> (i32, i32) {
    %c0_i32 = arith.constant 0 : i32
    %c0_i32_0 = arith.constant 0 : i32
    %c0_i32_1 = arith.constant 0 : i32
    return %c0_i32, %c0_i32_0 : i32, i32
  }
  func.func @transform_8(%arg0: i32) -> (i32, i32) {
    %c0_i32 = arith.constant 0 : i32
    %c0_i32_0 = arith.constant 0 : i32
    %c0_i32_1 = arith.constant 0 : i32
    return %c0_i32, %c0_i32_0 : i32, i32
  }
  func.func @transform_9(%arg0: i32) -> (i32, i32) {
    %c0_i32 = arith.constant 0 : i32
    %c0_i32_0 = arith.constant 0 : i32
    %c0_i32_1 = arith.constant 0 : i32
    return %c0_i32, %c0_i32_0 : i32, i32
  }
  func.func @transform_10(%arg0: i32) -> (i32, i32) {
    %c0_i32 = arith.constant 0 : i32
    %c0_i32_0 = arith.constant 0 : i32
    %c0_i32_1 = arith.constant 0 : i32
    return %c0_i32, %c0_i32_0 : i32, i32
  }
  func.func @transform_11(%arg0: i32) -> (i32, i32) {
    %c0_i32 = arith.constant 0 : i32
    %c0_i32_0 = arith.constant 0 : i32
    %c0_i32_1 = arith.constant 0 : i32
    return %c0_i32, %c0_i32_0 : i32, i32
  }
  func.func @transform_12(%arg0: i32) -> (i32, i32) {
    %c0_i32 = arith.constant 0 : i32
    %c0_i32_0 = arith.constant 0 : i32
    %c0_i32_1 = arith.constant 0 : i32
    return %c0_i32, %c0_i32_0 : i32, i32
  }
  func.func @transform_13(%arg0: i32) -> (i32, i32) {
    %c0_i32 = arith.constant 0 : i32
    %c0_i32_0 = arith.constant 0 : i32
    %c0_i32_1 = arith.constant 0 : i32
    return %c0_i32, %c0_i32_0 : i32, i32
  }
  func.func @transform_14(%arg0: i32) -> (i32, i32, i32) {
    %c0_i32 = arith.constant 0 : i32
    %c0_i32_0 = arith.constant 0 : i32
    %c0_i32_1 = arith.constant 0 : i32
    return %arg0, %c0_i32, %c0_i32_0 : i32, i32, i32
  }
  func.func @transform_15(%arg0: i32) -> (i32, i32, i32) {
    %c0_i32 = arith.constant 0 : i32
    %c0_i32_0 = arith.constant 0 : i32
    %c0_i32_1 = arith.constant 0 : i32
    return %arg0, %c0_i32, %c0_i32_0 : i32, i32, i32
  }
}

</mosaic_0001>

<bundles_post_ra>
// kernel: focus_forward.1
= control target key start
LH: loop header
LB: loop body
LE: loop exit
PB: predicated region body
PF: predicated region fallthrough
CT: control target
= control target key end

     0   :  { %21 = vsyncpa [#allocation7], 0  ;;  %s5392_s0 = inlined_call_operand.vmem [shape: s32[1,16,1], index: 0, kind: input, shape index: {}]   ;;  %s5393_s1 = inlined_call_operand.vmem [shape: s32[1,8,2,1], index: 1, kind: input, shape index: {}]   ;;  %s5394_s2 = inlined_call_operand.vmem [shape: f32[32,16], index: 2, kind: input, shape index: {}]   ;;  %s5395_s3 = inlined_call_operand.vmem [shape: f32[16,128], index: 3, kind: input, shape index: {}]   ;;  %s5396_s4 = inlined_call_operand.vmem [shape: f32[32,128], index: 4, kind: input, shape index: {}]   ;;  %s5397_s5 = inlined_call_operand.hbm [shape: f32[1,128], index: 5, kind: input, shape index: {}]   ;;  %s5398_s6 = inlined_call_operand.vmem [shape: f32[32,128], index: 6, kind: input, shape index: {}]   ;;  %s5399_s7 = inlined_call_operand.vmem [shape: f32[32,128], index: 7, kind: input, shape index: {}]   ;;  %s5400_s8 = inlined_call_operand.hbm [shape: f32[1,128], index: 8, kind: input, shape index: {}]   ;;  %s5401_s9 = inlined_call_operand.hbm [shape: f32[8,128], index: 9, kind: input, shape index: {}]   ;;  %s5402_s10 = inlined_call_operand.vmem [shape: f32[32,128], index: 10, kind: input, shape index: {}]   ;;  %s5403_s11 = inlined_call_operand.hbm [shape: f32[1,128], index: 11, kind: input, shape index: {}]   ;;  %s5404_s12 = inlined_call_operand.vmem [shape: f32[32,8], index: 12, kind: input, shape index: {}]   ;;  %s5405_s13 = inlined_call_operand.vmem [shape: f32[1,8], index: 13, kind: input, shape index: {}]   ;;  %s5406_s14 = inlined_call_operand.vmem [shape: f32[1,2,64], index: 14, kind: output, shape index: {0}]   ;;  %s5407_s15 = inlined_call_operand.hbm [shape: f32[1,1,1], index: 15, kind: output, shape index: {1}]  }
   0x1   :  { %22 = vsyncpa [#allocation10], 0 }
   0x2   :  { %23 = vsyncpa [#allocation13], 0 }
   0x3   :  { %24 = vsyncpa [#allocation8], 0  ;;  %s4315_s18 = smov [#allocation9]   ;;  %s4316_s20 = smov [#allocation6]  }
   0x4   :  { %s55_s19 = sshll.u32 %s4315_s18, 4  ;;  %s41_s21 = sshll.u32 %s4316_s20, 4  ;;  %s56_s19 = int_to_ptr.vmem [resolvable:$true] %s55_s19  ;;  %s42_s21 = int_to_ptr.vmem [resolvable:$true] %s41_s21 }
   0x5   :  { %s4197_s24 = scalar_lea.hbm %s5400_s8, 16 }
   0x6   :  { %p4198_p0 = scmp.ne.s32.totalorder %s5400_s8, %s4197_s24  ;;  %p4201_p1 = scmp.lt.u32.totalorder %s4197_s24, %s5400_s8 }
   0x8   :  { %p4203_p2 = pnand %p4201_p1, %p4198_p0 }
   0xa   :  { %4206 = shalt.err (!%p4203_p2)
}
   0xb   :  { %s4207_s29 = scalar_lea.vmem %s56_s19, 16  ;;  %s4211_s30 = scalar_lea.vmem %s56_s19, 32 }
   0xc   :  { %p4208_p3 = scmp.ne.s32.totalorder %s56_s19, %s4207_s29  ;;  %p4212_p4 = scmp.lt.s32.totalorder %s56_s19, %s56_s19 }
   0xd   :  { %p4213_p5 = scmp.lt.s32.totalorder %s4211_s30, %s4207_s29 }
   0xf   :  { %p4214_p6 = por %p4213_p5, %p4212_p4 }
  0x11   :  { %p4215_p7 = pnand %p4214_p6, %p4208_p3 }
  0x13   :  { %4218 = shalt.err (!%p4215_p7)
}
  0x14   :  { %58 = dma.hbm_to_vmem [thread:$0]  %s5400_s8, 16, %s56_s19, [#allocation10]  }
  0x15   :  { %s4219_s22 = scalar_lea.hbm %s5397_s5, 16 }
  0x16   :  { %p4220_p8 = scmp.ne.s32.totalorder %s5397_s5, %s4219_s22  ;;  %p4223_p9 = scmp.lt.u32.totalorder %s4219_s22, %s5397_s5 }
  0x18   :  { %p4225_p10 = pnand %p4223_p9, %p4220_p8 }
  0x1a   :  { %4228 = shalt.err (!%p4225_p10)
}
  0x1b   :  { %s4229_s27 = scalar_lea.vmem %s42_s21, 16  ;;  %s4233_s28 = scalar_lea.vmem %s42_s21, 32 }
  0x1c   :  { %p4230_p11 = scmp.ne.s32.totalorder %s42_s21, %s4229_s27  ;;  %p4234_p12 = scmp.lt.s32.totalorder %s42_s21, %s42_s21 }
  0x1d   :  { %p4235_p13 = scmp.lt.s32.totalorder %s4233_s28, %s4229_s27 }
  0x1f   :  { %p4236_p0 = por %p4235_p13, %p4234_p12 }
  0x21   :  { %p4237_p1 = pnand %p4236_p0, %p4230_p11 }
  0x23   :  { %4240 = shalt.err (!%p4237_p1)
}
  0x24   :  { %44 = dma.hbm_to_vmem [thread:$0]  %s5397_s5, 16, %s42_s21, [#allocation7]  }
  0x25   :  { %s4317_s29 = smov [#allocation11]   ;;  %s4318_s16 = smov [#allocation12]  }
  0x26   :  { %s65_s30 = sshll.u32 %s4317_s29, 4  ;;  %s77_s17 = sshll.u32 %s4318_s16, 4  ;;  %s66_s30 = int_to_ptr.vmem [resolvable:$true] %s65_s30  ;;  %s78_s17 = int_to_ptr.vmem [resolvable:$true] %s77_s17 }
  0x27   :  { %s4241_s22 = scalar_lea.hbm %s5401_s9, 128 }
  0x28   :  { %p4242_p2 = scmp.ne.s32.totalorder %s5401_s9, %s4241_s22  ;;  %p4245_p3 = scmp.lt.u32.totalorder %s4241_s22, %s5401_s9 }
  0x2a   :  { %p4247_p4 = pnand %p4245_p3, %p4242_p2 }
  0x2c   :  { %4250 = shalt.err (!%p4247_p4)
}
  0x2d   :  { %s4251_s5 = scalar_lea.vmem %s66_s30, 128  ;;  %p4256_p6 = scmp.lt.s32.totalorder %s66_s30, %s66_s30 }
  0x2e   :  { %p4252_p5 = scmp.ne.s32.totalorder %s66_s30, %s4251_s5  ;;  %p4257_p7 = scmp.lt.s32.totalorder %s4251_s5, %s4251_s5 }
  0x30   :  { %p4258_p8 = por %p4257_p7, %p4256_p6 }
  0x32   :  { %p4259_p9 = pnand %p4258_p8, %p4252_p5 }
  0x34   :  { %4262 = shalt.err (!%p4259_p9)
}
  0x35   :  { %68 = dma.hbm_to_vmem [thread:$0]  %s5401_s9, 128, %s66_s30, [#allocation10]  }
  0x36   :  { %s4263_s19 = scalar_lea.hbm %s5403_s11, 16 }
  0x37   :  { %p4264_p10 = scmp.ne.s32.totalorder %s5403_s11, %s4263_s19  ;;  %p4267_p11 = scmp.lt.u32.totalorder %s4263_s19, %s5403_s11 }
  0x39   :  { %p4269_p12 = pnand %p4267_p11, %p4264_p10 }
  0x3b   :  { %4272 = shalt.err (!%p4269_p12)
}
  0x3c   :  { %s4273_s22 = scalar_lea.vmem %s78_s17, 16  ;;  %s4277_s23 = scalar_lea.vmem %s78_s17, 32 }
  0x3d   :  { %p4274_p13 = scmp.ne.s32.totalorder %s78_s17, %s4273_s22  ;;  %p4278_p0 = scmp.lt.s32.totalorder %s78_s17, %s78_s17 }
  0x3e   :  { %p4279_p1 = scmp.lt.s32.totalorder %s4277_s23, %s4273_s22 }
  0x40   :  { %p4280_p2 = por %p4279_p1, %p4278_p0 }
  0x42   :  { %p4281_p3 = pnand %p4280_p2, %p4274_p13 }
  0x44   :  { %4284 = shalt.err (!%p4281_p3)
}
  0x45   :  { %80 = dma.hbm_to_vmem [thread:$0]  %s5403_s11, 16, %s78_s17, [#allocation13]  }
  0x46   :  { %4307 = dma.done.wait [#allocation7], 16  }
  0x47   :  { %4308 = vsyncadd [#allocation7], 4294967280 }
  0x48   :  { %4309 = dma.done.wait [#allocation10], 144  }
  0x49   :  { %4310 = vsyncadd [#allocation10], 4294967152 }
  0x4a   :  { %4311 = dma.done.wait [#allocation13], 16  }
  0x4b   :  { %4312 = vsyncadd [#allocation13], 4294967280  ;;  %v4319_v0 = vmov 0   ;;  %v4320_v1 = vmov 0.0   ;;  %v113_v2 = vld [vmem:[%s5392_s0] sm:$0xff]  ;;  %v129_v4 = vld [vmem:[%s5394_s2 + $0x8] sm:$0xff]  ;;  %v98_v10 = vlaneseq }
  0x4c   :  { %3954 = vset.pattern.permute.xlu0 %v4319_v0  ;;  %3568 = vmatprep.subr.bf16.mxu0 %v4320_v1  ;;  %v128_v3 = vld [vmem:[%s5394_s2] sm:$0xff]  ;;  %v114_v5 = vld [vmem:[%s5392_s0 + $0x8] sm:$0xff]  ;;  %v130_v7 = vld [vmem:[%s5394_s2 + $0x10] sm:$0xff]  ;;  %vm4321_vm0 = vmmov 0   ;;  %vm134_vm3 = vcmask 261120   ;;  %vm196_vm4 = vcmask 130048  }
  0x4d   :  { %3576 = vmatprep.subr.bf16.mxu1 %v4320_v1  ;;  %116 = vperm.xlu0 %3954, %v113_v2   ;;  %v132_v6 = vpack.c.bf16 %v129_v4, %v128_v3  ;;  %v131_v8 = vld [vmem:[%s5394_s2 + $0x18] sm:$0xff]  ;;  %v4486_v11 = vand.u32 127, %v98_v10  ;;  %v186_v17 = vld [vmem:[%s5395_s3] sm:$0xff]  ;;  %v187_v18 = vld [vmem:[%s5395_s3 + $0x8] sm:$0xff]  ;;  %s4323_s26 = smov 32   ;;  %vm348_vm6 = vcmask 123904  }
  0x4e   :  { %v133_v9 = vpack.c.bf16 %v131_v8, %v130_v7  ;;  %3572 = vmatprep.mubr.msk.bf16.mxu0 %vm4321_vm0, %v4320_v1  ;;  %3578 = vmatprep.mubr.msk.bf16.mxu1 %vm4321_vm0, %v4320_v1  ;;  %v189_v19 = vpack.c.bf16 %v187_v18, %v186_v17  ;;  %v180_v20 = vld [vmem:[%s5396_s4] sm:$0xff]  ;;  %v181_v21 = vld [vmem:[%s5396_s4 + $0x8] sm:$0xff]  ;;  %v182_v23 = vld [vmem:[%s5396_s4 + $0x10] sm:$0xff]  ;;  %vm350_vm7 = vcmask 255104   ;;  %vm1829_vm8 = vcmask 58368   ;;  %s4325_s20 = smov 8  }
  0x4f   :  { %3569 = vmatpush3.bf16.msra.mxu0 %v132_v6  ;;  %v4508_v22 = vpack.c.bf16 %v181_v21, %v180_v20  ;;  %v183_v24 = vld [vmem:[%s5396_s4 + $0x18] sm:$0xff]  ;;  %v3366_v31 = vld [vmem:[#allocation6] ss:$0 sm:$0xff]  ;;  %v104_v38 = vand.u32 31, %v4486_v11  ;;  %s4322_s4 = smov 64   ;;  %vm1881_vm11 = vcmask 1043456  }
  0x50   :  { %3570 = vmatprep.subr.bf16.mxu0 %v4320_v1  ;;  %3577 = vmatpush3.bf16.msra.mxu1 %v189_v19  ;;  %v4518_v25 = vpack.c.bf16 %v183_v24, %v182_v23  ;;  %vm1877_vm13 = vcmask 64512   ;;  %s4326_s29 = smov 40   ;;  %s4328_s0 = smov 24  }
  0x51   :  { %119 = vperm.xlu0 %3954, %v114_v5   ;;  %3582 = vmatprep.subr.bf16.mxu1 %v4320_v1  ;;  %vm4537_vm5 = vcmp.lt.s32.totalorder %v104_v38, 16  ;;  %s4330_s23 = smov [#allocation14]  }
  0x52   :  { %s3350_s9 = sshll.u32 %s4330_s23, 4  ;;  %s3351_s9 = int_to_ptr.vmem [resolvable:$true] %s3350_s9 }
  0x53   :  { %3571 = vmatpush3.bf16.msra.mxu0 %v133_v9  ;;  %s4285_s30 = scalar_lea.vmem %s3351_s9, 16  ;;  %s4289_s24 = scalar_lea.vmem %s3351_s9, 32 }
  0x54   :  { %3590 = vmatprep.subr.bf16.mxu0 %v4320_v1  ;;  %p4286_p4 = scmp.ne.s32.totalorder %s3351_s9, %s4285_s30  ;;  %p4290_p5 = scmp.lt.s32.totalorder %s3351_s9, %s3351_s9 }
  0x55   :  { %p4291_p6 = scmp.lt.s32.totalorder %s4289_s24, %s4285_s30 }
  0x57   :  { %p4292_p7 = por %p4291_p6, %p4290_p5 }
  0x59   :  { %p4293_p8 = pnand %p4292_p7, %p4286_p4 }
  0xcc   :  { %v117_v12 = vpop.permute.xlu0 %116 }
  0xcd   :  { %vm121_vm1 = vcmp.eq.s32.totalorder %v4486_v11, %v117_v12 }
  0xce   :  { %v3363_v14 = vsel %vm121_vm1, 1.0, %v4320_v1 }
  0xd0   :  { %v120_v13 = vpop.permute.xlu0 %119 }
  0xd1   :  { %vm122_vm2 = vcmp.eq.s32.totalorder %v4486_v11, %v120_v13 }
  0xd2   :  { %v3364_v15 = vsel %vm122_vm2, 1.0, %v4320_v1 }
  0xd3   :  { %v127_v16 = vpack.c.bf16 %v3364_v15, %v3363_v14 }
  0xd5   :  { %3573 = vmatmul.mubr.msk.bf16.vlgmr.msra.gmra.mrb[0].mxu0 %vm134_vm3, %v127_v16 }
  0xd6   :  { %3594 = vmatprep.mubr.msk.bf16.mxu0 %vm4321_vm0, %v4320_v1  ;;  %3591 = vmatpush3.bf16.msra.mxu0 %v4508_v22 }
  0xd7   :  { %3592 = vmatprep.subr.bf16.mxu0 %v4320_v1 }
  0xda   :  { %3593 = vmatpush3.bf16.msra.mxu0 %v4518_v25 }
  0xdb   :  { %3606 = vmatprep.subr.bf16.mxu0 %v4320_v1 }
 0x1a8   :  { %v172_v26 = vpop.f32.mrb[0].mxu0 }
 0x1a9   :  { %v3574_v27 = vpop.f32.mrb[1].mxu0 }
 0x1aa   :  { %v175_v28 = vpop.f32.mrb[2].mxu0 }
 0x1ab   :  { %v188_v29 = vpack.c.bf16 %v175_v28, %v172_v26  ;;  %v3575_v30 = vpop.f32.mrb[3].mxu0 }
 0x1ad   :  { %3579 = vmatmul.mubr.msk.bf16.vlgmr.msra.gmra.mrb[0].mxu1 %vm196_vm4, %v188_v29 }
 0x1ae   :  { %3583 = vmatpush3.bf16.msra.mxu1 %v4508_v22  ;;  %3586 = vmatprep.mubr.msk.bf16.mxu1 %vm4321_vm0, %v4320_v1 }
 0x1af   :  { %3584 = vmatprep.subr.bf16.mxu1 %v4320_v1 }
 0x1b2   :  { %3585 = vmatpush3.bf16.msra.mxu1 %v4518_v25 }
 0x1b3   :  { %3598 = vmatprep.subr.bf16.mxu1 %v4320_v1 }
 0x1b5   :  { %3587 = vmatmul.mubr.bf16.vlgmr.msra.gmra.mrb[4].mxu1 %v4319_v0 }
 0x1b6   :  { %3599 = vmatpush3.bf16.msra.mxu1 %v4508_v22  ;;  %3602 = vmatprep.mubr.msk.bf16.mxu1 %vm4321_vm0, %v4320_v1 }
 0x1b7   :  { %3600 = vmatprep.subr.bf16.mxu1 %v4320_v1 }
 0x1ba   :  { %3601 = vmatpush3.bf16.msra.mxu1 %v4518_v25 }
 0x1bb   :  { %3614 = vmatprep.subr.bf16.mxu1 %v4320_v1 }
 0x280   :  { %v234_v32 = vpop.f32.mrb[0].mxu1 }
 0x281   :  { %v235_v33 = vadd.f32 %v3366_v31, %v234_v32  ;;  %v3580_v34 = vpop.f32.mrb[1].mxu1 }
 0x282   :  { %v237_v35 = vpop.f32.mrb[2].mxu1 }
 0x283   :  { %241 = vst [vmem:[#allocation2] sm:$0xff] %v235_v33  ;;  %v238_v36 = vadd.f32 %v3366_v31, %v237_v35  ;;  %v3581_v37 = vpop.f32.mrb[3].mxu1 }
 0x285   :  { %242 = vst [vmem:[#allocation2 + $0x8] sm:$0xff] %v238_v36 }
 0x288   :  { %v313_v39 = vpop.f32.mrb[4].mxu1 }
 0x289   :  { %v3588_v40 = vpop.f32.mrb[5].mxu1 }
 0x28a   :  { %v243_v41 = vld [vmem:[#allocation2] sm:$0x3]  ;;  %v247_v43 = vld [vmem:[#allocation2 + $0x2] sm:$0x3]  ;;  %v251_v44 = vld [vmem:[#allocation2 + $0x4] sm:$0x3] }
 0x28b   :  { %v255_v45 = vld [vmem:[#allocation2 + $0x6] sm:$0x3]  ;;  %v264_v47 = vld [vmem:[#allocation2 + $0x4] sm:$0x3]  ;;  %v268_v48 = vld [vmem:[#allocation2 + $0x2] sm:$0x3] }
 0x28c   :  { %v260_v46 = vld [vmem:[#allocation2 + $0x6] sm:$0x3]  ;;  %v244_v49 = vld [vmem:[#allocation2 + $0xe] sm:$0x3]  ;;  %v248_v50 = vld [vmem:[#allocation2 + $0xc] sm:$0x3] }
 0x28d   :  { %v252_v51 = vld [vmem:[#allocation2 + $0xa] sm:$0x3]  ;;  %v256_v52 = vld [vmem:[#allocation2 + $0x8] sm:$0x3]  ;;  %v245_v53 = vsel %vm4537_vm5, %v243_v41, %v244_v49  ;;  %v267_v56 = vld [vmem:[#allocation2 + $0xc] sm:$0x3]  ;;  %v249_v57 = vsel %vm4537_vm5, %v247_v43, %v248_v50 }
 0x28e   :  { %v259_v54 = vld [vmem:[#allocation2 + $0x8] sm:$0x3]  ;;  %v263_v55 = vld [vmem:[#allocation2 + $0xa] sm:$0x3]  ;;  %246 = vst [vmem:[#allocation3] sm:$0x3] %v245_v53  ;;  %v253_v58 = vsel %vm4537_vm5, %v251_v44, %v252_v51  ;;  %v257_v59 = vsel %vm4537_vm5, %v255_v45, %v256_v52  ;;  %v269_v3 = vsel %vm4537_vm5, %v267_v56, %v268_v48 }
 0x28f   :  { %v272_v60 = vld [vmem:[#allocation2] sm:$0x3]  ;;  %v271_v61 = vld [vmem:[#allocation2 + $0xe] sm:$0x3]  ;;  %v316_v62 = vpop.f32.mrb[6].mxu1  ;;  %v261_v63 = vsel %vm4537_vm5, %v259_v54, %v260_v46  ;;  %v265_v2 = vsel %vm4537_vm5, %v263_v55, %v264_v47 }
 0x290   :  { %250 = vst [vmem:[#allocation3 + $0x2] sm:$0x3] %v249_v57  ;;  %254 = vst [vmem:[#allocation3 + $0x4] sm:$0x3] %v253_v58  ;;  %v3589_v4 = vpop.f32.mrb[7].mxu1  ;;  %v273_v5 = vsel %vm4537_vm5, %v271_v61, %v272_v60 }
 0x291   :  { %258 = vst [vmem:[#allocation3 + $0x6] sm:$0x3] %v257_v59  ;;  %262 = vst [vmem:[#allocation3 + $0x8] sm:$0x3] %v261_v63 }
 0x292   :  { %266 = vst [vmem:[#allocation3 + $0xa] sm:$0x3] %v265_v2  ;;  %270 = vst [vmem:[#allocation3 + $0xc] sm:$0x3] %v269_v3 }
 0x293   :  { %274 = vst [vmem:[#allocation3 + $0xe] sm:$0x3] %v273_v5 }
 0x295   :  { %v275_v6 = vld [vmem:[#allocation3] sm:$0x3] }
 0x296   :  { %v319_v7 = vadd.f32 %v313_v39, %v275_v6 }
 0x297   :  { %v352_v26 = vld [vmem:[#allocation3 + $0x2] sm:$0x3]  ;;  %v431_v48 = vld [vmem:[#allocation3 + $0x4] sm:$0x3] }
 0x298   :  { %3955 = vtanh.f32 %v319_v7  ;;  %v3368_v9 = vmul.f32 -1.442695, %v319_v7  ;;  %v510_v7 = vld [vmem:[#allocation3 + $0x6] sm:$0x3] }
 0x29a   :  { %3957 = vpow2.f32 %v3368_v9 }
 0x2a2   :  { %v3956_v8 = vpop.eup %3955 }
 0x2a3   :  { %329 = vrot.lane.b32.xlu1 %v3956_v8, %s4322_s4 }
 0x2a4   :  { %v3958_v10 = vpop.eup %3957 }
 0x2a5   :  { %v323_v12 = vadd.f32 1.0, %v3958_v10 }
 0x2a7   :  { %3959 = vrcp.f32 %v323_v12 }
 0x2b1   :  { %v3960_v13 = vpop.eup %3959 }
 0x2b2   :  { %v327_v16 = vmul.f32 0.0, %v3960_v13 }
 0x315   :  { %v330_v14 = vpop.permute.xlu1 %329 }
 0x316   :  { %v332_v15 = vmul.f32 %v3960_v13, %v330_v14 }
 0x318   :  { %334 = vrot.lane.b32.xlu1 %v332_v15, %s4323_s26 }
 0x38a   :  { %v335_v17 = vpop.permute.xlu1 %334 }
 0x38b   :  { %v337_v18 = vadd.f32 %v335_v17, %v327_v16 }
 0x38d   :  { %3961 = vtanh.f32 %v337_v18 }
 0x397   :  { %v3962_v19 = vpop.eup %3961 }
 0x398   :  { %340 = vrot.lane.b32.xlu0 %v3962_v19, %s4322_s4 }
 0x40a   :  { %v341_v20 = vpop.permute.xlu0 %340 }
 0x40b   :  { %v4560_v21 = vmul.f32 %v3960_v13, %v341_v20 }
 0x40d   :  { %v353_v23 = vpack.c.bf16 %v4560_v21, %v4560_v21 }
 0x40f   :  { %355 = vrot.lane.b32.xlu1 %v353_v23, %s4323_s26 }
 0x481   :  { %v356_v24 = vpop.permute.xlu1 %355 }
 0x482   :  { %3595 = vmatmul.mubr.msk.bf16.vlgmr.msra.gmra.mrb[4].mxu0 %vm134_vm3, %v356_v24 }
 0x483   :  { %3607 = vmatpush3.bf16.msra.mxu0 %v4508_v22  ;;  %3610 = vmatprep.mubr.msk.bf16.mxu0 %vm4321_vm0, %v4320_v1 }
 0x484   :  { %3608 = vmatprep.subr.bf16.mxu0 %v4320_v1 }
 0x487   :  { %3609 = vmatpush3.bf16.msra.mxu0 %v4518_v25 }
 0x488   :  { %3622 = vmatprep.subr.bf16.mxu0 %v4320_v1 }
 0x555   :  { %v394_v27 = vpop.f32.mrb[4].mxu0 }
 0x556   :  { %v400_v28 = vadd.f32 %v394_v27, %v352_v26  ;;  %v3596_v29 = vpop.f32.mrb[5].mxu0 }
 0x557   :  { %v397_v30 = vpop.f32.mrb[6].mxu0 }
 0x558   :  { %3963 = vtanh.f32 %v400_v28  ;;  %v3597_v31 = vpop.f32.mrb[7].mxu0  ;;  %v3370_v33 = vmul.f32 -1.442695, %v400_v28 }
 0x55a   :  { %3965 = vpow2.f32 %v3370_v33 }
 0x562   :  { %v3964_v32 = vpop.eup %3963 }
 0x563   :  { %410 = vrot.lane.b32.xlu0 %v3964_v32, %s4322_s4  ;;  %v589_v32 = vld [vmem:[#allocation3 + $0x8] sm:$0x3] }
 0x564   :  { %v3966_v34 = vpop.eup %3965 }
 0x565   :  { %v404_v35 = vadd.f32 1.0, %v3966_v34 }
 0x567   :  { %3967 = vrcp.f32 %v404_v35 }
 0x571   :  { %v3968_v36 = vpop.eup %3967 }
 0x572   :  { %v408_v39 = vmul.f32 %v3968_v36, %v337_v18 }
 0x5d5   :  { %v411_v37 = vpop.permute.xlu0 %410 }
 0x5d6   :  { %v413_v38 = vmul.f32 %v3968_v36, %v411_v37 }
 0x5d8   :  { %415 = vrot.lane.b32.xlu1 %v413_v38, %s4323_s26 }
 0x64a   :  { %v416_v40 = vpop.permute.xlu1 %415 }
 0x64b   :  { %v418_v41 = vadd.f32 %v416_v40, %v408_v39 }
 0x64d   :  { %3969 = vtanh.f32 %v418_v41 }
 0x657   :  { %v3970_v43 = vpop.eup %3969 }
 0x658   :  { %421 = vrot.lane.b32.xlu0 %v3970_v43, %s4322_s4 }
 0x6ca   :  { %v422_v44 = vpop.permute.xlu0 %421 }
 0x6cb   :  { %v4575_v45 = vmul.f32 %v3968_v36, %v422_v44 }
 0x6cd   :  { %v432_v46 = vpack.c.bf16 %v4575_v45, %v4575_v45 }
 0x6cf   :  { %434 = vrot.lane.b32.xlu1 %v432_v46, %s4323_s26 }
 0x741   :  { %v435_v47 = vpop.permute.xlu1 %434 }
 0x742   :  { %3603 = vmatmul.mubr.msk.bf16.vlgmr.msra.gmra.mrb[8].mxu1 %vm134_vm3, %v435_v47 }
 0x743   :  { %3615 = vmatpush3.bf16.msra.mxu1 %v4508_v22  ;;  %3618 = vmatprep.mubr.msk.bf16.mxu1 %vm4321_vm0, %v4320_v1 }
 0x744   :  { %3616 = vmatprep.subr.bf16.mxu1 %v4320_v1 }
 0x747   :  { %3617 = vmatpush3.bf16.msra.mxu1 %v4518_v25 }
 0x748   :  { %3630 = vmatprep.subr.bf16.mxu1 %v4320_v1 }
 0x815   :  { %v473_v49 = vpop.f32.mrb[8].mxu1 }
 0x816   :  { %v479_v50 = vadd.f32 %v473_v49, %v431_v48  ;;  %v3604_v51 = vpop.f32.mrb[9].mxu1 }
 0x817   :  { %v476_v52 = vpop.f32.mrb[10].mxu1 }
 0x818   :  { %3971 = vtanh.f32 %v479_v50  ;;  %v3605_v53 = vpop.f32.mrb[11].mxu1  ;;  %v3372_v55 = vmul.f32 -1.442695, %v479_v50 }
 0x81a   :  { %3973 = vpow2.f32 %v3372_v55  ;;  %v668_v55 = vld [vmem:[#allocation3 + $0xa] sm:$0x3] }
 0x822   :  { %v3972_v54 = vpop.eup %3971 }
 0x823   :  { %489 = vrot.lane.b32.xlu0 %v3972_v54, %s4322_s4 }
 0x824   :  { %v3974_v56 = vpop.eup %3973 }
 0x825   :  { %v483_v57 = vadd.f32 1.0, %v3974_v56 }
 0x827   :  { %3975 = vrcp.f32 %v483_v57 }
 0x831   :  { %v3976_v58 = vpop.eup %3975 }
 0x832   :  { %v487_v61 = vmul.f32 %v3976_v58, %v418_v41 }
 0x895   :  { %v490_v59 = vpop.permute.xlu0 %489 }
 0x896   :  { %v492_v60 = vmul.f32 %v3976_v58, %v490_v59 }
 0x898   :  { %494 = vrot.lane.b32.xlu1 %v492_v60, %s4323_s26 }
 0x90a   :  { %v495_v62 = vpop.permute.xlu1 %494 }
 0x90b   :  { %v497_v63 = vadd.f32 %v495_v62, %v487_v61 }
 0x90d   :  { %3977 = vtanh.f32 %v497_v63 }
 0x917   :  { %v3978_v2 = vpop.eup %3977 }
 0x918   :  { %500 = vrot.lane.b32.xlu0 %v3978_v2, %s4322_s4 }
 0x98a   :  { %v501_v3 = vpop.permute.xlu0 %500 }
 0x98b   :  { %v4590_v4 = vmul.f32 %v3976_v58, %v501_v3 }
 0x98d   :  { %v511_v5 = vpack.c.bf16 %v4590_v4, %v4590_v4 }
 0x98f   :  { %513 = vrot.lane.b32.xlu1 %v511_v5, %s4323_s26 }
 0xa01   :  { %v514_v6 = vpop.permute.xlu1 %513 }
 0xa02   :  { %3611 = vmatmul.mubr.msk.bf16.vlgmr.msra.gmra.mrb[8].mxu0 %vm134_vm3, %v514_v6 }
 0xa03   :  { %3623 = vmatpush3.bf16.msra.mxu0 %v4508_v22  ;;  %3626 = vmatprep.mubr.msk.bf16.mxu0 %vm4321_vm0, %v4320_v1 }
 0xa04   :  { %3624 = vmatprep.subr.bf16.mxu0 %v4320_v1 }
 0xa07   :  { %3625 = vmatpush3.bf16.msra.mxu0 %v4518_v25 }
 0xa08   :  { %3638 = vmatprep.subr.bf16.mxu0 %v4320_v1 }
 0xad5   :  { %v552_v8 = vpop.f32.mrb[8].mxu0 }
 0xad6   :  { %v558_v9 = vadd.f32 %v552_v8, %v510_v7  ;;  %v3612_v10 = vpop.f32.mrb[9].mxu0 }
 0xad7   :  { %v555_v12 = vpop.f32.mrb[10].mxu0 }
 0xad8   :  { %3979 = vtanh.f32 %v558_v9  ;;  %v3613_v13 = vpop.f32.mrb[11].mxu0  ;;  %v3374_v15 = vmul.f32 -1.442695, %v558_v9 }
 0xada   :  { %3981 = vpow2.f32 %v3374_v15 }
 0xae2   :  { %v3980_v14 = vpop.eup %3979 }
 0xae3   :  { %568 = vrot.lane.b32.xlu0 %v3980_v14, %s4322_s4  ;;  %v747_v14 = vld [vmem:[#allocation3 + $0xc] sm:$0x3] }
 0xae4   :  { %v3982_v16 = vpop.eup %3981 }
 0xae5   :  { %v562_v17 = vadd.f32 1.0, %v3982_v16 }
 0xae7   :  { %3983 = vrcp.f32 %v562_v17 }
 0xaf1   :  { %v3984_v18 = vpop.eup %3983 }
 0xaf2   :  { %v566_v23 = vmul.f32 %v3984_v18, %v497_v63 }
 0xb55   :  { %v569_v19 = vpop.permute.xlu0 %568 }
 0xb56   :  { %v571_v20 = vmul.f32 %v3984_v18, %v569_v19 }
 0xb58   :  { %573 = vrot.lane.b32.xlu1 %v571_v20, %s4323_s26 }
 0xbca   :  { %v574_v24 = vpop.permute.xlu1 %573 }
 0xbcb   :  { %v576_v26 = vadd.f32 %v574_v24, %v566_v23 }
 0xbcd   :  { %3985 = vtanh.f32 %v576_v26 }
 0xbd7   :  { %v3986_v27 = vpop.eup %3985 }
 0xbd8   :  { %579 = vrot.lane.b32.xlu0 %v3986_v27, %s4322_s4 }
 0xc4a   :  { %v580_v28 = vpop.permute.xlu0 %579 }
 0xc4b   :  { %v4605_v29 = vmul.f32 %v3984_v18, %v580_v28 }
 0xc4d   :  { %v590_v30 = vpack.c.bf16 %v4605_v29, %v4605_v29 }
 0xc4f   :  { %592 = vrot.lane.b32.xlu1 %v590_v30, %s4323_s26 }
 0xcc1   :  { %v593_v31 = vpop.permute.xlu1 %592 }
 0xcc2   :  { %3619 = vmatmul.mubr.msk.bf16.vlgmr.msra.gmra.mrb[12].mxu1 %vm134_vm3, %v593_v31 }
 0xcc3   :  { %3631 = vmatpush3.bf16.msra.mxu1 %v4508_v22  ;;  %3634 = vmatprep.mubr.msk.bf16.mxu1 %vm4321_vm0, %v4320_v1 }
 0xcc4   :  { %3632 = vmatprep.subr.bf16.mxu1 %v4320_v1 }
 0xcc7   :  { %3633 = vmatpush3.bf16.msra.mxu1 %v4518_v25 }
 0xcc8   :  { %3646 = vmatprep.subr.bf16.mxu1 %v4320_v1 }
 0xd95   :  { %v631_v33 = vpop.f32.mrb[12].mxu1 }
 0xd96   :  { %v637_v34 = vadd.f32 %v631_v33, %v589_v32  ;;  %v3620_v35 = vpop.f32.mrb[13].mxu1 }
 0xd97   :  { %v634_v36 = vpop.f32.mrb[14].mxu1 }
 0xd98   :  { %3987 = vtanh.f32 %v637_v34  ;;  %v3621_v37 = vpop.f32.mrb[15].mxu1  ;;  %v3376_v39 = vmul.f32 -1.442695, %v637_v34 }
 0xd9a   :  { %3989 = vpow2.f32 %v3376_v39  ;;  %v826_v39 = vld [vmem:[#allocation3 + $0xe] sm:$0x3] }
 0xda2   :  { %v3988_v38 = vpop.eup %3987 }
 0xda3   :  { %647 = vrot.lane.b32.xlu0 %v3988_v38, %s4322_s4 }
 0xda4   :  { %v3990_v40 = vpop.eup %3989 }
 0xda5   :  { %v641_v41 = vadd.f32 1.0, %v3990_v40 }
 0xda7   :  { %3991 = vrcp.f32 %v641_v41 }
 0xdb1   :  { %v3992_v43 = vpop.eup %3991 }
 0xdb2   :  { %v645_v47 = vmul.f32 %v3992_v43, %v576_v26 }
 0xe15   :  { %v648_v44 = vpop.permute.xlu0 %647 }
 0xe16   :  { %v650_v46 = vmul.f32 %v3992_v43, %v648_v44 }
 0xe18   :  { %652 = vrot.lane.b32.xlu1 %v650_v46, %s4323_s26 }
 0xe8a   :  { %v653_v48 = vpop.permute.xlu1 %652 }
 0xe8b   :  { %v655_v49 = vadd.f32 %v653_v48, %v645_v47 }
 0xe8d   :  { %3993 = vtanh.f32 %v655_v49 }
 0xe97   :  { %v3994_v50 = vpop.eup %3993 }
 0xe98   :  { %658 = vrot.lane.b32.xlu0 %v3994_v50, %s4322_s4 }
 0xf0a   :  { %v659_v51 = vpop.permute.xlu0 %658 }
 0xf0b   :  { %v4620_v52 = vmul.f32 %v3992_v43, %v659_v51 }
 0xf0d   :  { %v669_v53 = vpack.c.bf16 %v4620_v52, %v4620_v52 }
 0xf0f   :  { %671 = vrot.lane.b32.xlu1 %v669_v53, %s4323_s26 }
 0xf81   :  { %v672_v54 = vpop.permute.xlu1 %671 }
 0xf82   :  { %3627 = vmatmul.mubr.msk.bf16.vlgmr.msra.gmra.mrb[12].mxu0 %vm134_vm3, %v672_v54 }
 0xf83   :  { %3639 = vmatpush3.bf16.msra.mxu0 %v4508_v22  ;;  %3642 = vmatprep.mubr.msk.bf16.mxu0 %vm4321_vm0, %v4320_v1 }
 0xf84   :  { %3640 = vmatprep.subr.bf16.mxu0 %v4320_v1 }
 0xf87   :  { %3641 = vmatpush3.bf16.msra.mxu0 %v4518_v25 }
 0xf88   :  { %3654 = vmatprep.subr.bf16.mxu0 %v4320_v1 }
0x1055   :  { %v710_v56 = vpop.f32.mrb[12].mxu0 }
0x1056   :  { %v716_v57 = vadd.f32 %v710_v56, %v668_v55  ;;  %v3628_v58 = vpop.f32.mrb[13].mxu0 }
0x1057   :  { %v713_v59 = vpop.f32.mrb[14].mxu0 }
0x1058   :  { %3995 = vtanh.f32 %v716_v57  ;;  %v3629_v60 = vpop.f32.mrb[15].mxu0  ;;  %v3378_v22 = vmul.f32 -1.442695, %v716_v57  ;;  %v915_v59 = vld [vmem:[%s5398_s6 + $0x8] sm:$0xff] }
0x1059   :  { %v916_v60 = vld [vmem:[%s5398_s6 + $0x10] sm:$0xff] }
0x105a   :  { %3997 = vpow2.f32 %v3378_v22 }
0x1062   :  { %v3996_v61 = vpop.eup %3995 }
0x1063   :  { %726 = vrot.lane.b32.xlu0 %v3996_v61, %s4322_s4 }
0x1064   :  { %v3998_v62 = vpop.eup %3997 }
0x1065   :  { %v720_v63 = vadd.f32 1.0, %v3998_v62 }
0x1067   :  { %3999 = vrcp.f32 %v720_v63  ;;  %v906_v63 = vld [vmem:[%s5399_s7] sm:$0xff] }
0x1071   :  { %v4000_v2 = vpop.eup %3999 }
0x1072   :  { %v724_v5 = vmul.f32 %v4000_v2, %v655_v49 }
0x10d5   :  { %v727_v3 = vpop.permute.xlu0 %726 }
0x10d6   :  { %v729_v25 = vmul.f32 %v4000_v2, %v727_v3  ;;  %v908_v3 = vld [vmem:[%s5399_s7 + $0x10] sm:$0xff] }
0x10d8   :  { %731 = vrot.lane.b32.xlu1 %v729_v25, %s4323_s26 }
0x114a   :  { %v732_v6 = vpop.permute.xlu1 %731 }
0x114b   :  { %v734_v7 = vadd.f32 %v732_v6, %v724_v5  ;;  %v909_v6 = vld [vmem:[%s5399_s7 + $0x18] sm:$0xff] }
0x114d   :  { %4001 = vtanh.f32 %v734_v7 }
0x1157   :  { %v4002_v8 = vpop.eup %4001 }
0x1158   :  { %737 = vrot.lane.b32.xlu0 %v4002_v8, %s4322_s4 }
0x11ca   :  { %v738_v9 = vpop.permute.xlu0 %737 }
0x11cb   :  { %v4635_v10 = vmul.f32 %v4000_v2, %v738_v9  ;;  %v907_v2 = vld [vmem:[%s5399_s7 + $0x8] sm:$0xff] }
0x11cc   :  { %v4693_v5 = vpack.c.bf16 %v907_v2, %v906_v63 }
0x11cd   :  { %v748_v12 = vpack.c.bf16 %v4635_v10, %v4635_v10 }
0x11cf   :  { %750 = vrot.lane.b32.xlu1 %v748_v12, %s4323_s26 }
0x1241   :  { %v751_v13 = vpop.permute.xlu1 %750 }
0x1242   :  { %3635 = vmatmul.mubr.msk.bf16.vlgmr.msra.gmra.mrb[16].mxu1 %vm134_vm3, %v751_v13 }
0x1243   :  { %3650 = vmatprep.mubr.msk.bf16.mxu1 %vm4321_vm0, %v4320_v1 }
0x1315   :  { %v789_v15 = vpop.f32.mrb[16].mxu1 }
0x1316   :  { %v795_v16 = vadd.f32 %v789_v15, %v747_v14  ;;  %v3636_v17 = vpop.f32.mrb[17].mxu1 }
0x1317   :  { %v792_v18 = vpop.f32.mrb[18].mxu1 }
0x1318   :  { %4003 = vtanh.f32 %v795_v16  ;;  %v3637_v19 = vpop.f32.mrb[19].mxu1  ;;  %v3380_v23 = vmul.f32 -1.442695, %v795_v16 }
0x131a   :  { %4005 = vpow2.f32 %v3380_v23  ;;  %v3383_v23 = vld [vmem:[#allocation9] ss:$0 sm:$0xff] }
0x1322   :  { %v4004_v20 = vpop.eup %4003 }
0x1323   :  { %805 = vrot.lane.b32.xlu0 %v4004_v20, %s4322_s4 }
0x1324   :  { %v4006_v24 = vpop.eup %4005 }
0x1325   :  { %v799_v26 = vadd.f32 1.0, %v4006_v24 }
0x1327   :  { %4007 = vrcp.f32 %v799_v26 }
0x1331   :  { %v4008_v27 = vpop.eup %4007 }
0x1332   :  { %v803_v31 = vmul.f32 %v4008_v27, %v734_v7  ;;  %v4700_v7 = vpack.c.bf16 %v909_v6, %v908_v3 }
0x1395   :  { %v806_v28 = vpop.permute.xlu0 %805 }
0x1396   :  { %v808_v30 = vmul.f32 %v4008_v27, %v806_v28 }
0x1398   :  { %810 = vrot.lane.b32.xlu1 %v808_v30, %s4323_s26 }
0x140a   :  { %v811_v32 = vpop.permute.xlu1 %810 }
0x140b   :  { %v813_v33 = vadd.f32 %v811_v32, %v803_v31 }
0x140d   :  { %4009 = vtanh.f32 %v813_v33 }
0x1417   :  { %v4010_v34 = vpop.eup %4009 }
0x1418   :  { %816 = vrot.lane.b32.xlu0 %v4010_v34, %s4322_s4 }
0x148a   :  { %v817_v35 = vpop.permute.xlu0 %816 }
0x148b   :  { %v819_v36 = vmul.f32 %v4008_v27, %v817_v35 }
0x148d   :  { %v827_v37 = vpack.c.bf16 %v819_v36, %v819_v36 }
0x148f   :  { %829 = vrot.lane.b32.xlu1 %v827_v37, %s4323_s26 }
0x1501   :  { %v830_v38 = vpop.permute.xlu1 %829 }
0x1502   :  { %3643 = vmatmul.mubr.msk.bf16.vlgmr.msra.gmra.mrb[16].mxu0 %vm134_vm3, %v830_v38 }
0x1503   :  { %3658 = vmatprep.mubr.msk.bf16.mxu0 %vm4321_vm0, %v4320_v1  ;;  %3655 = vmatpush3.bf16.msra.mxu0 %v4693_v5 }
0x1504   :  { %3656 = vmatprep.subr.bf16.mxu0 %v4320_v1 }
0x1507   :  { %3657 = vmatpush3.bf16.msra.mxu0 %v4700_v7 }
0x1508   :  { %3670 = vmatprep.subr.bf16.mxu0 %v4320_v1 }
0x150a   :  { %3659 = vmatmul.mubr.bf16.vlgmr.msra.gmra.mrb[20].mxu0 %v4319_v0 }
0x150b   :  { %3671 = vmatpush3.bf16.msra.mxu0 %v4693_v5  ;;  %3674 = vmatprep.mubr.msk.bf16.mxu0 %vm4321_vm0, %v4320_v1 }
0x150c   :  { %3672 = vmatprep.subr.bf16.mxu0 %v4320_v1 }
0x150f   :  { %3673 = vmatpush3.bf16.msra.mxu0 %v4700_v7 }
0x1510   :  { %3686 = vmatprep.subr.bf16.mxu0 %v4320_v1 }
0x15d5   :  { %v868_v40 = vpop.f32.mrb[16].mxu0 }
0x15d6   :  { %v874_v41 = vadd.f32 %v868_v40, %v826_v39  ;;  %v3644_v43 = vpop.f32.mrb[17].mxu0 }
0x15d7   :  { %v871_v44 = vpop.f32.mrb[18].mxu0 }
0x15d8   :  { %4011 = vtanh.f32 %v874_v41  ;;  %v3645_v46 = vpop.f32.mrb[19].mxu0  ;;  %v3382_v48 = vmul.f32 -1.442695, %v874_v41 }
0x15da   :  { %4013 = vpow2.f32 %v3382_v48 }
0x15dd   :  { %v1040_v17 = vpop.f32.mrb[20].mxu0 }
0x15de   :  { %v3660_v18 = vpop.f32.mrb[21].mxu0 }
0x15df   :  { %v1043_v19 = vpop.f32.mrb[22].mxu0 }
0x15e0   :  { %v3661_v20 = vpop.f32.mrb[23].mxu0 }
0x15e2   :  { %v4012_v47 = vpop.eup %4011 }
0x15e3   :  { %884 = vrot.lane.b32.xlu0 %v4012_v47, %s4322_s4 }
0x15e4   :  { %v4014_v49 = vpop.eup %4013 }
0x15e5   :  { %v878_v50 = vadd.f32 1.0, %v4014_v49 }
0x15e7   :  { %4015 = vrcp.f32 %v878_v50 }
0x15f1   :  { %v4016_v51 = vpop.eup %4015 }
0x15f2   :  { %v882_v55 = vmul.f32 %v4016_v51, %v813_v33 }
0x1655   :  { %v885_v53 = vpop.permute.xlu0 %884 }
0x1656   :  { %v887_v54 = vmul.f32 %v4016_v51, %v885_v53 }
0x1658   :  { %889 = vrot.lane.b32.xlu1 %v887_v54, %s4323_s26 }
0x165c   :  { %345 = vrot.lane.b32.xlu1 %v4560_v21, %s4323_s26 }
0x1660   :  { %505 = vrot.lane.b32.xlu1 %v4590_v4, %s4323_s26 }
0x1664   :  { %663 = vrot.lane.b32.xlu1 %v4620_v52, %s4323_s26  ;;  %v914_v52 = vld [vmem:[%s5398_s6] sm:$0xff] }
0x1665   :  { %v919_v61 = vpack.c.bf16 %v915_v59, %v914_v52 }
0x1667   :  { %3647 = vmatpush3.bf16.msra.mxu1 %v919_v61 }
0x1668   :  { %821 = vrot.lane.b32.xlu1 %v819_v36, %s4323_s26  ;;  %3648 = vmatprep.subr.bf16.mxu1 %v4320_v1 }
0x16ca   :  { %v890_v56 = vpop.permute.xlu1 %889 }
0x16cb   :  { %v892_v57 = vadd.f32 %v890_v56, %v882_v55 }
0x16cd   :  { %4017 = vtanh.f32 %v892_v57 }
0x16ce   :  { %v346_v58 = vpop.permute.xlu1 %345 }
0x16cf   :  { %349 = vst.msk [vmem:[#allocation4] sm:$0x3] %vm348_vm6, %v346_v58 }
0x16d0   :  { %351 = vst.msk [vmem:[#allocation4 + $0xe] sm:$0x3] %vm350_vm7, %v346_v58 }
0x16d2   :  { %v506_v21 = vpop.permute.xlu1 %505 }
0x16d3   :  { %508 = vst.msk [vmem:[#allocation4 + $0x4] sm:$0x3] %vm348_vm6, %v506_v21 }
0x16d4   :  { %509 = vst.msk [vmem:[#allocation4 + $0xa] sm:$0x3] %vm350_vm7, %v506_v21 }
0x16d6   :  { %v664_v22 = vpop.permute.xlu1 %663 }
0x16d7   :  { %v4018_v4 = vpop.eup %4017 }
0x16d8   :  { %895 = vrot.lane.b32.xlu0 %v4018_v4, %s4322_s4 }
0x16da   :  { %v822_v9 = vpop.permute.xlu1 %821 }
0x16dc   :  { %426 = vrot.lane.b32.xlu0 %v4575_v45, %s4323_s26  ;;  %v917_v45 = vld [vmem:[%s5398_s6 + $0x18] sm:$0xff] }
0x16e0   :  { %584 = vrot.lane.b32.xlu0 %v4605_v29, %s4323_s26  ;;  %v920_v29 = vpack.c.bf16 %v917_v45, %v916_v60 }
0x16e2   :  { %3649 = vmatpush3.bf16.msra.mxu1 %v920_v29 }
0x16e3   :  { %3662 = vmatprep.subr.bf16.mxu1 %v4320_v1 }
0x16e4   :  { %742 = vrot.lane.b32.xlu0 %v4635_v10, %s4323_s26 }
0x174a   :  { %v896_v62 = vpop.permute.xlu0 %895 }
0x174b   :  { %v898_v25 = vmul.f32 %v4016_v51, %v896_v62 }
0x174d   :  { %900 = vrot.lane.b32.xlu0 %v898_v25, %s4323_s26 }
0x174e   :  { %v427_v8 = vpop.permute.xlu0 %426 }
0x174f   :  { %429 = vst.msk [vmem:[#allocation4 + $0x2] sm:$0x3] %vm348_vm6, %v427_v8 }
0x1750   :  { %430 = vst.msk [vmem:[#allocation4 + $0xc] sm:$0x3] %vm350_vm7, %v427_v8  ;;  %825 = vst.msk [vmem:[#allocation4 + $0x2] sm:$0x3] %vm350_vm7, %v822_v9 }
0x1751   :  { %824 = vst.msk [vmem:[#allocation4 + $0xc] sm:$0x3] %vm348_vm6, %v822_v9 }
0x1752   :  { %v585_v10 = vpop.permute.xlu0 %584 }
0x1753   :  { %587 = vst.msk [vmem:[#allocation4 + $0x6] sm:$0x3] %vm348_vm6, %v585_v10 }
0x1754   :  { %588 = vst.msk [vmem:[#allocation4 + $0x8] sm:$0x3] %vm350_vm7, %v585_v10  ;;  %667 = vst.msk [vmem:[#allocation4 + $0x6] sm:$0x3] %vm350_vm7, %v664_v22 }
0x1755   :  { %666 = vst.msk [vmem:[#allocation4 + $0x8] sm:$0x3] %vm348_vm6, %v664_v22 }
0x1756   :  { %v743_v12 = vpop.permute.xlu0 %742 }
0x1757   :  { %745 = vst.msk [vmem:[#allocation4 + $0xa] sm:$0x3] %vm348_vm6, %v743_v12 }
0x1758   :  { %746 = vst.msk [vmem:[#allocation4 + $0x4] sm:$0x3] %vm350_vm7, %v743_v12 }
0x17bf   :  { %v901_v13 = vpop.permute.xlu0 %900 }
0x17c0   :  { %903 = vst.msk [vmem:[#allocation4 + $0xe] sm:$0x3] %vm348_vm6, %v901_v13 }
0x17c1   :  { %904 = vst.msk [vmem:[#allocation4] sm:$0x3] %vm350_vm7, %v901_v13 }
0x17c7   :  { %v913_v15 = vld [vmem:[#allocation4 + $0x8] sm:$0xff] }
0x17c8   :  { %v912_v14 = vld [vmem:[#allocation4] sm:$0xff] }
0x17c9   :  { %v918_v16 = vpack.c.bf16 %v913_v15, %v912_v14 }
0x17cb   :  { %3651 = vmatmul.mubr.msk.bf16.vlgmr.msra.gmra.mrb[20].mxu1 %vm134_vm3, %v918_v16 }
0x17cc   :  { %3663 = vmatpush3.bf16.msra.mxu1 %v4693_v5  ;;  %3666 = vmatprep.mubr.msk.bf16.mxu1 %vm4321_vm0, %v4320_v1 }
0x17cd   :  { %3664 = vmatprep.subr.bf16.mxu1 %v4320_v1 }
0x17d0   :  { %3665 = vmatpush3.bf16.msra.mxu1 %v4700_v7 }
0x17d1   :  { %3678 = vmatprep.subr.bf16.mxu1 %v4320_v1 }
0x189e   :  { %v964_v24 = vpop.f32.mrb[20].mxu1 }
0x189f   :  { %v965_v26 = vadd.f32 %v3383_v23, %v964_v24  ;;  %v3652_v27 = vpop.f32.mrb[21].mxu1 }
0x18a0   :  { %v967_v28 = vpop.f32.mrb[22].mxu1 }
0x18a1   :  { %971 = vst [vmem:[#allocation2] sm:$0xff] %v965_v26  ;;  %v968_v30 = vadd.f32 %v3383_v23, %v967_v28  ;;  %v3653_v31 = vpop.f32.mrb[23].mxu1 }
0x18a3   :  { %972 = vst [vmem:[#allocation2 + $0x8] sm:$0xff] %v968_v30 }
0x18a8   :  { %v973_v32 = vld [vmem:[#allocation2] sm:$0x3]  ;;  %v977_v33 = vld [vmem:[#allocation2 + $0x2] sm:$0x3]  ;;  %v981_v34 = vld [vmem:[#allocation2 + $0x4] sm:$0x3] }
0x18a9   :  { %v985_v35 = vld [vmem:[#allocation2 + $0x6] sm:$0x3]  ;;  %v994_v37 = vld [vmem:[#allocation2 + $0x4] sm:$0x3]  ;;  %v998_v54 = vld [vmem:[#allocation2 + $0x2] sm:$0x3] }
0x18aa   :  { %v990_v36 = vld [vmem:[#allocation2 + $0x6] sm:$0x3]  ;;  %v974_v38 = vld [vmem:[#allocation2 + $0xe] sm:$0x3]  ;;  %v978_v39 = vld [vmem:[#allocation2 + $0xc] sm:$0x3] }
0x18ab   :  { %v982_v40 = vld [vmem:[#allocation2 + $0xa] sm:$0x3]  ;;  %v975_v41 = vsel %vm4537_vm5, %v973_v32, %v974_v38  ;;  %v979_v43 = vsel %vm4537_vm5, %v977_v33, %v978_v39  ;;  %v986_v46 = vld [vmem:[#allocation2 + $0x8] sm:$0x3]  ;;  %v997_v53 = vld [vmem:[#allocation2 + $0xc] sm:$0x3] }
0x18ac   :  { %v983_v44 = vsel %vm4537_vm5, %v981_v34, %v982_v40  ;;  %v989_v47 = vld [vmem:[#allocation2 + $0x8] sm:$0x3]  ;;  %v993_v48 = vld [vmem:[#allocation2 + $0xa] sm:$0x3]  ;;  %976 = vst [vmem:[#allocation3] sm:$0x3] %v975_v41  ;;  %v987_v49 = vsel %vm4537_vm5, %v985_v35, %v986_v46  ;;  %v999_v56 = vsel %vm4537_vm5, %v997_v53, %v998_v54 }
0x18ad   :  { %980 = vst [vmem:[#allocation3 + $0x2] sm:$0x3] %v979_v43  ;;  %984 = vst [vmem:[#allocation3 + $0x4] sm:$0x3] %v983_v44  ;;  %v991_v50 = vsel %vm4537_vm5, %v989_v47, %v990_v36  ;;  %v995_v51 = vsel %vm4537_vm5, %v993_v48, %v994_v37  ;;  %v1001_v55 = vld [vmem:[#allocation2 + $0xe] sm:$0x3] }
0x18ae   :  { %988 = vst [vmem:[#allocation3 + $0x6] sm:$0x3] %v987_v49  ;;  %992 = vst [vmem:[#allocation3 + $0x8] sm:$0x3] %v991_v50  ;;  %v1002_v57 = vld [vmem:[#allocation2] sm:$0x3] }
0x18af   :  { %996 = vst [vmem:[#allocation3 + $0xa] sm:$0x3] %v995_v51  ;;  %1000 = vst [vmem:[#allocation3 + $0xc] sm:$0x3] %v999_v56  ;;  %v1003_v58 = vsel %vm4537_vm5, %v1001_v55, %v1002_v57 }
0x18b0   :  { %1004 = vst [vmem:[#allocation3 + $0xe] sm:$0x3] %v1003_v58 }
0x18b3   :  { %v1005_v21 = vld [vmem:[#allocation3] sm:$0x3] }
0x18b4   :  { %v1046_v4 = vadd.f32 %v1040_v17, %v1005_v21  ;;  %v1077_v9 = vld [vmem:[#allocation3 + $0x2] sm:$0x3]  ;;  %v1156_v35 = vld [vmem:[#allocation3 + $0x4] sm:$0x3] }
0x18b5   :  { %v1235_v21 = vld [vmem:[#allocation3 + $0x6] sm:$0x3] }
0x18b6   :  { %4019 = vtanh.f32 %v1046_v4  ;;  %v3385_v59 = vmul.f32 -1.442695, %v1046_v4 }
0x18b8   :  { %4021 = vpow2.f32 %v3385_v59 }
0x18c0   :  { %v4020_v52 = vpop.eup %4019 }
0x18c1   :  { %1056 = vrot.lane.b32.xlu1 %v4020_v52, %s4322_s4 }
0x18c2   :  { %v4022_v60 = vpop.eup %4021 }
0x18c3   :  { %v1050_v61 = vadd.f32 1.0, %v4022_v60 }
0x18c5   :  { %4023 = vrcp.f32 %v1050_v61 }
0x18cf   :  { %v4024_v45 = vpop.eup %4023 }
0x18d0   :  { %v1054_v62 = vmul.f32 0.0, %v4024_v45 }
0x1933   :  { %v1057_v29 = vpop.permute.xlu1 %1056 }
0x1934   :  { %v1059_v22 = vmul.f32 %v4024_v45, %v1057_v29 }
0x1936   :  { %1061 = vrot.lane.b32.xlu0 %v1059_v22, %s4323_s26 }
0x19a8   :  { %v1062_v42 = vpop.permute.xlu0 %1061 }
0x19a9   :  { %v1064_v63 = vadd.f32 %v1062_v42, %v1054_v62 }
0x19ab   :  { %4025 = vtanh.f32 %v1064_v63 }
0x19b5   :  { %v4026_v2 = vpop.eup %4025 }
0x19b6   :  { %1067 = vrot.lane.b32.xlu1 %v4026_v2, %s4322_s4 }
0x1a28   :  { %v1068_v3 = vpop.permute.xlu1 %1067 }
0x1a29   :  { %v4750_v25 = vmul.f32 %v4024_v45, %v1068_v3 }
0x1a2b   :  { %v1078_v6 = vpack.c.bf16 %v4750_v25, %v4750_v25 }
0x1a2d   :  { %1080 = vrot.lane.b32.xlu0 %v1078_v6, %s4323_s26 }
0x1a9f   :  { %v1081_v8 = vpop.permute.xlu0 %1080 }
0x1aa0   :  { %3667 = vmatmul.mubr.msk.bf16.vlgmr.msra.gmra.mrb[24].mxu1 %vm134_vm3, %v1081_v8 }
0x1aa1   :  { %3679 = vmatpush3.bf16.msra.mxu1 %v4693_v5  ;;  %3682 = vmatprep.mubr.msk.bf16.mxu1 %vm4321_vm0, %v4320_v1 }
0x1aa2   :  { %3680 = vmatprep.subr.bf16.mxu1 %v4320_v1 }
0x1aa5   :  { %3681 = vmatpush3.bf16.msra.mxu1 %v4700_v7 }
0x1aa6   :  { %3694 = vmatprep.subr.bf16.mxu1 %v4320_v1 }
0x1b73   :  { %v1119_v10 = vpop.f32.mrb[24].mxu1 }
0x1b74   :  { %v1125_v12 = vadd.f32 %v1119_v10, %v1077_v9  ;;  %v3668_v13 = vpop.f32.mrb[25].mxu1 }
0x1b75   :  { %v1122_v14 = vpop.f32.mrb[26].mxu1 }
0x1b76   :  { %4027 = vtanh.f32 %v1125_v12  ;;  %v3669_v15 = vpop.f32.mrb[27].mxu1  ;;  %v3387_v17 = vmul.f32 -1.442695, %v1125_v12 }
0x1b77   :  { %v1314_v15 = vld [vmem:[#allocation3 + $0x8] sm:$0x3] }
0x1b78   :  { %4029 = vpow2.f32 %v3387_v17 }
0x1b80   :  { %v4028_v16 = vpop.eup %4027 }
0x1b81   :  { %1135 = vrot.lane.b32.xlu1 %v4028_v16, %s4322_s4 }
0x1b82   :  { %v4030_v18 = vpop.eup %4029 }
0x1b83   :  { %v1129_v19 = vadd.f32 1.0, %v4030_v18 }
0x1b85   :  { %4031 = vrcp.f32 %v1129_v19 }
0x1b8f   :  { %v4032_v20 = vpop.eup %4031 }
0x1b90   :  { %v1133_v26 = vmul.f32 %v4032_v20, %v1064_v63 }
0x1bf3   :  { %v1136_v23 = vpop.permute.xlu1 %1135 }
0x1bf4   :  { %v1138_v24 = vmul.f32 %v4032_v20, %v1136_v23 }
0x1bf6   :  { %1140 = vrot.lane.b32.xlu0 %v1138_v24, %s4323_s26 }
0x1c68   :  { %v1141_v27 = vpop.permute.xlu0 %1140 }
0x1c69   :  { %v1143_v28 = vadd.f32 %v1141_v27, %v1133_v26 }
0x1c6b   :  { %4033 = vtanh.f32 %v1143_v28 }
0x1c75   :  { %v4034_v30 = vpop.eup %4033 }
0x1c76   :  { %1146 = vrot.lane.b32.xlu1 %v4034_v30, %s4322_s4 }
0x1ce8   :  { %v1147_v31 = vpop.permute.xlu1 %1146 }
0x1ce9   :  { %v4765_v32 = vmul.f32 %v4032_v20, %v1147_v31 }
0x1ceb   :  { %v1157_v33 = vpack.c.bf16 %v4765_v32, %v4765_v32 }
0x1ced   :  { %1159 = vrot.lane.b32.xlu0 %v1157_v33, %s4323_s26 }
0x1d5f   :  { %v1160_v34 = vpop.permute.xlu0 %1159 }
0x1d60   :  { %3675 = vmatmul.mubr.msk.bf16.vlgmr.msra.gmra.mrb[24].mxu0 %vm134_vm3, %v1160_v34 }
0x1d61   :  { %3687 = vmatpush3.bf16.msra.mxu0 %v4693_v5  ;;  %3690 = vmatprep.mubr.msk.bf16.mxu0 %vm4321_vm0, %v4320_v1 }
0x1d62   :  { %3688 = vmatprep.subr.bf16.mxu0 %v4320_v1 }
0x1d65   :  { %3689 = vmatpush3.bf16.msra.mxu0 %v4700_v7 }
0x1d66   :  { %3702 = vmatprep.subr.bf16.mxu0 %v4320_v1 }
0x1e33   :  { %v1198_v36 = vpop.f32.mrb[24].mxu0 }
0x1e34   :  { %v1204_v37 = vadd.f32 %v1198_v36, %v1156_v35  ;;  %v3676_v38 = vpop.f32.mrb[25].mxu0 }
0x1e35   :  { %v1201_v39 = vpop.f32.mrb[26].mxu0 }
0x1e36   :  { %4035 = vtanh.f32 %v1204_v37  ;;  %v3677_v40 = vpop.f32.mrb[27].mxu0  ;;  %v3389_v43 = vmul.f32 -1.442695, %v1204_v37 }
0x1e38   :  { %4037 = vpow2.f32 %v3389_v43 }
0x1e40   :  { %v4036_v41 = vpop.eup %4035 }
0x1e41   :  { %1214 = vrot.lane.b32.xlu1 %v4036_v41, %s4322_s4  ;;  %v1393_v41 = vld [vmem:[#allocation3 + $0xa] sm:$0x3] }
0x1e42   :  { %v4038_v44 = vpop.eup %4037 }
0x1e43   :  { %v1208_v46 = vadd.f32 1.0, %v4038_v44 }
0x1e45   :  { %4039 = vrcp.f32 %v1208_v46 }
0x1e4f   :  { %v4040_v47 = vpop.eup %4039 }
0x1e50   :  { %v1212_v50 = vmul.f32 %v4040_v47, %v1143_v28 }
0x1eb3   :  { %v1215_v48 = vpop.permute.xlu1 %1214 }
0x1eb4   :  { %v1217_v49 = vmul.f32 %v4040_v47, %v1215_v48 }
0x1eb6   :  { %1219 = vrot.lane.b32.xlu0 %v1217_v49, %s4323_s26 }
0x1f28   :  { %v1220_v51 = vpop.permute.xlu0 %1219 }
0x1f29   :  { %v1222_v53 = vadd.f32 %v1220_v51, %v1212_v50 }
0x1f2b   :  { %4041 = vtanh.f32 %v1222_v53 }
0x1f35   :  { %v4042_v54 = vpop.eup %4041 }
0x1f36   :  { %1225 = vrot.lane.b32.xlu1 %v4042_v54, %s4322_s4 }
0x1fa8   :  { %v1226_v55 = vpop.permute.xlu1 %1225 }
0x1fa9   :  { %v4780_v56 = vmul.f32 %v4040_v47, %v1226_v55 }
0x1fab   :  { %v1236_v57 = vpack.c.bf16 %v4780_v56, %v4780_v56 }
0x1fad   :  { %1238 = vrot.lane.b32.xlu0 %v1236_v57, %s4323_s26 }
0x201f   :  { %v1239_v58 = vpop.permute.xlu0 %1238 }
0x2020   :  { %3683 = vmatmul.mubr.msk.bf16.vlgmr.msra.gmra.mrb[28].mxu1 %vm134_vm3, %v1239_v58 }
0x2021   :  { %3695 = vmatpush3.bf16.msra.mxu1 %v4693_v5  ;;  %3698 = vmatprep.mubr.msk.bf16.mxu1 %vm4321_vm0, %v4320_v1 }
0x2022   :  { %3696 = vmatprep.subr.bf16.mxu1 %v4320_v1 }
0x2025   :  { %3697 = vmatpush3.bf16.msra.mxu1 %v4700_v7 }
0x2026   :  { %3710 = vmatprep.subr.bf16.mxu1 %v4320_v1 }
0x20f3   :  { %v1277_v4 = vpop.f32.mrb[28].mxu1 }
0x20f4   :  { %v1283_v52 = vadd.f32 %v1277_v4, %v1235_v21  ;;  %v3684_v59 = vpop.f32.mrb[29].mxu1 }
0x20f5   :  { %v1280_v60 = vpop.f32.mrb[30].mxu1 }
0x20f6   :  { %4043 = vtanh.f32 %v1283_v52  ;;  %v3685_v61 = vpop.f32.mrb[31].mxu1  ;;  %v3391_v29 = vmul.f32 -1.442695, %v1283_v52 }
0x20f7   :  { %v1472_v61 = vld [vmem:[#allocation3 + $0xc] sm:$0x3] }
0x20f8   :  { %4045 = vpow2.f32 %v3391_v29 }
0x2100   :  { %v4044_v45 = vpop.eup %4043 }
0x2101   :  { %1293 = vrot.lane.b32.xlu1 %v4044_v45, %s4322_s4 }
0x2102   :  { %v4046_v22 = vpop.eup %4045 }
0x2103   :  { %v1287_v62 = vadd.f32 1.0, %v4046_v22 }
0x2105   :  { %4047 = vrcp.f32 %v1287_v62 }
0x210f   :  { %v4048_v42 = vpop.eup %4047 }
0x2110   :  { %v1291_v3 = vmul.f32 %v4048_v42, %v1222_v53 }
0x2173   :  { %v1294_v63 = vpop.permute.xlu1 %1293 }
0x2174   :  { %v1296_v2 = vmul.f32 %v4048_v42, %v1294_v63 }
0x2176   :  { %1298 = vrot.lane.b32.xlu0 %v1296_v2, %s4323_s26 }
0x21e8   :  { %v1299_v6 = vpop.permute.xlu0 %1298 }
0x21e9   :  { %v1301_v8 = vadd.f32 %v1299_v6, %v1291_v3 }
0x21eb   :  { %4049 = vtanh.f32 %v1301_v8 }
0x21f5   :  { %v4050_v9 = vpop.eup %4049 }
0x21f6   :  { %1304 = vrot.lane.b32.xlu1 %v4050_v9, %s4322_s4 }
0x2268   :  { %v1305_v10 = vpop.permute.xlu1 %1304 }
0x2269   :  { %v4795_v12 = vmul.f32 %v4048_v42, %v1305_v10 }
0x226b   :  { %v1315_v13 = vpack.c.bf16 %v4795_v12, %v4795_v12 }
0x226d   :  { %1317 = vrot.lane.b32.xlu0 %v1315_v13, %s4323_s26 }
0x22df   :  { %v1318_v14 = vpop.permute.xlu0 %1317 }
0x22e0   :  { %3691 = vmatmul.mubr.msk.bf16.vlgmr.msra.gmra.mrb[28].mxu0 %vm134_vm3, %v1318_v14 }
0x22e1   :  { %3703 = vmatpush3.bf16.msra.mxu0 %v4693_v5  ;;  %3706 = vmatprep.mubr.msk.bf16.mxu0 %vm4321_vm0, %v4320_v1 }
0x22e2   :  { %3704 = vmatprep.subr.bf16.mxu0 %v4320_v1 }
0x22e5   :  { %3705 = vmatpush3.bf16.msra.mxu0 %v4700_v7 }
0x22e6   :  { %3718 = vmatprep.subr.bf16.mxu0 %v4320_v1 }
0x23b3   :  { %v1356_v16 = vpop.f32.mrb[28].mxu0 }
0x23b4   :  { %v1362_v17 = vadd.f32 %v1356_v16, %v1314_v15  ;;  %v3692_v18 = vpop.f32.mrb[29].mxu0 }
0x23b5   :  { %v1359_v19 = vpop.f32.mrb[30].mxu0 }
0x23b6   :  { %4051 = vtanh.f32 %v1362_v17  ;;  %v3693_v20 = vpop.f32.mrb[31].mxu0  ;;  %v3393_v24 = vmul.f32 -1.442695, %v1362_v17 }
0x23b8   :  { %4053 = vpow2.f32 %v3393_v24 }
0x23c0   :  { %v4052_v23 = vpop.eup %4051 }
0x23c1   :  { %1372 = vrot.lane.b32.xlu1 %v4052_v23, %s4322_s4  ;;  %v1551_v23 = vld [vmem:[#allocation3 + $0xe] sm:$0x3] }
0x23c2   :  { %v4054_v26 = vpop.eup %4053 }
0x23c3   :  { %v1366_v27 = vadd.f32 1.0, %v4054_v26 }
0x23c5   :  { %4055 = vrcp.f32 %v1366_v27 }
0x23cf   :  { %v4056_v28 = vpop.eup %4055 }
0x23d0   :  { %v1370_v33 = vmul.f32 %v4056_v28, %v1301_v8 }
0x2433   :  { %v1373_v30 = vpop.permute.xlu1 %1372 }
0x2434   :  { %v1375_v31 = vmul.f32 %v4056_v28, %v1373_v30 }
0x2436   :  { %1377 = vrot.lane.b32.xlu0 %v1375_v31, %s4323_s26 }
0x24a8   :  { %v1378_v34 = vpop.permute.xlu0 %1377 }
0x24a9   :  { %v1380_v35 = vadd.f32 %v1378_v34, %v1370_v33 }
0x24ab   :  { %4057 = vtanh.f32 %v1380_v35 }
0x24b5   :  { %v4058_v36 = vpop.eup %4057 }
0x24b6   :  { %1383 = vrot.lane.b32.xlu1 %v4058_v36, %s4322_s4 }
0x2528   :  { %v1384_v37 = vpop.permute.xlu1 %1383 }
0x2529   :  { %v4810_v38 = vmul.f32 %v4056_v28, %v1384_v37 }
0x252b   :  { %v1394_v39 = vpack.c.bf16 %v4810_v38, %v4810_v38 }
0x252d   :  { %1396 = vrot.lane.b32.xlu0 %v1394_v39, %s4323_s26 }
0x259f   :  { %v1397_v40 = vpop.permute.xlu0 %1396 }
0x25a0   :  { %3699 = vmatmul.mubr.msk.bf16.vlgmr.msra.gmra.mrb[32].mxu1 %vm134_vm3, %v1397_v40 }
0x25a1   :  { %3711 = vmatpush3.bf16.msra.mxu1 %v4693_v5  ;;  %3714 = vmatprep.mubr.msk.bf16.mxu1 %vm4321_vm0, %v4320_v1 }
0x25a2   :  { %3712 = vmatprep.subr.bf16.mxu1 %v4320_v1 }
0x25a5   :  { %3713 = vmatpush3.bf16.msra.mxu1 %v4700_v7 }
0x25a6   :  { %3726 = vmatprep.subr.bf16.mxu1 %v4320_v1 }
0x2673   :  { %v1435_v43 = vpop.f32.mrb[32].mxu1 }
0x2674   :  { %v1441_v44 = vadd.f32 %v1435_v43, %v1393_v41  ;;  %v3700_v46 = vpop.f32.mrb[33].mxu1 }
0x2675   :  { %v1438_v47 = vpop.f32.mrb[34].mxu1 }
0x2676   :  { %4059 = vtanh.f32 %v1441_v44  ;;  %v3701_v48 = vpop.f32.mrb[35].mxu1  ;;  %v3395_v5 = vmul.f32 -1.442695, %v1441_v44  ;;  %v1632_v47 = vld [vmem:[%s5402_s10 + $0x10] sm:$0xff] }
0x2678   :  { %4061 = vpow2.f32 %v3395_v5 }
0x2680   :  { %v4060_v49 = vpop.eup %4059 }
0x2681   :  { %1451 = vrot.lane.b32.xlu1 %v4060_v49, %s4322_s4 }
0x2682   :  { %v4062_v50 = vpop.eup %4061 }
0x2683   :  { %v1445_v51 = vadd.f32 1.0, %v4062_v50 }
0x2685   :  { %4063 = vrcp.f32 %v1445_v51 }
0x268f   :  { %v4064_v53 = vpop.eup %4063 }
0x2690   :  { %v1449_v55 = vmul.f32 %v4064_v53, %v1380_v35 }
0x26f3   :  { %v1452_v54 = vpop.permute.xlu1 %1451 }
0x26f4   :  { %v1454_v7 = vmul.f32 %v4064_v53, %v1452_v54 }
0x26f6   :  { %1456 = vrot.lane.b32.xlu0 %v1454_v7, %s4323_s26 }
0x2768   :  { %v1457_v57 = vpop.permute.xlu0 %1456 }
0x2769   :  { %v1459_v58 = vadd.f32 %v1457_v57, %v1449_v55 }
0x276b   :  { %4065 = vtanh.f32 %v1459_v58 }
0x2775   :  { %v4066_v21 = vpop.eup %4065 }
0x2776   :  { %1462 = vrot.lane.b32.xlu1 %v4066_v21, %s4322_s4 }
0x27e8   :  { %v1463_v4 = vpop.permute.xlu1 %1462 }
0x27e9   :  { %v4825_v52 = vmul.f32 %v4064_v53, %v1463_v4 }
0x27eb   :  { %v1473_v59 = vpack.c.bf16 %v4825_v52, %v4825_v52 }
0x27ed   :  { %1475 = vrot.lane.b32.xlu0 %v1473_v59, %s4323_s26 }
0x285f   :  { %v1476_v60 = vpop.permute.xlu0 %1475 }
0x2860   :  { %3707 = vmatmul.mubr.msk.bf16.vlgmr.msra.gmra.mrb[32].mxu0 %vm134_vm3, %v1476_v60 }
0x2861   :  { %3722 = vmatprep.mubr.msk.bf16.mxu0 %vm4321_vm0, %v4320_v1 }
0x2933   :  { %v1514_v45 = vpop.f32.mrb[32].mxu0 }
0x2934   :  { %v1520_v29 = vadd.f32 %v1514_v45, %v1472_v61  ;;  %v3708_v22 = vpop.f32.mrb[33].mxu0 }
0x2935   :  { %v1517_v62 = vpop.f32.mrb[34].mxu0 }
0x2936   :  { %4067 = vtanh.f32 %v1520_v29  ;;  %v3709_v42 = vpop.f32.mrb[35].mxu0  ;;  %v3397_v2 = vmul.f32 -1.442695, %v1520_v29 }
0x2937   :  { %v4906_v42 = vld [vmem:[#allocation12] ss:$0 sm:$0xff] }
0x2938   :  { %4069 = vpow2.f32 %v3397_v2 }
0x2940   :  { %v4068_v63 = vpop.eup %4067 }
0x2941   :  { %1530 = vrot.lane.b32.xlu1 %v4068_v63, %s4322_s4 }
0x2942   :  { %v4070_v3 = vpop.eup %4069 }
0x2943   :  { %v1524_v6 = vadd.f32 1.0, %v4070_v3 }
0x2945   :  { %4071 = vrcp.f32 %v1524_v6 }
0x294f   :  { %v4072_v8 = vpop.eup %4071 }
0x2950   :  { %v1528_v13 = vmul.f32 %v4072_v8, %v1459_v58 }
0x29b3   :  { %v1531_v9 = vpop.permute.xlu1 %1530 }
0x29b4   :  { %v1533_v10 = vmul.f32 %v4072_v8, %v1531_v9 }
0x29b6   :  { %1535 = vrot.lane.b32.xlu0 %v1533_v10, %s4323_s26 }
0x2a28   :  { %v1536_v14 = vpop.permute.xlu0 %1535 }
0x2a29   :  { %v1538_v15 = vadd.f32 %v1536_v14, %v1528_v13 }
0x2a2b   :  { %4073 = vtanh.f32 %v1538_v15 }
0x2a35   :  { %v4074_v16 = vpop.eup %4073 }
0x2a36   :  { %1541 = vrot.lane.b32.xlu1 %v4074_v16, %s4322_s4 }
0x2aa8   :  { %v1542_v17 = vpop.permute.xlu1 %1541 }
0x2aa9   :  { %v1544_v18 = vmul.f32 %v4072_v8, %v1542_v17 }
0x2aab   :  { %v1552_v19 = vpack.c.bf16 %v1544_v18, %v1544_v18 }
0x2aad   :  { %1554 = vrot.lane.b32.xlu0 %v1552_v19, %s4323_s26 }
0x2b1f   :  { %v1555_v20 = vpop.permute.xlu0 %1554 }
0x2b20   :  { %3715 = vmatmul.mubr.msk.bf16.vlgmr.msra.gmra.mrb[36].mxu1 %vm134_vm3, %v1555_v20  ;;  %v1638_v20 = vld [vmem:[%s5404_s12] sm:$0xff] }
0x2b21   :  { %3730 = vmatprep.mubr.msk.bf16.mxu1 %vm4321_vm0, %v4320_v1 }
0x2bf3   :  { %v1593_v24 = vpop.f32.mrb[36].mxu1 }
0x2bf4   :  { %v1599_v26 = vadd.f32 %v1593_v24, %v1551_v23  ;;  %v3716_v27 = vpop.f32.mrb[37].mxu1  ;;  %v1639_v23 = vld [vmem:[%s5404_s12 + $0x8] sm:$0xff]  ;;  %v1640_v24 = vld [vmem:[%s5404_s12 + $0x10] sm:$0xff] }
0x2bf5   :  { %v1596_v28 = vpop.f32.mrb[38].mxu1  ;;  %v1641_v27 = vld [vmem:[%s5404_s12 + $0x18] sm:$0xff]  ;;  %s4327_s12 = smov 48  }
0x2bf6   :  { %4075 = vtanh.f32 %v1599_v26  ;;  %v3717_v30 = vpop.f32.mrb[39].mxu1  ;;  %v3399_v33 = vmul.f32 -1.442695, %v1599_v26  ;;  %v4923_v26 = vpack.c.bf16 %v1639_v23, %v1638_v20  ;;  %v4929_v28 = vpack.c.bf16 %v1641_v27, %v1640_v24 }
0x2bf8   :  { %4077 = vpow2.f32 %v3399_v33 }
0x2c00   :  { %v4076_v31 = vpop.eup %4075 }
0x2c01   :  { %1609 = vrot.lane.b32.xlu1 %v4076_v31, %s4322_s4 }
0x2c02   :  { %v4078_v34 = vpop.eup %4077 }
0x2c03   :  { %v1603_v35 = vadd.f32 1.0, %v4078_v34 }
0x2c05   :  { %4079 = vrcp.f32 %v1603_v35 }
0x2c0f   :  { %v4080_v36 = vpop.eup %4079 }
0x2c10   :  { %v1607_v40 = vmul.f32 %v4080_v36, %v1538_v15 }
0x2c73   :  { %v1610_v37 = vpop.permute.xlu1 %1609 }
0x2c74   :  { %v1612_v39 = vmul.f32 %v4080_v36, %v1610_v37 }
0x2c76   :  { %1614 = vrot.lane.b32.xlu0 %v1612_v39, %s4323_s26 }
0x2c7a   :  { %1072 = vrot.lane.b32.xlu0 %v4750_v25, %s4323_s26 }
0x2c7e   :  { %1230 = vrot.lane.b32.xlu0 %v4780_v56, %s4323_s26  ;;  %v1630_v56 = vld [vmem:[%s5402_s10] sm:$0xff] }
0x2c82   :  { %1388 = vrot.lane.b32.xlu0 %v4810_v38, %s4323_s26  ;;  %v1631_v38 = vld [vmem:[%s5402_s10 + $0x8] sm:$0xff] }
0x2c83   :  { %v4869_v48 = vpack.c.bf16 %v1631_v38, %v1630_v56 }
0x2c85   :  { %3719 = vmatpush3.bf16.msra.mxu0 %v4869_v48  ;;  %3727 = vmatpush3.bf16.msra.mxu1 %v4869_v48 }
0x2c86   :  { %1546 = vrot.lane.b32.xlu0 %v1544_v18, %s4323_s26  ;;  %3720 = vmatprep.subr.bf16.mxu0 %v4320_v1 }
0x2c87   :  { %3728 = vmatprep.subr.bf16.mxu1 %v4320_v1 }
0x2ce8   :  { %v1615_v41 = vpop.permute.xlu0 %1614 }
0x2ce9   :  { %v1617_v43 = vadd.f32 %v1615_v41, %v1607_v40 }
0x2ceb   :  { %4081 = vtanh.f32 %v1617_v43 }
0x2cec   :  { %v1073_v44 = vpop.permute.xlu0 %1072 }
0x2ced   :  { %1075 = vst.msk [vmem:[#allocation4] sm:$0x3] %vm348_vm6, %v1073_v44 }
0x2cee   :  { %1076 = vst.msk [vmem:[#allocation4 + $0xe] sm:$0x3] %vm350_vm7, %v1073_v44 }
0x2cf0   :  { %v1231_v46 = vpop.permute.xlu0 %1230 }
0x2cf1   :  { %1233 = vst.msk [vmem:[#allocation4 + $0x4] sm:$0x3] %vm348_vm6, %v1231_v46 }
0x2cf2   :  { %1234 = vst.msk [vmem:[#allocation4 + $0xa] sm:$0x3] %vm350_vm7, %v1231_v46 }
0x2cf4   :  { %v1389_v49 = vpop.permute.xlu0 %1388 }
0x2cf5   :  { %v4082_v25 = vpop.eup %4081 }
0x2cf6   :  { %1620 = vrot.lane.b32.xlu1 %v4082_v25, %s4322_s4 }
0x2cf8   :  { %v1547_v53 = vpop.permute.xlu0 %1546 }
0x2cfa   :  { %1151 = vrot.lane.b32.xlu1 %v4765_v32, %s4323_s26  ;;  %v1633_v32 = vld [vmem:[%s5402_s10 + $0x18] sm:$0xff]  ;;  %s4324_s10 = smov 16  }
0x2cfe   :  { %1309 = vrot.lane.b32.xlu1 %v4795_v12, %s4323_s26  ;;  %v4875_v12 = vpack.c.bf16 %v1633_v32, %v1632_v47 }
0x2d00   :  { %3721 = vmatpush3.bf16.msra.mxu0 %v4875_v12  ;;  %3729 = vmatpush3.bf16.msra.mxu1 %v4875_v12 }
0x2d01   :  { %3734 = vmatprep.subr.bf16.mxu0 %v4320_v1  ;;  %3742 = vmatprep.subr.bf16.mxu1 %v4320_v1 }
0x2d02   :  { %1467 = vrot.lane.b32.xlu1 %v4825_v52, %s4323_s26 }
0x2d03   :  { %3731 = vmatmul.mubr.bf16.vlgmr.msra.gmra.mrb[40].mxu1 %v4319_v0 }
0x2d04   :  { %3744 = vmatprep.mubr.msk.bf16.mxu1 %vm4321_vm0, %v4320_v1 }
0x2d68   :  { %v1621_v5 = vpop.permute.xlu1 %1620 }
0x2d69   :  { %v1623_v50 = vmul.f32 %v4080_v36, %v1621_v5  ;;  %v4946_v36 = vld [vmem:[%s5405_s13] ss:$0 sm:$0xff] }
0x2d6b   :  { %1695 = vrot.lane.b32.xlu0 %v1623_v50, %s4324_s10  ;;  %1625 = vrot.lane.b32.xlu1 %v1623_v50, %s4323_s26 }
0x2d6c   :  { %v1152_v51 = vpop.permute.xlu1 %1151 }
0x2d6d   :  { %1154 = vst.msk [vmem:[#allocation4 + $0x2] sm:$0x3] %vm348_vm6, %v1152_v51 }
0x2d6e   :  { %1155 = vst.msk [vmem:[#allocation4 + $0xc] sm:$0x3] %vm350_vm7, %v1152_v51  ;;  %1550 = vst.msk [vmem:[#allocation4 + $0x2] sm:$0x3] %vm350_vm7, %v1547_v53  ;;  %v1636_v51 = vld [vmem:[#allocation11] sm:$0xff] }
0x2d6f   :  { %1549 = vst.msk [vmem:[#allocation4 + $0xc] sm:$0x3] %vm348_vm6, %v1547_v53  ;;  %v1637_v53 = vpack.c.bf16 %v1636_v51, %v1636_v51 }
0x2d70   :  { %v1310_v54 = vpop.permute.xlu1 %1309 }
0x2d71   :  { %1312 = vst.msk [vmem:[#allocation4 + $0x6] sm:$0x3] %vm348_vm6, %v1310_v54 }
0x2d72   :  { %1313 = vst.msk [vmem:[#allocation4 + $0x8] sm:$0x3] %vm350_vm7, %v1310_v54  ;;  %1392 = vst.msk [vmem:[#allocation4 + $0x6] sm:$0x3] %vm350_vm7, %v1389_v49  ;;  %v4959_v54 = vsel %vm1881_vm11, %v1637_v53, 0 }
0x2d73   :  { %1391 = vst.msk [vmem:[#allocation4 + $0x8] sm:$0x3] %vm348_vm6, %v1389_v49  ;;  %3743 = vmatpush3.bf16.msra.mxu1 %v4959_v54 }
0x2d74   :  { %v1468_v0 = vpop.permute.xlu1 %1467  ;;  %3748 = vmatprep.subr.bf16.mxu1 %v4320_v1 }
0x2d75   :  { %1470 = vst.msk [vmem:[#allocation4 + $0xa] sm:$0x3] %vm348_vm6, %v1468_v0 }
0x2d76   :  { %1471 = vst.msk [vmem:[#allocation4 + $0x4] sm:$0x3] %vm350_vm7, %v1468_v0 }
0x2dd6   :  { %v1741_v52 = vpop.f32.mrb[40].mxu1 }
0x2dd7   :  { %v3732_v59 = vpop.f32.mrb[41].mxu1 }
0x2dd8   :  { %v1744_v60 = vpop.f32.mrb[42].mxu1 }
0x2dd9   :  { %v3733_v61 = vpop.f32.mrb[43].mxu1 }
0x2ddd   :  { %v1696_v7 = vpop.permute.xlu0 %1695  ;;  %v1626_v55 = vpop.permute.xlu1 %1625 }
0x2dde   :  { %1628 = vst.msk [vmem:[#allocation4 + $0xe] sm:$0x3] %vm348_vm6, %v1626_v55  ;;  %v1698_v57 = vsel %vm196_vm4, %v1696_v7, %v1626_v55 }
0x2ddf   :  { %1629 = vst.msk [vmem:[#allocation4] sm:$0x3] %vm350_vm7, %v1626_v55  ;;  %1756 = vrot.lane.b32.xlu0 %v1698_v57, %s4323_s26 }
0x2de5   :  { %v1647_v21 = vld [vmem:[#allocation4 + $0x8] sm:$0xff] }
0x2de6   :  { %v1646_v58 = vld [vmem:[#allocation4] sm:$0xff] }
0x2de7   :  { %v1648_v4 = vpack.c.bf16 %v1647_v21, %v1646_v58 }
0x2de9   :  { %3723 = vmatmul.mubr.msk.bf16.vlgmr.msra.gmra.mrb[36].mxu0 %vm134_vm3, %v1648_v4 }
0x2dea   :  { %3738 = vmatprep.mubr.msk.bf16.mxu0 %vm4321_vm0, %v4320_v1  ;;  %3735 = vmatpush3.bf16.msra.mxu0 %v4923_v26 }
0x2deb   :  { %3736 = vmatprep.subr.bf16.mxu0 %v4320_v1 }
0x2dee   :  { %3737 = vmatpush3.bf16.msra.mxu0 %v4929_v28 }
0x2def   :  { %3756 = vmatprep.subr.bf16.mxu0 %v4320_v1 }
0x2e51   :  { %v1757_v16 = vpop.permute.xlu0 %1756 }
0x2ebc   :  { %v1686_v45 = vpop.f32.mrb[36].mxu0 }
0x2ebd   :  { %1693 = vst [vmem:[#allocation5] sm:$0xff] %v1686_v45  ;;  %v3724_v29 = vpop.f32.mrb[37].mxu0 }
0x2ebe   :  { %v1689_v22 = vpop.f32.mrb[38].mxu0 }
0x2ebf   :  { %1694 = vst [vmem:[#allocation5 + $0x8] sm:$0xff] %v1689_v22  ;;  %v3725_v62 = vpop.f32.mrb[39].mxu0 }
0x2ec4   :  { %v1699_v63 = vld [vmem:[#allocation5] sm:$0x3]  ;;  %v2135_v51 = vld [vmem:[#allocation5 + $0x4] sm:$0x3] }
0x2ec5   :  { %v1706_v2 = vadd.f32 %v4906_v42, %v1699_v63  ;;  %v3898_v53 = vadd.f32 %v4906_v42, %v2135_v51 }
0x2ec7   :  { %v1747_v3 = vadd.f32 %v1741_v52, %v1706_v2  ;;  %v1925_v52 = vld [vmem:[#allocation5 + $0x2] sm:$0x3] }
0x2ec8   :  { %v3896_v59 = vadd.f32 %v4906_v42, %v1925_v52 }
0x2ec9   :  { %4083 = vtanh.f32 %v1747_v3  ;;  %v3402_v8 = vmul.f32 -1.442695, %v1747_v3 }
0x2ecb   :  { %4085 = vpow2.f32 %v3402_v8 }
0x2ed3   :  { %v4084_v6 = vpop.eup %4083 }
0x2ed4   :  { %1761 = vrot.lane.b32.xlu1 %v4084_v6, %s4322_s4 }
0x2ed5   :  { %v4086_v9 = vpop.eup %4085 }
0x2ed6   :  { %v1751_v10 = vadd.f32 1.0, %v4086_v9 }
0x2ed8   :  { %4087 = vrcp.f32 %v1751_v10 }
0x2ee2   :  { %v4088_v13 = vpop.eup %4087 }
0x2ee3   :  { %v1759_v17 = vmul.f32 %v4088_v13, %v1757_v16 }
0x2f46   :  { %v1762_v14 = vpop.permute.xlu1 %1761 }
0x2f47   :  { %v1764_v15 = vmul.f32 %v4088_v13, %v1762_v14 }
0x2f49   :  { %1766 = vrot.lane.b32.xlu1 %v1764_v15, %s4323_s26 }
0x2fbb   :  { %v1767_v18 = vpop.permute.xlu1 %1766 }
0x2fbc   :  { %v4911_v19 = vadd.f32 %v1767_v18, %v1759_v17 }
0x2fbe   :  { %4089 = vtanh.f32 %v4911_v19 }
0x2fc8   :  { %v4090_v30 = vpop.eup %4089 }
0x2fc9   :  { %1772 = vrot.lane.b32.xlu0 %v4090_v30, %s4322_s4 }
0x303b   :  { %v1773_v31 = vpop.permute.xlu0 %1772 }
0x303c   :  { %v1775_v33 = vmul.f32 %v4088_v13, %v1773_v31 }
0x303e   :  { %v1776_v34 = vpack.c.bf16 %v1775_v33, %v1775_v33 }
0x3040   :  { %1784 = vrot.lane.b32.xlu1 %v1776_v34, %s4323_s26 }
0x30b2   :  { %v1785_v35 = vpop.permute.xlu1 %1784 }
0x30b3   :  { %3739 = vmatmul.mubr.msk.bf16.vlgmr.msra.gmra.mrb[40].mxu0 %vm134_vm3, %v1785_v35 }
0x30b4   :  { %3757 = vmatpush3.bf16.msra.mxu0 %v4923_v26  ;;  %3760 = vmatprep.mubr.msk.bf16.mxu0 %vm4321_vm0, %v4320_v1 }
0x30b5   :  { %3758 = vmatprep.subr.bf16.mxu0 %v4320_v1 }
0x30b8   :  { %3759 = vmatpush3.bf16.msra.mxu0 %v4929_v28 }
0x30b9   :  { %3764 = vmatprep.subr.bf16.mxu0 %v4320_v1 }
0x3186   :  { %v1823_v37 = vpop.f32.mrb[40].mxu0 }
0x3187   :  { %v4949_v39 = vadd.f32 %v4946_v36, %v1823_v37  ;;  %v3740_v40 = vpop.f32.mrb[41].mxu0 }
0x3188   :  { %v1826_v41 = vpop.f32.mrb[42].mxu0 }
0x3189   :  { %v3741_v43 = vpop.f32.mrb[43].mxu0  ;;  %v1830_v44 = vsel %vm1829_vm8, %v4949_v39, -inf }
0x318a   :  { %1831 = vmax.xlane.f32.xlu0 %v1830_v44 }
0x3217   :  { %v4953_v46 = vpop.xlane.xlu0 %1831 }
0x3218   :  { %vm1856_vm9 = vcmp.eq.f32.partialorder %v4949_v39, %v4953_v46 }
0x3219   :  { %v1857_v25 = vsel %vm1856_vm9, %v4486_v11, 8 }
0x321a   :  { %v1858_v56 = vsel %vm1829_vm8, %v1857_v25, 2147483647 }
0x321b   :  { %v1860_v38 = vshra.s32 %v1858_v56, 16  ;;  %v1859_v32 = vand.u32 65535, %v1858_v56 }
0x321d   :  { %v1862_v47 = vcvt.s32.f32 %v1860_v38  ;;  %v1861_v5 = vcvt.s32.f32 %v1859_v32 }
0x321f   :  { %1863 = vmin.xlane.f32.xlu1 %v1862_v47 }
0x32ac   :  { %v1864_v49 = vpop.xlane.xlu1 %1863 }
0x32ad   :  { %vm1865_vm10 = vcmp.eq.f32.partialorder %v1862_v47, %v1864_v49  ;;  %v1870_v0 = vcvt.f32.s32 %v1864_v49 }
0x32ae   :  { %v1866_v50 = vsel %vm1865_vm10, %v1861_v5, inf }
0x32af   :  { %1867 = vmin.xlane.f32.xlu0 %v1866_v50  ;;  %v1871_v55 = vshll.u32 %v1870_v0, 16 }
0x333c   :  { %v1868_v7 = vpop.xlane.xlu0 %1867 }
0x333d   :  { %v1869_v57 = vcvt.f32.s32 %v1868_v7 }
0x333f   :  { %v1872_v58 = vadd.s32 %v1871_v55, %v1869_v57 }
0x3341   :  { %vm1873_vm12 = vcmp.eq.s32.totalorder %v4486_v11, %v1872_v58 }
0x3342   :  { %v3405_v21 = vsel %vm1873_vm12, 1.0, %v4320_v1 }
0x3343   :  { %v1876_v4 = vpack.c.bf16 %v3405_v21, %v3405_v21 }
0x3345   :  { %3745 = vmatmul.mubr.msk.bf16.vlgmr.msra.gmra.mrb[44].mxu1 %vm1877_vm13, %v1876_v4 }
0x3346   :  { %3749 = vmatpush3.bf16.msra.mxu1 %v4869_v48  ;;  %3752 = vmatprep.mubr.msk.bf16.mxu1 %vm4321_vm0, %v4320_v1 }
0x3347   :  { %3750 = vmatprep.subr.bf16.mxu1 %v4320_v1 }
0x334a   :  { %3751 = vmatpush3.bf16.msra.mxu1 %v4875_v12 }
0x334b   :  { %3778 = vmatprep.subr.bf16.mxu1 %v4320_v1 }
0x3351   :  { %3753 = vmatmul.mubr.msk.bf16.vlgmr.msra.gmra.mrb[44].mxu1 %vm134_vm3, %v1785_v35 }
0x3352   :  { %3779 = vmatpush3.bf16.msra.mxu1 %v4923_v26  ;;  %3782 = vmatprep.mubr.msk.bf16.mxu1 %vm4321_vm0, %v4320_v1 }
0x3353   :  { %3780 = vmatprep.subr.bf16.mxu1 %v4320_v1 }
0x3356   :  { %3781 = vmatpush3.bf16.msra.mxu1 %v4929_v28 }
0x3357   :  { %3786 = vmatprep.subr.bf16.mxu1 %v4320_v1 }
0x3424   :  { %v1961_v60 = vpop.f32.mrb[44].mxu1 }
0x3425   :  { %v3897_v61 = vadd.f32 %v3896_v59, %v1961_v60  ;;  %v3754_v45 = vpop.f32.mrb[45].mxu1 }
0x3426   :  { %v1964_v29 = vpop.f32.mrb[46].mxu1 }
0x3427   :  { %4091 = vtanh.f32 %v3897_v61  ;;  %v3755_v22 = vpop.f32.mrb[47].mxu1  ;;  %v3408_v63 = vmul.f32 -1.442695, %v3897_v61 }
0x3429   :  { %4093 = vpow2.f32 %v3408_v63 }
0x3431   :  { %v4092_v62 = vpop.eup %4091 }
0x3432   :  { %1977 = vrot.lane.b32.xlu0 %v4092_v62, %s4322_s4 }
0x3433   :  { %v4094_v2 = vpop.eup %4093 }
0x3434   :  { %v1971_v3 = vadd.f32 1.0, %v4094_v2 }
0x3436   :  { %4095 = vrcp.f32 %v1971_v3 }
0x3440   :  { %v4096_v6 = vpop.eup %4095 }
0x3441   :  { %v1975_v10 = vmul.f32 %v4096_v6, %v4911_v19 }
0x34a4   :  { %v1978_v8 = vpop.permute.xlu0 %1977 }
0x34a5   :  { %v1980_v9 = vmul.f32 %v4096_v6, %v1978_v8 }
0x34a7   :  { %1982 = vrot.lane.b32.xlu1 %v1980_v9, %s4323_s26 }
0x3519   :  { %v1983_v13 = vpop.permute.xlu1 %1982 }
0x351a   :  { %v4983_v14 = vadd.f32 %v1983_v13, %v1975_v10 }
0x351c   :  { %4097 = vtanh.f32 %v4983_v14 }
0x3526   :  { %v4098_v15 = vpop.eup %4097 }
0x3527   :  { %1988 = vrot.lane.b32.xlu1 %v4098_v15, %s4322_s4 }
0x3599   :  { %v1989_v16 = vpop.permute.xlu1 %1988 }
0x359a   :  { %v1991_v17 = vmul.f32 %v4096_v6, %v1989_v16 }
0x359c   :  { %v1992_v18 = vpack.c.bf16 %v1991_v17, %v1991_v17 }
0x359e   :  { %1994 = vrot.lane.b32.xlu0 %v1992_v18, %s4323_s26 }
0x3610   :  { %v1995_v20 = vpop.permute.xlu0 %1994 }
0x3611   :  { %3761 = vmatmul.mubr.msk.bf16.vlgmr.msra.gmra.mrb[44].mxu0 %vm134_vm3, %v1995_v20 }
0x3612   :  { %3765 = vmatpush3.bf16.msra.mxu0 %v4959_v54  ;;  %3766 = vmatprep.mubr.msk.bf16.mxu0 %vm4321_vm0, %v4320_v1 }
0x3613   :  { %3770 = vmatprep.subr.bf16.mxu0 %v4320_v1 }
0x36e4   :  { %v2033_v19 = vpop.f32.mrb[44].mxu0 }
0x36e5   :  { %v4994_v23 = vadd.f32 %v4946_v36, %v2033_v19  ;;  %v3762_v24 = vpop.f32.mrb[45].mxu0 }
0x36e6   :  { %v2036_v27 = vpop.f32.mrb[46].mxu0 }
0x36e7   :  { %v3763_v30 = vpop.f32.mrb[47].mxu0  ;;  %v2039_v31 = vsel %vm1829_vm8, %v4994_v23, -inf }
0x36e8   :  { %2040 = vmax.xlane.f32.xlu1 %v2039_v31 }
0x3775   :  { %v4998_v33 = vpop.xlane.xlu1 %2040 }
0x3776   :  { %vm2071_vm14 = vcmp.eq.f32.partialorder %v4994_v23, %v4998_v33 }
0x3777   :  { %v2072_v34 = vsel %vm2071_vm14, %v4486_v11, 8 }
0x3778   :  { %v2073_v35 = vsel %vm1829_vm8, %v2072_v34, 2147483647 }
0x3779   :  { %v2075_v37 = vshra.s32 %v2073_v35, 16  ;;  %v2074_v41 = vand.u32 65535, %v2073_v35 }
0x377b   :  { %v2077_v40 = vcvt.s32.f32 %v2075_v37  ;;  %v2076_v44 = vcvt.s32.f32 %v2074_v41 }
0x377d   :  { %2078 = vmin.xlane.f32.xlu0 %v2077_v40 }
0x380a   :  { %v2079_v43 = vpop.xlane.xlu0 %2078 }
0x380b   :  { %vm2080_vm15 = vcmp.eq.f32.partialorder %v2077_v40, %v2079_v43  ;;  %v2085_v56 = vcvt.f32.s32 %v2079_v43 }
0x380c   :  { %v2081_v25 = vsel %vm2080_vm15, %v2076_v44, inf }
0x380d   :  { %2082 = vmin.xlane.f32.xlu0 %v2081_v25  ;;  %v2086_v47 = vshll.u32 %v2085_v56, 16  ;;  %v2345_v56 = vld [vmem:[#allocation5 + $0x6] sm:$0x3] }
0x389a   :  { %v2083_v38 = vpop.xlane.xlu0 %2082 }
0x389b   :  { %v2084_v32 = vcvt.f32.s32 %v2083_v38  ;;  %v3900_v38 = vadd.f32 %v4906_v42, %v2345_v56 }
0x389d   :  { %v2087_v49 = vadd.s32 %v2086_v47, %v2084_v32 }
0x389f   :  { %vm2088_vm1 = vcmp.eq.s32.totalorder %v4486_v11, %v2087_v49 }
0x38a0   :  { %v3411_v5 = vsel %vm2088_vm1, 1.0, %v4320_v1 }
0x38a1   :  { %v2091_v50 = vpack.c.bf16 %v3411_v5, %v3411_v5 }
0x38a3   :  { %3767 = vmatmul.mubr.msk.bf16.vlgmr.msra.gmra.mrb[48].mxu0 %vm1877_vm13, %v2091_v50 }
0x38a4   :  { %3771 = vmatpush3.bf16.msra.mxu0 %v4869_v48  ;;  %3774 = vmatprep.mubr.msk.bf16.mxu0 %vm4321_vm0, %v4320_v1 }
0x38a5   :  { %3772 = vmatprep.subr.bf16.mxu0 %v4320_v1 }
0x38a8   :  { %3773 = vmatpush3.bf16.msra.mxu0 %v4875_v12 }
0x38a9   :  { %3800 = vmatprep.subr.bf16.mxu0 %v4320_v1 }
0x38af   :  { %3775 = vmatmul.mubr.msk.bf16.vlgmr.msra.gmra.mrb[48].mxu0 %vm134_vm3, %v1995_v20 }
0x38b0   :  { %3801 = vmatpush3.bf16.msra.mxu0 %v4923_v26  ;;  %3804 = vmatprep.mubr.msk.bf16.mxu0 %vm4321_vm0, %v4320_v1 }
0x38b1   :  { %3802 = vmatprep.subr.bf16.mxu0 %v4320_v1 }
0x38b4   :  { %3803 = vmatpush3.bf16.msra.mxu0 %v4929_v28 }
0x38b5   :  { %3808 = vmatprep.subr.bf16.mxu0 %v4320_v1 }
0x3982   :  { %v2171_v0 = vpop.f32.mrb[48].mxu0 }
0x3983   :  { %v3899_v7 = vadd.f32 %v3898_v53, %v2171_v0  ;;  %v3776_v55 = vpop.f32.mrb[49].mxu0 }
0x3984   :  { %v2174_v57 = vpop.f32.mrb[50].mxu0 }
0x3985   :  { %4099 = vtanh.f32 %v3899_v7  ;;  %v3777_v58 = vpop.f32.mrb[51].mxu0  ;;  %v3414_v4 = vmul.f32 -1.442695, %v3899_v7 }
0x3987   :  { %4101 = vpow2.f32 %v3414_v4 }
0x398f   :  { %v4100_v21 = vpop.eup %4099 }
0x3990   :  { %2187 = vrot.lane.b32.xlu1 %v4100_v21, %s4322_s4 }
0x3991   :  { %v4102_v52 = vpop.eup %4101 }
0x3992   :  { %v2181_v59 = vadd.f32 1.0, %v4102_v52 }
0x3994   :  { %4103 = vrcp.f32 %v2181_v59 }
0x399e   :  { %v4104_v60 = vpop.eup %4103 }
0x399f   :  { %v2185_v29 = vmul.f32 %v4104_v60, %v4983_v14 }
0x3a02   :  { %v2188_v61 = vpop.permute.xlu1 %2187 }
0x3a03   :  { %v2190_v45 = vmul.f32 %v4104_v60, %v2188_v61 }
0x3a05   :  { %2192 = vrot.lane.b32.xlu0 %v2190_v45, %s4323_s26 }
0x3a77   :  { %v2193_v22 = vpop.permute.xlu0 %2192 }
0x3a78   :  { %v5024_v62 = vadd.f32 %v2193_v22, %v2185_v29 }
0x3a7a   :  { %4105 = vtanh.f32 %v5024_v62 }
0x3a84   :  { %v4106_v63 = vpop.eup %4105 }
0x3a85   :  { %2198 = vrot.lane.b32.xlu1 %v4106_v63, %s4322_s4 }
0x3af7   :  { %v2199_v2 = vpop.permute.xlu1 %2198 }
0x3af8   :  { %v2201_v3 = vmul.f32 %v4104_v60, %v2199_v2 }
0x3afa   :  { %v2202_v6 = vpack.c.bf16 %v2201_v3, %v2201_v3 }
0x3afc   :  { %2204 = vrot.lane.b32.xlu1 %v2202_v6, %s4323_s26 }
0x3b6e   :  { %v2205_v8 = vpop.permute.xlu1 %2204 }
0x3b6f   :  { %3783 = vmatmul.mubr.msk.bf16.vlgmr.msra.gmra.mrb[48].mxu1 %vm134_vm3, %v2205_v8 }
0x3b70   :  { %3787 = vmatpush3.bf16.msra.mxu1 %v4959_v54  ;;  %3788 = vmatprep.mubr.msk.bf16.mxu1 %vm4321_vm0, %v4320_v1 }
0x3b71   :  { %3792 = vmatprep.subr.bf16.mxu1 %v4320_v1 }
0x3c42   :  { %v2243_v9 = vpop.f32.mrb[48].mxu1 }
0x3c43   :  { %v5035_v10 = vadd.f32 %v4946_v36, %v2243_v9  ;;  %v3784_v13 = vpop.f32.mrb[49].mxu1 }
0x3c44   :  { %v2246_v14 = vpop.f32.mrb[50].mxu1 }
0x3c45   :  { %v3785_v15 = vpop.f32.mrb[51].mxu1  ;;  %v2249_v16 = vsel %vm1829_vm8, %v5035_v10, -inf }
0x3c46   :  { %2250 = vmax.xlane.f32.xlu0 %v2249_v16 }
0x3cd3   :  { %v5039_v17 = vpop.xlane.xlu0 %2250 }
0x3cd4   :  { %vm2281_vm2 = vcmp.eq.f32.partialorder %v5035_v10, %v5039_v17 }
0x3cd5   :  { %v2282_v18 = vsel %vm2281_vm2, %v4486_v11, 8 }
0x3cd6   :  { %v2283_v20 = vsel %vm1829_vm8, %v2282_v18, 2147483647 }
0x3cd7   :  { %v2285_v19 = vshra.s32 %v2283_v20, 16  ;;  %v2284_v27 = vand.u32 65535, %v2283_v20 }
0x3cd9   :  { %v2287_v24 = vcvt.s32.f32 %v2285_v19  ;;  %v2286_v31 = vcvt.s32.f32 %v2284_v27 }
0x3cdb   :  { %2288 = vmin.xlane.f32.xlu1 %v2287_v24 }
0x3d68   :  { %v2289_v30 = vpop.xlane.xlu1 %2288 }
0x3d69   :  { %vm2290_vm4 = vcmp.eq.f32.partialorder %v2287_v24, %v2289_v30  ;;  %v2295_v35 = vcvt.f32.s32 %v2289_v30 }
0x3d6a   :  { %v2291_v34 = vsel %vm2290_vm4, %v2286_v31, inf }
0x3d6b   :  { %2292 = vmin.xlane.f32.xlu0 %v2291_v34  ;;  %v2296_v40 = vshll.u32 %v2295_v35, 16 }
0x3df8   :  { %v2293_v37 = vpop.xlane.xlu0 %2292 }
0x3df9   :  { %v2294_v41 = vcvt.f32.s32 %v2293_v37 }
0x3dfb   :  { %v2297_v43 = vadd.s32 %v2296_v40, %v2294_v41  ;;  %v2555_v40 = vld [vmem:[#allocation5 + $0x8] sm:$0x3] }
0x3dfc   :  { %v3902_v41 = vadd.f32 %v4906_v42, %v2555_v40 }
0x3dfd   :  { %vm2298_vm5 = vcmp.eq.s32.totalorder %v4486_v11, %v2297_v43 }
0x3dfe   :  { %v3417_v44 = vsel %vm2298_vm5, 1.0, %v4320_v1 }
0x3dff   :  { %v2301_v25 = vpack.c.bf16 %v3417_v44, %v3417_v44 }
0x3e01   :  { %3789 = vmatmul.mubr.msk.bf16.vlgmr.msra.gmra.mrb[52].mxu1 %vm1877_vm13, %v2301_v25 }
0x3e02   :  { %3793 = vmatpush3.bf16.msra.mxu1 %v4869_v48  ;;  %3796 = vmatprep.mubr.msk.bf16.mxu1 %vm4321_vm0, %v4320_v1 }
0x3e03   :  { %3794 = vmatprep.subr.bf16.mxu1 %v4320_v1 }
0x3e06   :  { %3795 = vmatpush3.bf16.msra.mxu1 %v4875_v12 }
0x3e07   :  { %3822 = vmatprep.subr.bf16.mxu1 %v4320_v1 }
0x3e0d   :  { %3797 = vmatmul.mubr.msk.bf16.vlgmr.msra.gmra.mrb[52].mxu1 %vm134_vm3, %v2205_v8 }
0x3e0e   :  { %3823 = vmatpush3.bf16.msra.mxu1 %v4923_v26  ;;  %3826 = vmatprep.mubr.msk.bf16.mxu1 %vm4321_vm0, %v4320_v1 }
0x3e0f   :  { %3824 = vmatprep.subr.bf16.mxu1 %v4320_v1 }
0x3e12   :  { %3825 = vmatpush3.bf16.msra.mxu1 %v4929_v28 }
0x3e13   :  { %3830 = vmatprep.subr.bf16.mxu1 %v4320_v1 }
0x3ee0   :  { %v2381_v47 = vpop.f32.mrb[52].mxu1 }
0x3ee1   :  { %v3901_v32 = vadd.f32 %v3900_v38, %v2381_v47  ;;  %v3798_v49 = vpop.f32.mrb[53].mxu1 }
0x3ee2   :  { %v2384_v5 = vpop.f32.mrb[54].mxu1 }
0x3ee3   :  { %4107 = vtanh.f32 %v3901_v32  ;;  %v3799_v50 = vpop.f32.mrb[55].mxu1  ;;  %v3420_v53 = vmul.f32 -1.442695, %v3901_v32 }
0x3ee5   :  { %4109 = vpow2.f32 %v3420_v53 }
0x3eed   :  { %v4108_v51 = vpop.eup %4107 }
0x3eee   :  { %2397 = vrot.lane.b32.xlu0 %v4108_v51, %s4322_s4 }
0x3eef   :  { %v4110_v0 = vpop.eup %4109 }
0x3ef0   :  { %v2391_v7 = vadd.f32 1.0, %v4110_v0 }
0x3ef2   :  { %4111 = vrcp.f32 %v2391_v7 }
0x3efc   :  { %v4112_v55 = vpop.eup %4111 }
0x3efd   :  { %v2395_v21 = vmul.f32 %v4112_v55, %v5024_v62 }
0x3f60   :  { %v2398_v57 = vpop.permute.xlu0 %2397 }
0x3f61   :  { %v2400_v58 = vmul.f32 %v4112_v55, %v2398_v57 }
0x3f63   :  { %2402 = vrot.lane.b32.xlu1 %v2400_v58, %s4323_s26 }
0x3fd5   :  { %v2403_v4 = vpop.permute.xlu1 %2402 }
0x3fd6   :  { %v5065_v52 = vadd.f32 %v2403_v4, %v2395_v21 }
0x3fd8   :  { %4113 = vtanh.f32 %v5065_v52 }
0x3fe2   :  { %v4114_v59 = vpop.eup %4113 }
0x3fe3   :  { %2408 = vrot.lane.b32.xlu1 %v4114_v59, %s4322_s4 }
0x4055   :  { %v2409_v60 = vpop.permute.xlu1 %2408 }
0x4056   :  { %v2411_v61 = vmul.f32 %v4112_v55, %v2409_v60 }
0x4058   :  { %v2412_v45 = vpack.c.bf16 %v2411_v61, %v2411_v61 }
0x405a   :  { %2414 = vrot.lane.b32.xlu0 %v2412_v45, %s4323_s26 }
0x40cc   :  { %v2415_v29 = vpop.permute.xlu0 %2414 }
0x40cd   :  { %3805 = vmatmul.mubr.msk.bf16.vlgmr.msra.gmra.mrb[52].mxu0 %vm134_vm3, %v2415_v29 }
0x40ce   :  { %3809 = vmatpush3.bf16.msra.mxu0 %v4959_v54  ;;  %3810 = vmatprep.mubr.msk.bf16.mxu0 %vm4321_vm0, %v4320_v1 }
0x40cf   :  { %3814 = vmatprep.subr.bf16.mxu0 %v4320_v1 }
0x41a0   :  { %v2453_v22 = vpop.f32.mrb[52].mxu0 }
0x41a1   :  { %v5076_v62 = vadd.f32 %v4946_v36, %v2453_v22  ;;  %v3806_v63 = vpop.f32.mrb[53].mxu0 }
0x41a2   :  { %v2456_v2 = vpop.f32.mrb[54].mxu0 }
0x41a3   :  { %v3807_v3 = vpop.f32.mrb[55].mxu0  ;;  %v2459_v6 = vsel %vm1829_vm8, %v5076_v62, -inf }
0x41a4   :  { %2460 = vmax.xlane.f32.xlu1 %v2459_v6 }
0x4231   :  { %v5080_v8 = vpop.xlane.xlu1 %2460 }
0x4232   :  { %vm2491_vm6 = vcmp.eq.f32.partialorder %v5076_v62, %v5080_v8 }
0x4233   :  { %v2492_v9 = vsel %vm2491_vm6, %v4486_v11, 8 }
0x4234   :  { %v2493_v13 = vsel %vm1829_vm8, %v2492_v9, 2147483647 }
0x4235   :  { %v2495_v14 = vshra.s32 %v2493_v13, 16  ;;  %v2494_v16 = vand.u32 65535, %v2493_v13 }
0x4237   :  { %v2497_v15 = vcvt.s32.f32 %v2495_v14  ;;  %v2496_v20 = vcvt.s32.f32 %v2494_v16 }
0x4239   :  { %2498 = vmin.xlane.f32.xlu0 %v2497_v15 }
0x42c6   :  { %v2499_v18 = vpop.xlane.xlu0 %2498 }
0x42c7   :  { %vm2500_vm7 = vcmp.eq.f32.partialorder %v2497_v15, %v2499_v18  ;;  %v2505_v24 = vcvt.f32.s32 %v2499_v18 }
0x42c8   :  { %v2501_v19 = vsel %vm2500_vm7, %v2496_v20, inf }
0x42c9   :  { %2502 = vmin.xlane.f32.xlu0 %v2501_v19  ;;  %v2506_v30 = vshll.u32 %v2505_v24, 16 }
0x4356   :  { %v2503_v27 = vpop.xlane.xlu0 %2502 }
0x4357   :  { %v2504_v31 = vcvt.f32.s32 %v2503_v27 }
0x4359   :  { %v2507_v34 = vadd.s32 %v2506_v30, %v2504_v31 }
0x435b   :  { %vm2508_vm9 = vcmp.eq.s32.totalorder %v4486_v11, %v2507_v34  ;;  %v2765_v34 = vld [vmem:[#allocation5 + $0xa] sm:$0x3] }
0x435c   :  { %v3423_v35 = vsel %vm2508_vm9, 1.0, %v4320_v1  ;;  %vm2264_vm9 = vcmask 189568  }
0x435d   :  { %v2511_v37 = vpack.c.bf16 %v3423_v35, %v3423_v35  ;;  %v3904_v35 = vadd.f32 %v4906_v42, %v2765_v34 }
0x435f   :  { %3811 = vmatmul.mubr.msk.bf16.vlgmr.msra.gmra.mrb[56].mxu0 %vm1877_vm13, %v2511_v37 }
0x4360   :  { %3815 = vmatpush3.bf16.msra.mxu0 %v4869_v48  ;;  %3818 = vmatprep.mubr.msk.bf16.mxu0 %vm4321_vm0, %v4320_v1 }
0x4361   :  { %3816 = vmatprep.subr.bf16.mxu0 %v4320_v1 }
0x4364   :  { %3817 = vmatpush3.bf16.msra.mxu0 %v4875_v12 }
0x4365   :  { %3844 = vmatprep.subr.bf16.mxu0 %v4320_v1 }
0x436b   :  { %3819 = vmatmul.mubr.msk.bf16.vlgmr.msra.gmra.mrb[56].mxu0 %vm134_vm3, %v2415_v29 }
0x436c   :  { %3845 = vmatpush3.bf16.msra.mxu0 %v4923_v26  ;;  %3848 = vmatprep.mubr.msk.bf16.mxu0 %vm4321_vm0, %v4320_v1 }
0x436d   :  { %3846 = vmatprep.subr.bf16.mxu0 %v4320_v1 }
0x4370   :  { %3847 = vmatpush3.bf16.msra.mxu0 %v4929_v28 }
0x4371   :  { %3852 = vmatprep.subr.bf16.mxu0 %v4320_v1 }
0x443e   :  { %v2591_v43 = vpop.f32.mrb[56].mxu0 }
0x443f   :  { %v3903_v44 = vadd.f32 %v3902_v41, %v2591_v43  ;;  %v3820_v25 = vpop.f32.mrb[57].mxu0 }
0x4440   :  { %v2594_v56 = vpop.f32.mrb[58].mxu0 }
0x4441   :  { %4115 = vtanh.f32 %v3903_v44  ;;  %v3821_v38 = vpop.f32.mrb[59].mxu0  ;;  %v3426_v32 = vmul.f32 -1.442695, %v3903_v44 }
0x4443   :  { %4117 = vpow2.f32 %v3426_v32 }
0x444b   :  { %v4116_v47 = vpop.eup %4115 }
0x444c   :  { %2607 = vrot.lane.b32.xlu1 %v4116_v47, %s4322_s4 }
0x444d   :  { %v4118_v49 = vpop.eup %4117 }
0x444e   :  { %v2601_v5 = vadd.f32 1.0, %v4118_v49 }
0x4450   :  { %4119 = vrcp.f32 %v2601_v5 }
0x445a   :  { %v4120_v50 = vpop.eup %4119 }
0x445b   :  { %v2605_v0 = vmul.f32 %v4120_v50, %v5065_v52 }
0x44be   :  { %v2608_v51 = vpop.permute.xlu1 %2607 }
0x44bf   :  { %v2610_v53 = vmul.f32 %v4120_v50, %v2608_v51 }
0x44c1   :  { %2612 = vrot.lane.b32.xlu0 %v2610_v53, %s4323_s26 }
0x4533   :  { %v2613_v7 = vpop.permute.xlu0 %2612 }
0x4534   :  { %v5106_v55 = vadd.f32 %v2613_v7, %v2605_v0 }
0x4536   :  { %4121 = vtanh.f32 %v5106_v55 }
0x4540   :  { %v4122_v57 = vpop.eup %4121 }
0x4541   :  { %2618 = vrot.lane.b32.xlu1 %v4122_v57, %s4322_s4 }
0x45b3   :  { %v2619_v58 = vpop.permute.xlu1 %2618 }
0x45b4   :  { %v2621_v21 = vmul.f32 %v4120_v50, %v2619_v58 }
0x45b6   :  { %v2622_v4 = vpack.c.bf16 %v2621_v21, %v2621_v21 }
0x45b8   :  { %2624 = vrot.lane.b32.xlu1 %v2622_v4, %s4323_s26 }
0x462a   :  { %v2625_v59 = vpop.permute.xlu1 %2624 }
0x462b   :  { %3827 = vmatmul.mubr.msk.bf16.vlgmr.msra.gmra.mrb[56].mxu1 %vm134_vm3, %v2625_v59 }
0x462c   :  { %3831 = vmatpush3.bf16.msra.mxu1 %v4959_v54  ;;  %3832 = vmatprep.mubr.msk.bf16.mxu1 %vm4321_vm0, %v4320_v1 }
0x462d   :  { %3836 = vmatprep.subr.bf16.mxu1 %v4320_v1 }
0x46fe   :  { %v2663_v52 = vpop.f32.mrb[56].mxu1 }
0x46ff   :  { %v5117_v60 = vadd.f32 %v4946_v36, %v2663_v52  ;;  %v3828_v61 = vpop.f32.mrb[57].mxu1 }
0x4700   :  { %v2666_v45 = vpop.f32.mrb[58].mxu1 }
0x4701   :  { %v3829_v29 = vpop.f32.mrb[59].mxu1  ;;  %v2669_v22 = vsel %vm1829_vm8, %v5117_v60, -inf }
0x4702   :  { %2670 = vmax.xlane.f32.xlu0 %v2669_v22 }
0x478f   :  { %v5121_v63 = vpop.xlane.xlu0 %2670 }
0x4790   :  { %vm2701_vm10 = vcmp.eq.f32.partialorder %v5117_v60, %v5121_v63 }
0x4791   :  { %v2702_v2 = vsel %vm2701_vm10, %v4486_v11, 8 }
0x4792   :  { %v2703_v3 = vsel %vm1829_vm8, %v2702_v2, 2147483647 }
0x4793   :  { %v2705_v6 = vshra.s32 %v2703_v3, 16  ;;  %v2704_v13 = vand.u32 65535, %v2703_v3 }
0x4795   :  { %v2707_v9 = vcvt.s32.f32 %v2705_v6  ;;  %v2706_v15 = vcvt.s32.f32 %v2704_v13 }
0x4797   :  { %2708 = vmin.xlane.f32.xlu1 %v2707_v9 }
0x4824   :  { %v2709_v14 = vpop.xlane.xlu1 %2708 }
0x4825   :  { %vm2710_vm11 = vcmp.eq.f32.partialorder %v2707_v9, %v2709_v14  ;;  %v2715_v18 = vcvt.f32.s32 %v2709_v14 }
0x4826   :  { %v2711_v16 = vsel %vm2710_vm11, %v2706_v15, inf }
0x4827   :  { %2712 = vmin.xlane.f32.xlu0 %v2711_v16  ;;  %v2716_v19 = vshll.u32 %v2715_v18, 16 }
0x48b4   :  { %v2713_v20 = vpop.xlane.xlu0 %2712 }
0x48b5   :  { %v2714_v24 = vcvt.f32.s32 %v2713_v20 }
0x48b7   :  { %v2717_v27 = vadd.s32 %v2716_v19, %v2714_v24 }
0x48b9   :  { %vm2718_vm12 = vcmp.eq.s32.totalorder %v4486_v11, %v2717_v27 }
0x48ba   :  { %v3429_v30 = vsel %vm2718_vm12, 1.0, %v4320_v1 }
0x48bb   :  { %v2721_v31 = vpack.c.bf16 %v3429_v30, %v3429_v30 }
0x48bd   :  { %3833 = vmatmul.mubr.msk.bf16.vlgmr.msra.gmra.mrb[60].mxu1 %vm1877_vm13, %v2721_v31  ;;  %v2975_v31 = vld [vmem:[#allocation5 + $0xc] sm:$0x3] }
0x48be   :  { %3837 = vmatpush3.bf16.msra.mxu1 %v4869_v48  ;;  %3840 = vmatprep.mubr.msk.bf16.mxu1 %vm4321_vm0, %v4320_v1  ;;  %v3906_v34 = vadd.f32 %v4906_v42, %v2975_v31 }
0x48bf   :  { %3838 = vmatprep.subr.bf16.mxu1 %v4320_v1 }
0x48c2   :  { %3839 = vmatpush3.bf16.msra.mxu1 %v4875_v12 }
0x48c3   :  { %3866 = vmatprep.subr.bf16.mxu1 %v4320_v1 }
0x48c9   :  { %3841 = vmatmul.mubr.msk.bf16.vlgmr.msra.gmra.mrb[60].mxu1 %vm134_vm3, %v2625_v59 }
0x48ca   :  { %3867 = vmatpush3.bf16.msra.mxu1 %v4923_v26  ;;  %3870 = vmatprep.mubr.msk.bf16.mxu1 %vm4321_vm0, %v4320_v1 }
0x48cb   :  { %3868 = vmatprep.subr.bf16.mxu1 %v4320_v1 }
0x48ce   :  { %3869 = vmatpush3.bf16.msra.mxu1 %v4929_v28 }
0x48cf   :  { %3874 = vmatprep.subr.bf16.mxu1 %v4320_v1 }
0x499c   :  { %v2801_v37 = vpop.f32.mrb[60].mxu1 }
0x499d   :  { %v3905_v40 = vadd.f32 %v3904_v35, %v2801_v37  ;;  %v3842_v41 = vpop.f32.mrb[61].mxu1 }
0x499e   :  { %v2804_v43 = vpop.f32.mrb[62].mxu1 }
0x499f   :  { %4123 = vtanh.f32 %v3905_v40  ;;  %v3843_v44 = vpop.f32.mrb[63].mxu1  ;;  %v3432_v56 = vmul.f32 -1.442695, %v3905_v40 }
0x49a1   :  { %4125 = vpow2.f32 %v3432_v56 }
0x49a9   :  { %v4124_v25 = vpop.eup %4123 }
0x49aa   :  { %2817 = vrot.lane.b32.xlu0 %v4124_v25, %s4322_s4 }
0x49ab   :  { %v4126_v38 = vpop.eup %4125 }
0x49ac   :  { %v2811_v47 = vadd.f32 1.0, %v4126_v38 }
0x49ae   :  { %4127 = vrcp.f32 %v2811_v47 }
0x49b8   :  { %v4128_v32 = vpop.eup %4127 }
0x49b9   :  { %v2815_v50 = vmul.f32 %v4128_v32, %v5106_v55 }
0x4a1c   :  { %v2818_v49 = vpop.permute.xlu0 %2817 }
0x4a1d   :  { %v2820_v5 = vmul.f32 %v4128_v32, %v2818_v49 }
0x4a1f   :  { %2822 = vrot.lane.b32.xlu1 %v2820_v5, %s4323_s26 }
0x4a91   :  { %v2823_v51 = vpop.permute.xlu1 %2822 }
0x4a92   :  { %v5147_v53 = vadd.f32 %v2823_v51, %v2815_v50 }
0x4a94   :  { %4129 = vtanh.f32 %v5147_v53 }
0x4a9e   :  { %v4130_v0 = vpop.eup %4129 }
0x4a9f   :  { %2828 = vrot.lane.b32.xlu1 %v4130_v0, %s4322_s4 }
0x4b11   :  { %v2829_v7 = vpop.permute.xlu1 %2828 }
0x4b12   :  { %v2831_v57 = vmul.f32 %v4128_v32, %v2829_v7 }
0x4b14   :  { %v2832_v58 = vpack.c.bf16 %v2831_v57, %v2831_v57 }
0x4b16   :  { %2834 = vrot.lane.b32.xlu0 %v2832_v58, %s4323_s26 }
0x4b88   :  { %v2835_v21 = vpop.permute.xlu0 %2834 }
0x4b89   :  { %3849 = vmatmul.mubr.msk.bf16.vlgmr.msra.gmra.mrb[60].mxu0 %vm134_vm3, %v2835_v21 }
0x4b8a   :  { %3853 = vmatpush3.bf16.msra.mxu0 %v4959_v54  ;;  %3854 = vmatprep.mubr.msk.bf16.mxu0 %vm4321_vm0, %v4320_v1 }
0x4b8b   :  { %3858 = vmatprep.subr.bf16.mxu0 %v4320_v1 }
0x4c5c   :  { %v2873_v55 = vpop.f32.mrb[60].mxu0 }
0x4c5d   :  { %v5158_v4 = vadd.f32 %v4946_v36, %v2873_v55  ;;  %v3850_v59 = vpop.f32.mrb[61].mxu0 }
0x4c5e   :  { %v2876_v52 = vpop.f32.mrb[62].mxu0 }
0x4c5f   :  { %v3851_v61 = vpop.f32.mrb[63].mxu0  ;;  %v2879_v45 = vsel %vm1829_vm8, %v5158_v4, -inf }
0x4c60   :  { %2880 = vmax.xlane.f32.xlu1 %v2879_v45 }
0x4ced   :  { %v5162_v29 = vpop.xlane.xlu1 %2880 }
0x4cee   :  { %vm2911_vm14 = vcmp.eq.f32.partialorder %v5158_v4, %v5162_v29 }
0x4cef   :  { %v2912_v22 = vsel %vm2911_vm14, %v4486_v11, 8 }
0x4cf0   :  { %v2913_v2 = vsel %vm1829_vm8, %v2912_v22, 2147483647 }
0x4cf1   :  { %v2915_v3 = vshra.s32 %v2913_v2, 16  ;;  %v2914_v9 = vand.u32 65535, %v2913_v2 }
0x4cf3   :  { %v2917_v6 = vcvt.s32.f32 %v2915_v3  ;;  %v2916_v14 = vcvt.s32.f32 %v2914_v9 }
0x4cf5   :  { %2918 = vmin.xlane.f32.xlu0 %v2917_v6 }
0x4d82   :  { %v2919_v13 = vpop.xlane.xlu0 %2918 }
0x4d83   :  { %vm2920_vm15 = vcmp.eq.f32.partialorder %v2917_v6, %v2919_v13  ;;  %v2925_v16 = vcvt.f32.s32 %v2919_v13 }
0x4d84   :  { %v2921_v15 = vsel %vm2920_vm15, %v2916_v14, inf  ;;  %vm2684_vm15 = vcmask 320768  }
0x4d85   :  { %2922 = vmin.xlane.f32.xlu0 %v2921_v15  ;;  %v2926_v20 = vshll.u32 %v2925_v16, 16 }
0x4e12   :  { %v2923_v18 = vpop.xlane.xlu0 %2922 }
0x4e13   :  { %v2924_v19 = vcvt.f32.s32 %v2923_v18 }
0x4e15   :  { %v2927_v24 = vadd.s32 %v2926_v20, %v2924_v19  ;;  %v3185_v19 = vld [vmem:[#allocation5 + $0xe] sm:$0x3] }
0x4e17   :  { %vm2928_vm1 = vcmp.eq.s32.totalorder %v4486_v11, %v2927_v24  ;;  %v4195_v24 = vld [vmem:[#allocation12] ss:$0 sm:$0xff] }
0x4e18   :  { %v3435_v27 = vsel %vm2928_vm1, 1.0, %v4320_v1  ;;  %vm2894_vm1 = vcmask 386368  }
0x4e19   :  { %v2931_v30 = vpack.c.bf16 %v3435_v27, %v3435_v27  ;;  %v3908_v27 = vadd.f32 %v4195_v24, %v3185_v19 }
0x4e1b   :  { %3855 = vmatmul.mubr.msk.bf16.vlgmr.msra.gmra.mrb[64].mxu0 %vm1877_vm13, %v2931_v30 }
0x4e1c   :  { %3859 = vmatpush3.bf16.msra.mxu0 %v4869_v48  ;;  %3862 = vmatprep.mubr.msk.bf16.mxu0 %vm4321_vm0, %v4320_v1 }
0x4e1d   :  { %3860 = vmatprep.subr.bf16.mxu0 %v4320_v1 }
0x4e20   :  { %3861 = vmatpush3.bf16.msra.mxu0 %v4875_v12 }
0x4e21   :  { %3888 = vmatprep.subr.bf16.mxu0 %v4320_v1 }
0x4e27   :  { %3863 = vmatmul.mubr.msk.bf16.vlgmr.msra.gmra.mrb[64].mxu0 %vm134_vm3, %v2835_v21 }
0x4e28   :  { %3889 = vmatpush3.bf16.msra.mxu0 %v4923_v26  ;;  %3892 = vmatprep.mubr.msk.bf16.mxu0 %vm4321_vm0, %v4320_v1 }
0x4e29   :  { %3890 = vmatprep.subr.bf16.mxu0 %v4320_v1 }
0x4e2c   :  { %3891 = vmatpush3.bf16.msra.mxu0 %v4929_v28 }
0x4efa   :  { %v3011_v35 = vpop.f32.mrb[64].mxu0 }
0x4efb   :  { %v3907_v37 = vadd.f32 %v3906_v34, %v3011_v35  ;;  %v3864_v40 = vpop.f32.mrb[65].mxu0 }
0x4efc   :  { %v3014_v41 = vpop.f32.mrb[66].mxu0 }
0x4efd   :  { %4131 = vtanh.f32 %v3907_v37  ;;  %v3865_v43 = vpop.f32.mrb[67].mxu0  ;;  %v3438_v26 = vmul.f32 -1.442695, %v3907_v37 }
0x4eff   :  { %4133 = vpow2.f32 %v3438_v26 }
0x4f07   :  { %v4132_v44 = vpop.eup %4131 }
0x4f08   :  { %3027 = vrot.lane.b32.xlu1 %v4132_v44, %s4322_s4 }
0x4f09   :  { %v4134_v25 = vpop.eup %4133 }
0x4f0a   :  { %v3021_v56 = vadd.f32 1.0, %v4134_v25 }
0x4f0c   :  { %4135 = vrcp.f32 %v3021_v56 }
0x4f16   :  { %v4136_v38 = vpop.eup %4135 }
0x4f17   :  { %v3025_v42 = vmul.f32 %v4136_v38, %v5147_v53 }
0x4f7a   :  { %v3028_v47 = vpop.permute.xlu1 %3027 }
0x4f7b   :  { %v3030_v28 = vmul.f32 %v4136_v38, %v3028_v47  ;;  %v1833_v47 = vsub.f32 %v4949_v39, %v4953_v46 }
0x4f7d   :  { %3032 = vrot.lane.b32.xlu0 %v3030_v28, %s4323_s26  ;;  %v1834_v28 = vmul.f32 1.442695, %v1833_v47  ;;  %v3446_v47 = vld [vmem:[%s5393_s1 + $0xe] sm:$0x3] }
0x4fef   :  { %v3033_v32 = vpop.permute.xlu0 %3032 }
0x4ff0   :  { %v5187_v49 = vadd.f32 %v3033_v32, %v3025_v42  ;;  %v2042_v42 = vsub.f32 %v4994_v23, %v4998_v33 }
0x4ff2   :  { %4137 = vtanh.f32 %v5187_v49  ;;  %v2043_v32 = vmul.f32 1.442695, %v2042_v42  ;;  %v2882_v42 = vsub.f32 %v5158_v4, %v5162_v29 }
0x4ffc   :  { %v4138_v5 = vpop.eup %4137 }
0x4ffd   :  { %3038 = vrot.lane.b32.xlu1 %v4138_v5, %s4322_s4 }
0x506f   :  { %v3039_v50 = vpop.permute.xlu1 %3038 }
0x5070   :  { %v3041_v51 = vmul.f32 %v4136_v38, %v3039_v50 }
0x5072   :  { %v3042_v0 = vpack.c.bf16 %v3041_v51, %v3041_v51 }
0x5074   :  { %3044 = vrot.lane.b32.xlu1 %v3042_v0, %s4323_s26 }
0x50e6   :  { %v3045_v7 = vpop.permute.xlu1 %3044 }
0x50e7   :  { %3871 = vmatmul.mubr.msk.bf16.vlgmr.msra.gmra.mrb[64].mxu1 %vm134_vm3, %v3045_v7 }
0x50e8   :  { %3875 = vmatpush3.bf16.msra.mxu1 %v4959_v54  ;;  %3876 = vmatprep.mubr.msk.bf16.mxu1 %vm4321_vm0, %v4320_v1 }
0x50e9   :  { %3880 = vmatprep.subr.bf16.mxu1 %v4320_v1 }
0x51ba   :  { %v3083_v53 = vpop.f32.mrb[64].mxu1 }
0x51bb   :  { %v5198_v57 = vadd.f32 %v4946_v36, %v3083_v53  ;;  %v3872_v58 = vpop.f32.mrb[65].mxu1 }
0x51bc   :  { %v3086_v21 = vpop.f32.mrb[66].mxu1  ;;  %v1845_v58 = vld [vmem:[%s5393_s1] sm:$0x3] }
0x51bd   :  { %v3873_v55 = vpop.f32.mrb[67].mxu1  ;;  %v3089_v59 = vsel %vm1829_vm8, %v5198_v57, -inf }
0x51be   :  { %3090 = vmax.xlane.f32.xlu0 %v3089_v59 }
0x524b   :  { %v5202_v52 = vpop.xlane.xlu0 %3090 }
0x524c   :  { %vm3121_vm2 = vcmp.eq.f32.partialorder %v5198_v57, %v5202_v52 }
0x524d   :  { %v3122_v54 = vsel %vm3121_vm2, %v4486_v11, 8  ;;  %vm3104_vm2 = vcmask 451968  }
0x524e   :  { %v3123_v61 = vsel %vm1829_vm8, %v3122_v54, 2147483647 }
0x524f   :  { %v3125_v45 = vshra.s32 %v3123_v61, 16  ;;  %v3124_v36 = vand.u32 65535, %v3123_v61 }
0x5251   :  { %v3127_v22 = vcvt.s32.f32 %v3125_v45  ;;  %v3126_v3 = vcvt.s32.f32 %v3124_v36 }
0x5253   :  { %3128 = vmin.xlane.f32.xlu1 %v3127_v22 }
0x52e0   :  { %v3129_v2 = vpop.xlane.xlu1 %3128 }
0x52e1   :  { %vm3130_vm4 = vcmp.eq.f32.partialorder %v3127_v22, %v3129_v2  ;;  %v3135_v9 = vcvt.f32.s32 %v3129_v2 }
0x52e2   :  { %v3131_v6 = vsel %vm3130_vm4, %v3126_v3, inf  ;;  %vm3331_vm4 = vcmask 1041408  }
0x52e3   :  { %3132 = vmin.xlane.f32.xlu0 %v3131_v6  ;;  %v3136_v14 = vshll.u32 %v3135_v9, 16  ;;  %v3410_v6 = vld [vmem:[%s5393_s1 + $0x2] sm:$0x3]  ;;  %v2252_v9 = vsub.f32 %v5035_v10, %v5039_v17 }
0x5370   :  { %v3133_v13 = vpop.xlane.xlu0 %3132 }
0x5371   :  { %v3134_v15 = vcvt.f32.s32 %v3133_v13  ;;  %v2253_v13 = vmul.f32 1.442695, %v2252_v9 }
0x5373   :  { %v3137_v16 = vadd.s32 %v3136_v14, %v3134_v15 }
0x5375   :  { %vm3138_vm5 = vcmp.eq.s32.totalorder %v4486_v11, %v3137_v16 }
0x5376   :  { %v3441_v18 = vsel %vm3138_vm5, 1.0, %v4320_v1  ;;  %vm3340_vm5 = vcmask 0  }
0x5377   :  { %v3141_v20 = vpack.c.bf16 %v3441_v18, %v3441_v18  ;;  %v3422_v18 = vld [vmem:[%s5393_s1 + $0x6] sm:$0x3] }
0x5379   :  { %3877 = vmatmul.mubr.msk.bf16.vlgmr.msra.gmra.mrb[68].mxu1 %vm1877_vm13, %v3141_v20 }
0x537a   :  { %3881 = vmatpush3.bf16.msra.mxu1 %v4869_v48  ;;  %3884 = vmatprep.mubr.msk.bf16.mxu1 %vm4321_vm0, %v4320_v1 }
0x537b   :  { %3882 = vmatprep.subr.bf16.mxu1 %v4320_v1 }
0x537e   :  { %3883 = vmatpush3.bf16.msra.mxu1 %v4875_v12 }
0x5385   :  { %3885 = vmatmul.mubr.msk.bf16.vlgmr.msra.gmra.mrb[68].mxu1 %vm134_vm3, %v3045_v7 }
0x5458   :  { %v3221_v30 = vpop.f32.mrb[68].mxu1 }
0x5459   :  { %v3909_v31 = vadd.f32 %v3908_v27, %v3221_v30  ;;  %v3886_v34 = vpop.f32.mrb[69].mxu1 }
0x545a   :  { %v3224_v35 = vpop.f32.mrb[70].mxu1 }
0x545b   :  { %4139 = vtanh.f32 %v3909_v31  ;;  %v3887_v37 = vpop.f32.mrb[71].mxu1  ;;  %v3444_v48 = vmul.f32 -1.442695, %v3909_v31 }
0x545d   :  { %4141 = vpow2.f32 %v3444_v48 }
0x5465   :  { %v4140_v40 = vpop.eup %4139 }
0x5466   :  { %3237 = vrot.lane.b32.xlu0 %v4140_v40, %s4322_s4  ;;  %v4196_v40 = vld [vmem:[%s5405_s13] ss:$0 sm:$0xff] }
0x5467   :  { %v4142_v41 = vpop.eup %4141 }
0x5468   :  { %v3231_v1 = vadd.f32 1.0, %v4142_v41 }
0x546a   :  { %4143 = vrcp.f32 %v3231_v1 }
0x5474   :  { %v4144_v12 = vpop.eup %4143 }
0x5475   :  { %v3235_v26 = vmul.f32 %v4144_v12, %v5187_v49 }
0x54d8   :  { %v3238_v43 = vpop.permute.xlu0 %3237 }
0x54d9   :  { %v3240_v44 = vmul.f32 %v4144_v12, %v3238_v43 }
0x54db   :  { %3242 = vrot.lane.b32.xlu1 %v3240_v44, %s4323_s26 }
0x554d   :  { %v3243_v25 = vpop.permute.xlu1 %3242 }
0x554e   :  { %v3245_v56 = vadd.f32 %v3243_v25, %v3235_v26  ;;  %v3428_v26 = vld [vmem:[%s5393_s1 + $0x8] sm:$0x3]  ;;  %v3434_v25 = vld [vmem:[%s5393_s1 + $0xa] sm:$0x3] }
0x5550   :  { %4145 = vtanh.f32 %v3245_v56  ;;  %v3440_v56 = vld [vmem:[%s5393_s1 + $0xc] sm:$0x3] }
0x5551   :  { %4147 = vpow2.f32 %v1834_v28 }
0x5552   :  { %4149 = vpow2.f32 %v2043_v32  ;;  %v2883_v32 = vmul.f32 1.442695, %v2882_v42 }
0x555a   :  { %v4146_v38 = vpop.eup %4145 }
0x555b   :  { %3248 = vrot.lane.b32.xlu1 %v4146_v38, %s4322_s4  ;;  %v4148_v5 = vpop.eup %4147  ;;  %v2672_v38 = vsub.f32 %v5117_v60, %v5121_v63 }
0x555c   :  { %v1836_v50 = vsel %vm1829_vm8, %v4148_v5, 0.0  ;;  %v4150_v49 = vpop.eup %4149 }
0x555d   :  { %v2045_v51 = vsel %vm1829_vm8, %v4150_v49, 0.0  ;;  %v2673_v28 = vmul.f32 1.442695, %v2672_v38 }
0x557f   :  { %1837 = vadd.xlane.f32.xlu1 %v1836_v50 }
0x5583   :  { %2046 = vadd.xlane.f32.xlu1 %v2045_v51 }
0x55cd   :  { %v3249_v0 = vpop.permute.xlu1 %3248 }
0x55ce   :  { %v3251_v7 = vmul.f32 %v4144_v12, %v3249_v0 }
0x55d0   :  { %v3252_v53 = vpack.c.bf16 %v3251_v7, %v3251_v7 }
0x55d2   :  { %3254 = vrot.lane.b32.xlu0 %v3252_v53, %s4323_s26 }
0x55d6   :  { %1847 = vperm.xlu0 %3954, %v1845_v58  }
0x560c   :  { %v1838_v21 = vpop.xlane.xlu1 %1837 }
0x560d   :  { %4151 = vrcp.f32 %v1838_v21 }
0x5610   :  { %v5231_v55 = vpop.xlane.xlu1 %2046 }
0x5611   :  { %4153 = vrcp.f32 %v5231_v55 }
0x5612   :  { %4155 = vpow2.f32 %v2253_v13 }
0x5613   :  { %4157 = vlog2.f32 %v1838_v21 }
0x5617   :  { %v4152_v59 = vpop.eup %4151 }
0x5618   :  { %v1840_v54 = vmul.f32 %v4152_v59, %v4148_v5  ;;  %v3092_v5 = vsub.f32 %v5198_v57, %v5202_v52 }
0x561a   :  { %1841 = vst.msk [vmem:[%s5406_s14] sm:$0x3] %vm1829_vm8, %v1840_v54  ;;  %v3093_v51 = vmul.f32 1.442695, %v3092_v5 }
0x561b   :  { %v4154_v61 = vpop.eup %4153 }
0x561c   :  { %v2049_v45 = vmul.f32 %v4154_v61, %v4150_v49  ;;  %v4156_v14 = vpop.eup %4155  ;;  %v2462_v49 = vsub.f32 %v5076_v62, %v5080_v8 }
0x561d   :  { %v2255_v15 = vsel %vm1829_vm8, %v4156_v14, 0.0  ;;  %v4158_v20 = vpop.eup %4157 }
0x561e   :  { %2051 = vrot.lane.b32.xlu1 %v2049_v45, %s4325_s20  ;;  %v1843_v19 = vmul.f32 0.6931472, %v4158_v20  ;;  %v2463_v7 = vmul.f32 1.442695, %v2462_v49 }
0x5620   :  { %v5258_v24 = vadd.f32 %v1843_v19, %v4953_v46 }
0x5644   :  { %v3255_v22 = vpop.permute.xlu0 %3254 }
0x5645   :  { %3893 = vmatmul.mubr.msk.bf16.vlgmr.msra.gmra.mrb[68].mxu0 %vm134_vm3, %v3255_v22  ;;  %vm2054_vm3 = vcmask 123968  }
0x5655   :  { %v1848_v36 = vpop.permute.xlu0 %1847 }
0x5656   :  { %vm1849_vm0 = vcmp.eq.s32.totalorder %v4486_v11, %v1848_v36 }
0x5657   :  { %v1850_v2 = vsel %vm1849_vm0, %v4949_v39, 0.0  ;;  %v3416_v39 = vld [vmem:[%s5393_s1 + $0x4] sm:$0x3] }
0x5658   :  { %v1851_v3 = vsel %vm1829_vm8, %v1850_v2, 0.0 }
0x5659   :  { %1852 = vadd.xlane.f32.xlu0 %v1851_v3 }
0x566f   :  { %2062 = vperm.xlu0 %3954, %v3410_v6  }
0x568e   :  { %2256 = vadd.xlane.f32.xlu0 %v2255_v15 }
0x5690   :  { %v2052_v16 = vpop.permute.xlu1 %2051 }
0x5691   :  { %2055 = vst.msk [vmem:[%s5406_s14] sm:$0x3] %vm2054_vm3, %v2052_v16 }
0x56a4   :  { %2272 = vperm.xlu0 %3954, %v3416_v39  }
0x56a8   :  { %2482 = vperm.xlu0 %3954, %v3422_v18  }
0x56e6   :  { %v5260_v27 = vpop.xlane.xlu0 %1852 }
0x56e7   :  { %v1854_v30 = vsub.f32 %v5258_v24, %v5260_v27 }
0x56ee   :  { %v2063_v31 = vpop.permute.xlu0 %2062 }
0x56ef   :  { %vm2064_vm13 = vcmp.eq.s32.totalorder %v4486_v11, %v2063_v31 }
0x56f0   :  { %v2065_v34 = vsel %vm2064_vm13, %v4994_v23, 0.0 }
0x56f1   :  { %v2066_v35 = vsel %vm1829_vm8, %v2065_v34, 0.0 }
0x56f2   :  { %2067 = vadd.xlane.f32.xlu1 %v2066_v35 }
0x5718   :  { %v3293_v37 = vpop.f32.mrb[68].mxu0 }
0x5719   :  { %v5270_v46 = vadd.f32 %v4196_v40, %v3293_v37  ;;  %v3894_v48 = vpop.f32.mrb[69].mxu0 }
0x571a   :  { %v3296_v41 = vpop.f32.mrb[70].mxu0 }
0x571b   :  { %v5272_v1 = vpop.xlane.xlu0 %2256  ;;  %v3895_v12 = vpop.f32.mrb[71].mxu0  ;;  %v3299_v43 = vsel %vm1829_vm8, %v5270_v46, -inf }
0x571c   :  { %4159 = vrcp.f32 %v5272_v1  ;;  %3300 = vmax.xlane.f32.xlu0 %v3299_v43 }
0x571d   :  { %4161 = vpow2.f32 %v2673_v28 }
0x571e   :  { %4163 = vpow2.f32 %v2883_v32 }
0x571f   :  { %4165 = vpow2.f32 %v3093_v51 }
0x5720   :  { %4167 = vpow2.f32 %v2463_v7 }
0x5721   :  { %4169 = vlog2.f32 %v5231_v55 }
0x5723   :  { %v2273_v50 = vpop.permute.xlu0 %2272 }
0x5724   :  { %vm2274_vm6 = vcmp.eq.s32.totalorder %v4486_v11, %v2273_v50 }
0x5725   :  { %v2275_v0 = vsel %vm2274_vm6, %v5035_v10, 0.0 }
0x5726   :  { %v4160_v23 = vpop.eup %4159  ;;  %v2276_v53 = vsel %vm1829_vm8, %v2275_v0, 0.0 }
0x5727   :  { %v2259_v44 = vmul.f32 %v4160_v23, %v4156_v14  ;;  %v5301_v58 = vpop.eup %4161  ;;  %v2483_v10 = vpop.permute.xlu0 %2482 }
0x5728   :  { %v2675_v21 = vsel %vm1829_vm8, %v5301_v58, 0.0  ;;  %v5305_v59 = vpop.eup %4163  ;;  %vm2484_vm7 = vcmp.eq.s32.totalorder %v4486_v11, %v2483_v10 }
0x5729   :  { %2261 = vrot.lane.b32.xlu1 %v2259_v44, %s4324_s10  ;;  %v2885_v54 = vsel %vm1829_vm8, %v5305_v59, 0.0  ;;  %v5309_v61 = vpop.eup %4165  ;;  %v2485_v2 = vsel %vm2484_vm7, %v5076_v62, 0.0 }
0x572a   :  { %v3095_v45 = vsel %vm1829_vm8, %v5309_v61, 0.0  ;;  %v5313_v22 = vpop.eup %4167  ;;  %v2486_v3 = vsel %vm1829_vm8, %v2485_v2, 0.0 }
0x572b   :  { %v2465_v36 = vsel %vm1829_vm8, %v5313_v22, 0.0  ;;  %v4170_v6 = vpop.eup %4169 }
0x572c   :  { %v2057_v9 = vmul.f32 0.6931472, %v4170_v6 }
0x572e   :  { %v2058_v13 = vadd.f32 %v2057_v9, %v4998_v33 }
0x5732   :  { %2692 = vperm.xlu0 %3954, %v3428_v26  }
0x5736   :  { %2902 = vperm.xlu0 %3954, %v3434_v25  }
0x573a   :  { %3112 = vperm.xlu0 %3954, %v3440_v56  }
0x573e   :  { %3322 = vperm.xlu0 %3954, %v3446_v47  }
0x574d   :  { %2277 = vadd.xlane.f32.xlu1 %v2276_v53 }
0x5751   :  { %2676 = vadd.xlane.f32.xlu1 %v2675_v21 }
0x5755   :  { %2886 = vadd.xlane.f32.xlu1 %v2885_v54 }
0x5759   :  { %3096 = vadd.xlane.f32.xlu1 %v3095_v45 }
0x575d   :  { %2466 = vadd.xlane.f32.xlu0 %v2465_v36 }
0x5761   :  { %2487 = vadd.xlane.f32.xlu0 %v2486_v3 }
0x577f   :  { %v2068_v14 = vpop.xlane.xlu1 %2067 }
0x5780   :  { %v2069_v15 = vsub.f32 %v2058_v13, %v2068_v14 }
0x5782   :  { %v2070_v16 = vadd.f32 %v2069_v15, %v1854_v30 }
0x579b   :  { %v2262_v39 = vpop.permute.xlu1 %2261 }
0x579c   :  { %2265 = vst.msk [vmem:[%s5406_s14] sm:$0x3] %vm2264_vm9, %v2262_v39 }
0x57a9   :  { %v5328_v62 = vpop.xlane.xlu0 %3300 }
0x57aa   :  { %v3302_v55 = vsub.f32 %v5270_v46, %v5328_v62 }
0x57ac   :  { %v3303_v18 = vmul.f32 1.442695, %v3302_v55 }
0x57ae   :  { %4171 = vpow2.f32 %v3303_v18 }
0x57af   :  { %4173 = vlog2.f32 %v5272_v1 }
0x57b1   :  { %v2693_v33 = vpop.permute.xlu0 %2692 }
0x57b2   :  { %vm2694_vm10 = vcmp.eq.s32.totalorder %v4486_v11, %v2693_v33 }
0x57b3   :  { %v2695_v20 = vsel %vm2694_vm10, %v5117_v60, 0.0 }
0x57b4   :  { %v2696_v19 = vsel %vm1829_vm8, %v2695_v20, 0.0 }
0x57b5   :  { %2697 = vadd.xlane.f32.xlu0 %v2696_v19  ;;  %v2903_v24 = vpop.permute.xlu0 %2902 }
0x57b6   :  { %vm2904_vm11 = vcmp.eq.s32.totalorder %v4486_v11, %v2903_v24 }
0x57b7   :  { %v2905_v27 = vsel %vm2904_vm11, %v5158_v4, 0.0 }
0x57b8   :  { %v5337_v30 = vpop.eup %4171  ;;  %v2906_v31 = vsel %vm1829_vm8, %v2905_v27, 0.0 }
0x57b9   :  { %2907 = vadd.xlane.f32.xlu0 %v2906_v31  ;;  %v3113_v34 = vpop.permute.xlu0 %3112  ;;  %v3305_v35 = vsel %vm1829_vm8, %v5337_v30, 0.0  ;;  %v4174_v4 = vpop.eup %4173 }
0x57ba   :  { %3306 = vadd.xlane.f32.xlu1 %v3305_v35  ;;  %v2267_v48 = vmul.f32 0.6931472, %v4174_v4  ;;  %vm3114_vm14 = vcmp.eq.s32.totalorder %v4486_v11, %v3113_v34 }
0x57bb   :  { %v3115_v53 = vsel %vm3114_vm14, %v5198_v57, 0.0 }
0x57bc   :  { %v2268_v41 = vadd.f32 %v2267_v48, %v5039_v17 }
0x57bd   :  { %v3323_v37 = vpop.permute.xlu0 %3322 }
0x57be   :  { %vm3324_vm12 = vcmp.eq.s32.totalorder %v4486_v11, %v3323_v37 }
0x57bf   :  { %v3325_v60 = vsel %vm3324_vm12, %v5270_v46, 0.0 }
0x57c0   :  { %v3326_v40 = vsel %vm1829_vm8, %v3325_v60, 0.0 }
0x57c1   :  { %3327 = vadd.xlane.f32.xlu0 %v3326_v40 }
0x57da   :  { %v2278_v12 = vpop.xlane.xlu1 %2277 }
0x57db   :  { %v2279_v43 = vsub.f32 %v2268_v41, %v2278_v12 }
0x57dd   :  { %v2280_v23 = vadd.f32 %v2279_v43, %v2070_v16 }
0x57de   :  { %v2677_v44 = vpop.xlane.xlu1 %2676 }
0x57df   :  { %4175 = vrcp.f32 %v2677_v44 }
0x57e2   :  { %v2887_v26 = vpop.xlane.xlu1 %2886 }
0x57e3   :  { %4177 = vrcp.f32 %v2887_v26 }
0x57e6   :  { %v5347_v25 = vpop.xlane.xlu1 %3096 }
0x57e7   :  { %4179 = vrcp.f32 %v5347_v25 }
0x57e9   :  { %v4176_v46 = vpop.eup %4175 }
0x57ea   :  { %v2467_v56 = vpop.xlane.xlu0 %2466  ;;  %v2679_v38 = vmul.f32 %v4176_v46, %v5301_v58  ;;  %v3116_v58 = vsel %vm1829_vm8, %v3115_v53, 0.0  ;;  %vm2474_vm8 = vcmask 255168  }
0x57eb   :  { %4181 = vrcp.f32 %v2467_v56 }
0x57ec   :  { %4183 = vlog2.f32 %v2467_v56  ;;  %2681 = vrot.lane.b32.xlu0 %v2679_v38, %s4323_s26  ;;  %s4329_s26 = smov 56  }
0x57ed   :  { %v4178_v17 = vpop.eup %4177  ;;  %4185 = vlog2.f32 %v2677_v44 }
0x57ee   :  { %v2889_v1 = vmul.f32 %v4178_v17, %v5305_v59  ;;  %v2488_v51 = vpop.xlane.xlu0 %2487  ;;  %4187 = vlog2.f32 %v2887_v26 }
0x57f0   :  { %2891 = vrot.lane.b32.xlu0 %v2889_v1, %s4326_s29 }
0x57f1   :  { %v4180_v47 = vpop.eup %4179 }
0x57f2   :  { %v3099_v28 = vmul.f32 %v4180_v47, %v5309_v61 }
0x57f4   :  { %3101 = vrot.lane.b32.xlu0 %v3099_v28, %s4327_s12 }
0x57f5   :  { %v4182_v42 = vpop.eup %4181 }
0x57f6   :  { %v4184_v32 = vpop.eup %4183  ;;  %v2469_v5 = vmul.f32 %v4182_v42, %v5313_v22 }
0x57f7   :  { %v2477_v50 = vmul.f32 0.6931472, %v4184_v32  ;;  %v4186_v21 = vpop.eup %4185 }
0x57f8   :  { %2471 = vrot.lane.b32.xlu1 %v2469_v5, %s4328_s0  ;;  %v2687_v59 = vmul.f32 0.6931472, %v4186_v21  ;;  %v4188_v54 = vpop.eup %4187 }
0x57f9   :  { %v2478_v49 = vadd.f32 %v2477_v50, %v5080_v8  ;;  %v2897_v10 = vmul.f32 0.6931472, %v4188_v54 }
0x57fa   :  { %v2688_v61 = vadd.f32 %v2687_v59, %v5121_v63 }
0x57fb   :  { %v2489_v0 = vsub.f32 %v2478_v49, %v2488_v51  ;;  %v2898_v36 = vadd.f32 %v2897_v10, %v5162_v29 }
0x57fd   :  { %v2490_v7 = vadd.f32 %v2489_v0, %v2280_v23 }
0x581c   :  { %3117 = vadd.xlane.f32.xlu1 %v3116_v58 }
0x5842   :  { %v2698_v45 = vpop.xlane.xlu0 %2697 }
0x5843   :  { %v2699_v8 = vsub.f32 %v2688_v61, %v2698_v45 }
0x5845   :  { %v2700_v22 = vadd.f32 %v2699_v8, %v2490_v7 }
0x5846   :  { %v2908_v2 = vpop.xlane.xlu0 %2907 }
0x5847   :  { %v2909_v11 = vsub.f32 %v2898_v36, %v2908_v2  ;;  %v3307_v3 = vpop.xlane.xlu1 %3306 }
0x5848   :  { %4189 = vrcp.f32 %v3307_v3 }
0x5849   :  { %v2910_v57 = vadd.f32 %v2909_v11, %v2700_v22  ;;  %4191 = vlog2.f32 %v3307_v3 }
0x584a   :  { %4193 = vlog2.f32 %v5347_v25 }
0x584e   :  { %v3328_v15 = vpop.xlane.xlu0 %3327 }
0x5852   :  { %v4190_v6 = vpop.eup %4189 }
0x5853   :  { %v4192_v9 = vpop.eup %4191  ;;  %v3309_v13 = vmul.f32 %v4190_v6, %v5337_v30 }
0x5854   :  { %v3317_v14 = vmul.f32 0.6931472, %v4192_v9 }
0x5855   :  { %3311 = vrot.lane.b32.xlu0 %v3309_v13, %s4329_s26 }
0x5856   :  { %v3318_v63 = vadd.f32 %v3317_v14, %v5328_v62  ;;  %v4194_v62 = vpop.eup %4193 }
0x5857   :  { %v3107_v33 = vmul.f32 0.6931472, %v4194_v62 }
0x5858   :  { %v3329_v16 = vsub.f32 %v3318_v63, %v3328_v15 }
0x5859   :  { %v3108_v20 = vadd.f32 %v3107_v33, %v5202_v52 }
0x585e   :  { %v2682_v39 = vpop.permute.xlu0 %2681 }
0x5862   :  { %v2892_v55 = vpop.permute.xlu0 %2891 }
0x5866   :  { %v3102_v18 = vpop.permute.xlu0 %3101 }
0x586a   :  { %v2472_v29 = vpop.permute.xlu1 %2471 }
0x586b   :  { %2475 = vst.msk [vmem:[%s5406_s14] sm:$0x3] %vm2474_vm8, %v2472_v29 }
0x586c   :  { %2685 = vst.msk [vmem:[%s5406_s14] sm:$0x3] %vm2684_vm15, %v2682_v39 }
0x586d   :  { %2895 = vst.msk [vmem:[%s5406_s14] sm:$0x3] %vm2894_vm1, %v2892_v55 }
0x586e   :  { %3105 = vst.msk [vmem:[%s5406_s14] sm:$0x3] %vm3104_vm2, %v3102_v18 }
0x58a9   :  { %v3118_v19 = vpop.xlane.xlu1 %3117 }
0x58aa   :  { %v3119_v24 = vsub.f32 %v3108_v20, %v3118_v19 }
0x58ac   :  { %v3120_v27 = vadd.f32 %v3119_v24, %v2910_v57 }
0x58ae   :  { %v3330_v30 = vadd.f32 %v3329_v16, %v3120_v27 }
0x58b0   :  { %v3332_v31 = vsel %vm3331_vm4, %v3330_v30, 0.0 }
0x58b1   :  { %v3333_v34 = vrot.slane %v3332_v31, 4 }
0x58b3   :  { %v3334_v35 = vadd.f32 %v3333_v34, %v3332_v31 }
0x58b5   :  { %v3335_v37 = vrot.slane %v3334_v35, 2 }
0x58b7   :  { %v3336_v60 = vadd.f32 %v3335_v37, %v3334_v35 }
0x58b9   :  { %v3337_v40 = vrot.slane %v3336_v60, 1 }
0x58bb   :  { %v3338_v4 = vadd.f32 %v3337_v40, %v3336_v60 }
0x58bd   :  { %v3339_v48 = vmul.f32 0.5, %v3338_v4 }
0x58bf   :  { %3341 = vst.msk [vmem:[#allocation14] sm:$0x1] %vm3340_vm5, %v3339_v48 }
0x58c0   :  { %4296 = shalt.err (!%p4293_p8)
}
0x58c1   :  { %s4297_s11 = scalar_lea.hbm %s5407_s15, 16 }
0x58c2   :  { %p4298_p9 = scmp.ne.s32.totalorder %s5407_s15, %s4297_s11  ;;  %p4301_p10 = scmp.lt.u32.totalorder %s4297_s11, %s5407_s15 }
0x58c4   :  { %p4303_p11 = pnand %p4301_p10, %p4298_p9 }
0x58c6   :  { %4306 = shalt.err (!%p4303_p11)
}
0x58c7   :  { %3353 = dma.vmem_to_hbm [thread:$0]  %s3351_s9, 16, %s5407_s15, [#allocation8]   ;;  %vm3314_vm0 = vcmask 517568   ;;  %v3312_v52 = vpop.permute.xlu0 %3311 }
0x58c8   :  { %3315 = vst.msk [vmem:[%s5406_s14] sm:$0x3] %vm3314_vm0, %v3312_v52 }
0x58c9   :  { %4313 = dma.done.wait [#allocation8], 16  }
0x58ca   :  { %4314 = vsyncadd [#allocation8], 4294967280 }
0x58cb   :  { %3359 = vsyncpa [#allocation7], 1 }
0x58cc   :  { %3360 = vsyncpa [#allocation10], 1 }
0x58cd   :  { %3361 = vsyncpa [#allocation13], 1 }
0x58ce   :  { %3362 = vsyncpa [#allocation8], 1 }

</bundles_post_ra>
